<compile_context>
chip_gen: v7x
topology: tpu7x:2x2x1
jax: 0.10.0
libtpu: 0.0.40
codegen_flags: <defaults>
</compile_context>

<pallas_src>
import math
import numpy as np
import jax
import jax.numpy as jnp
from jax.experimental import pallas as pl
from jax.experimental.pallas import tpu as pltpu


# ---------------------------------------------------------------------------
# In-kernel math helpers.  erf via Abramowitz & Stegun 7.1.26 (|err| < 1.5e-7)
# so we do not rely on a lax.erf Mosaic lowering; matches torch's exact GELU.
# ---------------------------------------------------------------------------
def _erf(x):
    a1, a2, a3, a4, a5 = 0.254829592, -0.284496736, 1.421413741, -1.453152027, 1.061405429
    p = 0.3275911
    z = jnp.abs(x)
    t = 1.0 / (1.0 + p * z)
    poly = ((((a5 * t + a4) * t + a3) * t + a2) * t + a1) * t
    y = 1.0 - poly * jnp.exp(-z * z)
    return jnp.where(x >= 0, y, -y)


def _gelu(x):  # exact (erf-based) GELU == torch.nn.functional.gelu default
    return 0.5 * x * (1.0 + _erf(x * 0.7071067811865476))


def _sigmoid(x):
    return 1.0 / (1.0 + jnp.exp(-x))


def _layernorm(x, w, b, eps=1e-5):
    mu = jnp.mean(x, axis=-1, keepdims=True)
    var = jnp.mean((x - mu) ** 2, axis=-1, keepdims=True)
    return (x - mu) * jax.lax.rsqrt(var + eps) * w + b


def _image_view(stage_ref, C, S, k):
    """(C, S) raw-reshape ('NCHW, HW flattened') view of the (S, C) sequence
    block currently held in stage_ref; img[:, a*C:(a+1)*C] == seq[a::k, :]."""
    return jnp.concatenate(
        [stage_ref[pl.ds(a, C, stride=k), :] for a in range(k)], axis=1)


# ---------------------------------------------------------------------------
# Fused MixerLayer kernel (TokenMixer then ChannelMixer, x1 stays in VMEM)
# ---------------------------------------------------------------------------
def _mixer_kernel(x_ref, A_ref, convb_ref,
                  lnw1_ref, lnb1_ref, tw1t_ref, tb1c_ref, tw2t_ref, tb2c_ref,
                  gw1_ref, gb1c_ref, gw2_ref, gb2c_ref,
                  lnw2_ref, lnb2_ref, cw1_ref, cb1_ref, cw2_ref, cb2_ref,
                  o_ref, stage_ref):
    Bblk, S, C = x_ref.shape
    k = S // C

    # Hoist all weight/operand loads out of the (unrolled) per-batch loop so the
    # VMEM reads happen once per grid step even when B is folded into one block.
    A, convb = A_ref[...], convb_ref[...]
    lnw1, lnb1 = lnw1_ref[...], lnb1_ref[...]
    tw1t, tb1c = tw1t_ref[...], tb1c_ref[...]
    tw2t, tb2c = tw2t_ref[...], tb2c_ref[...]
    gw1, gb1c = gw1_ref[...], gb1c_ref[...]
    gw2, gb2c = gw2_ref[...], gb2c_ref[...]
    lnw2, lnb2 = lnw2_ref[...], lnb2_ref[...]
    cw1, cb1 = cw1_ref[...], cb1_ref[...]
    cw2, cb2 = cw2_ref[...], cb2_ref[...]

    for b in range(Bblk):                       # static unroll (Bblk is tiny)
        x = x_ref[b]                            # (S, C) sequence layout
        # ------------------------- TokenMixer -------------------------
        stage_ref[...] = x
        ximg = _image_view(stage_ref, C, S, k)  # (C, S) image layout
        # SpatialGate: ChannelPool = [max over C ; mean over C]
        pmax = jnp.max(ximg, axis=0, keepdims=True)        # (1, S)
        pmean = jnp.mean(ximg, axis=0, keepdims=True)      # (1, S)
        pv = jnp.concatenate([pmax, pmean], axis=1)        # (1, 2S)
        # 7x7 conv (pad 3, no bias) + BatchNorm(eval) as ONE stacked matmul
        conv = (jnp.dot(pv, A, preferred_element_type=jnp.float32)
                + convb)                                   # (1, S)
        gated = ximg * _sigmoid(conv)                      # (C, S)
        x_pre = x + gated.T                                # permute-back + residual
        xn = _layernorm(x_pre, lnw1, lnb1)
        # token-mixing MLP over S with pre-transposed weights (no activation
        # transposes): m.T = W2.T @ gelu(W1.T @ xn + b1.T) + b2.T
        h = _gelu(jnp.dot(tw1t, xn, preferred_element_type=jnp.float32)
                  + tb1c)                                  # (Et, C)
        m = (jnp.dot(tw2t, h, preferred_element_type=jnp.float32)
             + tb2c)                                       # (S, C)
        x1 = m + x                                         # (S, C)

        # ------------------------ ChannelMixer ------------------------
        stage_ref[...] = x1
        x1img = _image_view(stage_ref, C, S, k)            # (C, S)
        # ChannelGate: avg- and max-pool over spatial, both branches batched
        avg = jnp.mean(x1img, axis=1, keepdims=True)       # (C, 1)
        mx = jnp.max(x1img, axis=1, keepdims=True)         # (C, 1)
        pc = jnp.concatenate([avg, mx], axis=1)            # (C, 2)
        hg = jnp.maximum(
            jnp.dot(gw1, pc, preferred_element_type=jnp.float32)
            + gb1c, 0.0)                                   # (Cr, 2)
        att2 = (jnp.dot(gw2, hg, preferred_element_type=jnp.float32)
                + gb2c)                                    # (C, 2)
        att = att2[:, 0:1] + att2[:, 1:2]                  # (C, 1)  (= mlp(avg)+mlp(max))
        gated2 = x1img * _sigmoid(att)                     # (C, S)
        x1_pre = x1 + gated2.T                             # (S, C)
        xn2 = _layernorm(x1_pre, lnw2, lnb2)
        # channel-mixing MLP over C
        h2 = _gelu(jnp.dot(xn2, cw1, preferred_element_type=jnp.float32)
                   + cb1)                                  # (S, Ec)
        m2 = (jnp.dot(h2, cw2, preferred_element_type=jnp.float32)
              + cb2)                                       # (S, C)
        o_ref[b] = m2 + x1


# ---------------------------------------------------------------------------
# Wrappers / glue
# ---------------------------------------------------------------------------
def _tensorcores_per_chip():
    """Heuristic: 2 TCs on v4 / v5p / v7x, 1 on v5e / v6e.  Only affects the
    batch-folding choice; correctness is identical either way."""
    try:
        kind = jax.devices()[0].device_kind.lower()
    except Exception:
        return 1
    if ("v5 lite" in kind) or ("v5e" in kind) or ("v6" in kind):
        return 1
    if ("v4" in kind) or ("v5p" in kind) or ("v7" in kind) or ("7x" in kind):
        return 2
    return 1


def mixer_layer(x, ops, *, fold_batch=None):
    B, S, C = x.shape
    assert S % C == 0, "fused kernel requires num_features % num_patches == 0"
    if fold_batch is None:
        fold_batch = _tensorcores_per_chip() < 2   # fold B on single-TC chips
    Bblk = B if fold_batch else 1
    nb = B // Bblk
    Et = ops['tw1t'].shape[0]
    Ec = ops['cw1'].shape[1]
    Cr = ops['gw1'].shape[0]

    def rep(shape):  # replicated (weight) operand: same block every grid step
        return pl.BlockSpec(shape, lambda i: (0,) * len(shape))

    in_specs = [
        pl.BlockSpec((Bblk, S, C), lambda i: (i, 0, 0)),       # x
        rep((2 * S, S)), rep((1, S)),                          # conv operator, conv bias row
        rep((1, C)), rep((1, C)),                              # LayerNorm 1
        rep((Et, S)), rep((Et, 1)), rep((S, Et)), rep((S, 1)), # token MLP (pre-transposed)
        rep((Cr, C)), rep((Cr, 1)), rep((C, Cr)), rep((C, 1)), # ChannelGate MLP
        rep((1, C)), rep((1, C)),                              # LayerNorm 2
        rep((C, Ec)), rep((1, Ec)), rep((Ec, C)), rep((1, C)), # channel MLP
    ]
    return pl.pallas_call(
        _mixer_kernel,
        out_shape=jax.ShapeDtypeStruct((B, S, C), x.dtype),
        grid_spec=pltpu.PrefetchScalarGridSpec(
            num_scalar_prefetch=0,
            grid=(nb,),
            in_specs=in_specs,
            out_specs=pl.BlockSpec((Bblk, S, C), lambda i: (i, 0, 0)),
            scratch_shapes=[pltpu.VMEM((S, C), jnp.float32)],   # staging for raw reshape
        ),
        compiler_params=pltpu.CompilerParams(dimension_semantics=("parallel",)),
    )(x, ops['A'], ops['convb'],
      ops['lnw1'], ops['lnb1'], ops['tw1t'], ops['tb1c'], ops['tw2t'], ops['tb2c'],
      ops['gw1'], ops['gb1c'], ops['gw2'], ops['gb2c'],
      ops['lnw2'], ops['lnb2'], ops['cw1'], ops['cb1'], ops['cw2'], ops['cb2'])


def conv7x7_as_matmul(conv_w, H, W, bn_scale):
    """Lower Conv2d(2,1,7,pad=3,bias=False) + BN(eval) scale to a single stacked
    (2S, S) operator:  conv_flat = concat([max_flat, mean_flat], -1) @ A."""
    S = H * W
    A = np.zeros((2 * S, S), dtype=np.float32)
    wc = np.asarray(conv_w, dtype=np.float32)
    for ho in range(H):
        for wo in range(W):
            so = ho * W + wo
            for ky in range(7):
                hi = ho + ky - 3
                if hi < 0 or hi >= H:
                    continue
                for kx in range(7):
                    wi = wo + kx - 3
                    if wi < 0 or wi >= W:
                        continue
                    si = hi * W + wi
                    A[si, so] = wc[0, 0, ky, kx]        # channel 0 = max-pool
                    A[S + si, so] = wc[0, 1, ky, kx]    # channel 1 = mean-pool
    A *= bn_scale
    return jnp.asarray(A)


def prepare_operands(p, H, W):
    """Host-side, once-per-parameter-set prep (hoisted out of the forward path)."""
    S = H * W
    bn_scale = float(p['bn_gamma']) / math.sqrt(float(p['bn_rv']) + 1e-5)
    bn_bias = float(p['bn_beta']) - float(p['bn_rm']) * bn_scale
    return {
        'A': conv7x7_as_matmul(p['conv_w'], H, W, bn_scale),
        'convb': jnp.full((1, S), bn_bias, jnp.float32),   # BN bias folded into a bias row
        'lnw1': p['ln1_w'], 'lnb1': p['ln1_b'],
        'tw1t': jnp.transpose(p['tw1']), 'tb1c': jnp.transpose(p['tb1']),
        'tw2t': jnp.transpose(p['tw2']), 'tb2c': jnp.transpose(p['tb2']),
        'gw1': p['gw1'], 'gb1c': p['gb1'], 'gw2': p['gw2'], 'gb2c': p['gb2'],
        'lnw2': p['ln2_w'], 'lnb2': p['ln2_b'],
        'cw1': p['cw1'], 'cb1': p['cb1'], 'cw2': p['cw2'], 'cb2': p['cb2'],
    }


# ---------------------------------------------------------------------------
# Pure-JAX reference (mirrors the PyTorch forward, eval mode)
# ---------------------------------------------------------------------------
def reference_forward(x, p, H, W):
    B, S, C = x.shape
    bn_scale = p['bn_gamma'] / math.sqrt(p['bn_rv'] + 1e-5)
    bn_bias = p['bn_beta'] - p['bn_rm'] * bn_scale
    # ---- TokenMixer ----
    residual = x
    xi = x.reshape(B, C, H, W)
    pool = jnp.concatenate([jnp.max(xi, axis=1, keepdims=True),
                            jnp.mean(xi, axis=1, keepdims=True)], axis=1)
    conv = jax.lax.conv_general_dilated(pool, p['conv_w'], (1, 1), [(3, 3), (3, 3)],
                                        dimension_numbers=('NCHW', 'OIHW', 'NCHW'))
    y = xi * jax.nn.sigmoid(conv * bn_scale + bn_bias)
    y = jnp.transpose(y, (0, 2, 3, 1)).reshape(B, S, C)
    xn = _layernorm(residual + y, p['ln1_w'], p['ln1_b'])
    xt = jnp.transpose(xn, (0, 2, 1))
    h = jax.nn.gelu(xt @ p['tw1'] + p['tb1'], approximate=False)
    m = h @ p['tw2'] + p['tb2']
    x1 = jnp.transpose(m, (0, 2, 1)) + residual
    # ---- ChannelMixer ----
    residual = x1
    xi = x1.reshape(B, C, H, W)
    avg = jnp.mean(xi, axis=(2, 3))
    mx = jnp.max(xi, axis=(2, 3))

    def gmlp(v):
        h = jnp.maximum(v @ p['gw1'].T + p['gb1'][:, 0], 0.0)
        return h @ p['gw2'].T + p['gb2'][:, 0]

    att = gmlp(avg) + gmlp(mx)
    y = xi * jax.nn.sigmoid(att)[:, :, None, None]
    y = jnp.transpose(y, (0, 2, 3, 1)).reshape(B, S, C)
    xn = _layernorm(residual + y, p['ln2_w'], p['ln2_b'])
    h = jax.nn.gelu(xn @ p['cw1'] + p['cb1'], approximate=False)
    m = h @ p['cw2'] + p['cb2']
    return m + residual


# ---------------------------------------------------------------------------
# Deterministic parameter init (shapes dictated by the module's __init__)
# ---------------------------------------------------------------------------
def init_params(key, S, C, expansion):
    Et, Ec, Cr = S * expansion, C * expansion, C // 16
    ks = jax.random.split(key, 13)

    def unif(k, shape, fan_in):
        b = 1.0 / math.sqrt(fan_in)
        return jax.random.uniform(k, shape, jnp.float32, -b, b)

    return {
        # SpatialGate: Conv2d(2, 1, 7, padding=3, bias=False) + BatchNorm2d(1) (eval, defaults)
        'conv_w': unif(ks[0], (1, 2, 7, 7), 2 * 7 * 7),
        'bn_gamma': 1.0, 'bn_beta': 0.0, 'bn_rm': 0.0, 'bn_rv': 1.0,
        # TokenMixer: LayerNorm(C) + MLP(S -> S*e -> S)   (weights stored (in, out))
        'ln1_w': jnp.ones((1, C), jnp.float32), 'ln1_b': jnp.zeros((1, C), jnp.float32),
        'tw1': unif(ks[1], (S, Et), S), 'tb1': unif(ks[2], (1, Et), S),
        'tw2': unif(ks[3], (Et, S), Et), 'tb2': unif(ks[4], (1, S), Et),
        # ChannelGate MLP: Linear(C, C//16) -> ReLU -> Linear(C//16, C)  (torch (out,in) layout)
        'gw1': unif(ks[5], (Cr, C), C), 'gb1': unif(ks[6], (Cr, 1), C),
        'gw2': unif(ks[7], (C, Cr), Cr), 'gb2': unif(ks[8], (C, 1), Cr),
        # ChannelMixer: LayerNorm(C) + MLP(C -> C*e -> C)
        'ln2_w': jnp.ones((1, C), jnp.float32), 'ln2_b': jnp.zeros((1, C), jnp.float32),
        'cw1': unif(ks[9], (C, Ec), C), 'cb1': unif(ks[10], (1, Ec), C),
        'cw2': unif(ks[11], (Ec, C), Ec), 'cb2': unif(ks[12], (1, C), Ec),
    }


if __name__ == "__main__":
    # MixerLayer(num_features=64, image_size=8, num_patches=32, expansion_factor=2, dropout=0.0)
    # Forward input: (batch, num_features, num_patches) = (2, 64, 32); H = W = sqrt(64) = 8.
    B, S, C, expansion = 2, 64, 32, 2
    H = W = int(math.isqrt(S))

    key = jax.random.PRNGKey(0)
    kx, kp = jax.random.split(key)
    x = jax.random.normal(kx, (B, S, C), jnp.float32)
    params = init_params(kp, S, C, expansion)
    ops = prepare_operands(params, H, W)   # hoisted one-time host/conv-operator prep

    out = mixer_layer(x, ops)
    out = jax.block_until_ready(out)

    ref = reference_forward(x, params, H, W)
    err = float(jnp.max(jnp.abs(out - ref)))
    assert out.shape == (B, S, C) and err < 2e-3, f"mismatch: max|err|={err}"
    print("KERNEL_OK")
</pallas_src>

<mosaic_0001>
module attributes {stable_mosaic.version = 11 : i64} {
  func.func @_mixer_kernel(%arg0: i32, %arg1: memref<2x64x32xf32, #tpu.memory_space<vmem>>, %arg2: memref<128x64xf32, #tpu.memory_space<vmem>>, %arg3: memref<1x64xf32, #tpu.memory_space<vmem>>, %arg4: memref<1x32xf32, #tpu.memory_space<vmem>>, %arg5: memref<1x32xf32, #tpu.memory_space<vmem>>, %arg6: memref<128x64xf32, #tpu.memory_space<vmem>>, %arg7: memref<128x1xf32, #tpu.memory_space<vmem>>, %arg8: memref<64x128xf32, #tpu.memory_space<vmem>>, %arg9: memref<64x1xf32, #tpu.memory_space<vmem>>, %arg10: memref<2x32xf32, #tpu.memory_space<vmem>>, %arg11: memref<2x1xf32, #tpu.memory_space<vmem>>, %arg12: memref<32x2xf32, #tpu.memory_space<vmem>>, %arg13: memref<32x1xf32, #tpu.memory_space<vmem>>, %arg14: memref<1x32xf32, #tpu.memory_space<vmem>>, %arg15: memref<1x32xf32, #tpu.memory_space<vmem>>, %arg16: memref<32x64xf32, #tpu.memory_space<vmem>>, %arg17: memref<1x64xf32, #tpu.memory_space<vmem>>, %arg18: memref<64x32xf32, #tpu.memory_space<vmem>>, %arg19: memref<1x32xf32, #tpu.memory_space<vmem>>, %arg20: memref<2x64x32xf32, #tpu.memory_space<vmem>>, %arg21: memref<64x32xf32, #tpu.memory_space<vmem>>) attributes {dimension_semantics = [#tpu.dimension_semantics<parallel>], iteration_bounds = array<i64: 1>, scalar_prefetch = 0 : i64, scratch_operands = 1 : i64, tpu.core_type = #tpu.core_type<tc>, window_params = [{transform_indices = @transform_0, window_bounds = array<i64: 2, 64, 32>}, {pipeline_mode = #tpu.pipeline_mode<synchronous>, transform_indices = @transform_1, window_bounds = array<i64: 128, 64>}, {pipeline_mode = #tpu.pipeline_mode<synchronous>, transform_indices = @transform_2, window_bounds = array<i64: 1, 64>}, {pipeline_mode = #tpu.pipeline_mode<synchronous>, transform_indices = @transform_3, window_bounds = array<i64: 1, 32>}, {pipeline_mode = #tpu.pipeline_mode<synchronous>, transform_indices = @transform_4, window_bounds = array<i64: 1, 32>}, {pipeline_mode = #tpu.pipeline_mode<synchronous>, transform_indices = @transform_5, window_bounds = array<i64: 128, 64>}, {pipeline_mode = #tpu.pipeline_mode<synchronous>, transform_indices = @transform_6, window_bounds = array<i64: 128, 1>}, {pipeline_mode = #tpu.pipeline_mode<synchronous>, transform_indices = @transform_7, window_bounds = array<i64: 64, 128>}, {pipeline_mode = #tpu.pipeline_mode<synchronous>, transform_indices = @transform_8, window_bounds = array<i64: 64, 1>}, {pipeline_mode = #tpu.pipeline_mode<synchronous>, transform_indices = @transform_9, window_bounds = array<i64: 2, 32>}, {pipeline_mode = #tpu.pipeline_mode<synchronous>, transform_indices = @transform_10, window_bounds = array<i64: 2, 1>}, {pipeline_mode = #tpu.pipeline_mode<synchronous>, transform_indices = @transform_11, window_bounds = array<i64: 32, 2>}, {pipeline_mode = #tpu.pipeline_mode<synchronous>, transform_indices = @transform_12, window_bounds = array<i64: 32, 1>}, {pipeline_mode = #tpu.pipeline_mode<synchronous>, transform_indices = @transform_13, window_bounds = array<i64: 1, 32>}, {pipeline_mode = #tpu.pipeline_mode<synchronous>, transform_indices = @transform_14, window_bounds = array<i64: 1, 32>}, {pipeline_mode = #tpu.pipeline_mode<synchronous>, transform_indices = @transform_15, window_bounds = array<i64: 32, 64>}, {pipeline_mode = #tpu.pipeline_mode<synchronous>, transform_indices = @transform_16, window_bounds = array<i64: 1, 64>}, {pipeline_mode = #tpu.pipeline_mode<synchronous>, transform_indices = @transform_17, window_bounds = array<i64: 64, 32>}, {pipeline_mode = #tpu.pipeline_mode<synchronous>, transform_indices = @transform_18, window_bounds = array<i64: 1, 32>}, {transform_indices = @transform_19, window_bounds = array<i64: 2, 64, 32>}]} {
    %c0 = arith.constant 0 : index
    %c0_0 = arith.constant 0 : index
    %0 = vector.load %arg2[%c0, %c0_0] : memref<128x64xf32, #tpu.memory_space<vmem>>, vector<128x64xf32>
    %c0_1 = arith.constant 0 : index
    %c0_2 = arith.constant 0 : index
    %1 = vector.load %arg3[%c0_1, %c0_2] : memref<1x64xf32, #tpu.memory_space<vmem>>, vector<1x64xf32>
    %c0_3 = arith.constant 0 : index
    %c0_4 = arith.constant 0 : index
    %2 = vector.load %arg4[%c0_3, %c0_4] : memref<1x32xf32, #tpu.memory_space<vmem>>, vector<1x32xf32>
    %c0_5 = arith.constant 0 : index
    %c0_6 = arith.constant 0 : index
    %3 = vector.load %arg5[%c0_5, %c0_6] : memref<1x32xf32, #tpu.memory_space<vmem>>, vector<1x32xf32>
    %c0_7 = arith.constant 0 : index
    %c0_8 = arith.constant 0 : index
    %4 = vector.load %arg6[%c0_7, %c0_8] : memref<128x64xf32, #tpu.memory_space<vmem>>, vector<128x64xf32>
    %c0_9 = arith.constant 0 : index
    %c0_10 = arith.constant 0 : index
    %5 = vector.load %arg7[%c0_9, %c0_10] : memref<128x1xf32, #tpu.memory_space<vmem>>, vector<128x1xf32>
    %c0_11 = arith.constant 0 : index
    %c0_12 = arith.constant 0 : index
    %6 = vector.load %arg8[%c0_11, %c0_12] : memref<64x128xf32, #tpu.memory_space<vmem>>, vector<64x128xf32>
    %c0_13 = arith.constant 0 : index
    %c0_14 = arith.constant 0 : index
    %7 = vector.load %arg9[%c0_13, %c0_14] : memref<64x1xf32, #tpu.memory_space<vmem>>, vector<64x1xf32>
    %c0_15 = arith.constant 0 : index
    %c0_16 = arith.constant 0 : index
    %8 = vector.load %arg10[%c0_15, %c0_16] : memref<2x32xf32, #tpu.memory_space<vmem>>, vector<2x32xf32>
    %c0_17 = arith.constant 0 : index
    %c0_18 = arith.constant 0 : index
    %9 = vector.load %arg11[%c0_17, %c0_18] : memref<2x1xf32, #tpu.memory_space<vmem>>, vector<2x1xf32>
    %c0_19 = arith.constant 0 : index
    %c0_20 = arith.constant 0 : index
    %10 = vector.load %arg12[%c0_19, %c0_20] : memref<32x2xf32, #tpu.memory_space<vmem>>, vector<32x2xf32>
    %c0_21 = arith.constant 0 : index
    %c0_22 = arith.constant 0 : index
    %11 = vector.load %arg13[%c0_21, %c0_22] : memref<32x1xf32, #tpu.memory_space<vmem>>, vector<32x1xf32>
    %c0_23 = arith.constant 0 : index
    %c0_24 = arith.constant 0 : index
    %12 = vector.load %arg14[%c0_23, %c0_24] : memref<1x32xf32, #tpu.memory_space<vmem>>, vector<1x32xf32>
    %c0_25 = arith.constant 0 : index
    %c0_26 = arith.constant 0 : index
    %13 = vector.load %arg15[%c0_25, %c0_26] : memref<1x32xf32, #tpu.memory_space<vmem>>, vector<1x32xf32>
    %c0_27 = arith.constant 0 : index
    %c0_28 = arith.constant 0 : index
    %14 = vector.load %arg16[%c0_27, %c0_28] : memref<32x64xf32, #tpu.memory_space<vmem>>, vector<32x64xf32>
    %c0_29 = arith.constant 0 : index
    %c0_30 = arith.constant 0 : index
    %15 = vector.load %arg17[%c0_29, %c0_30] : memref<1x64xf32, #tpu.memory_space<vmem>>, vector<1x64xf32>
    %c0_31 = arith.constant 0 : index
    %c0_32 = arith.constant 0 : index
    %16 = vector.load %arg18[%c0_31, %c0_32] : memref<64x32xf32, #tpu.memory_space<vmem>>, vector<64x32xf32>
    %c0_33 = arith.constant 0 : index
    %c0_34 = arith.constant 0 : index
    %17 = vector.load %arg19[%c0_33, %c0_34] : memref<1x32xf32, #tpu.memory_space<vmem>>, vector<1x32xf32>
    %c0_35 = arith.constant 0 : index
    %c0_36 = arith.constant 0 : index
    %c0_37 = arith.constant 0 : index
    %18 = vector.load %arg1[%c0_35, %c0_36, %c0_37] : memref<2x64x32xf32, #tpu.memory_space<vmem>>, vector<1x64x32xf32>
    %19 = vector.shape_cast %18 : vector<1x64x32xf32> to vector<64x32xf32>
    %c0_38 = arith.constant 0 : index
    %c0_39 = arith.constant 0 : index
    %20 = vector.load %arg21[%c0_38, %c0_39] : memref<64x32xf32, #tpu.memory_space<vmem>>, vector<64x32xf32>
    tpu.vector_store %arg21[%c0_38, %c0_39], %19 {strides = array<i32>} : memref<64x32xf32, #tpu.memory_space<vmem>>, vector<64x32xf32>,
    %c0_40 = arith.constant 0 : index
    %c0_41 = arith.constant 0 : index
    %21 = tpu.strided_load %arg21[%c0_40, %c0_41] {strides = array<i32: 2, 1>} : memref<64x32xf32, #tpu.memory_space<vmem>>, vector<32x32xf32>
    %c1 = arith.constant 1 : index
    %c0_42 = arith.constant 0 : index
    %22 = tpu.strided_load %arg21[%c1, %c0_42] {strides = array<i32: 2, 1>} : memref<64x32xf32, #tpu.memory_space<vmem>>, vector<32x32xf32>
    %23 = tpu.concatenate %21, %22 in 1 : vector<32x32xf32>, vector<32x32xf32> -> vector<32x64xf32>
    %cst = arith.constant dense<0xFF800000> : vector<64xf32>
    %24 = vector.multi_reduction <maximumf>, %23, %cst [0] : vector<32x64xf32> to vector<64xf32>
    %25 = vector.shape_cast %24 : vector<64xf32> to vector<1x64xf32>
    %cst_43 = arith.constant dense<0.000000e+00> : vector<64xf32>
    %26 = vector.multi_reduction <add>, %23, %cst_43 [0] : vector<32x64xf32> to vector<64xf32>
    %27 = vector.shape_cast %26 : vector<64xf32> to vector<1x64xf32>
    %cst_44 = arith.constant 3.200000e+01 : f32
    %28 = vector.broadcast %cst_44 : f32 to vector<1x64xf32>
    %29 = arith.divf %27, %28 : vector<1x64xf32>
    %30 = tpu.concatenate %25, %29 in 1 : vector<1x64xf32>, vector<1x64xf32> -> vector<1x128xf32>
    %cst_45 = arith.constant dense<0.000000e+00> : vector<1x64xf32>
    %31 = tpu.matmul %30, %0, %cst_45 {dimension_numbers = #tpu.dot_dimension_numbers<[1], [0], [0], [1], [0, 0, 1, 1], [], []>} : vector<1x128xf32>, vector<128x64xf32>, vector<1x64xf32> -> vector<1x64xf32>
    %32 = arith.addf %31, %1 : vector<1x64xf32>
    %cst_46 = arith.constant 0.000000e+00 : f32
    %33 = vector.broadcast %cst_46 : f32 to vector<1x64xf32>
    %34 = arith.subf %33, %32 : vector<1x64xf32>
    %35 = math.exp %34 : vector<1x64xf32>
    %cst_47 = arith.constant 1.000000e+00 : f32
    %36 = vector.broadcast %cst_47 : f32 to vector<1x64xf32>
    %37 = arith.addf %36, %35 : vector<1x64xf32>
    %cst_48 = arith.constant 1.000000e+00 : f32
    %38 = vector.broadcast %cst_48 : f32 to vector<1x64xf32>
    %39 = arith.divf %38, %37 : vector<1x64xf32>
    %40 = vector.broadcast %39 : vector<1x64xf32> to vector<32x64xf32>
    %41 = arith.mulf %23, %40 : vector<32x64xf32>
    %42 = tpu.transpose %41, [1, 0] : vector<32x64xf32> -> vector<64x32xf32>
    %43 = arith.addf %19, %42 : vector<64x32xf32>
    %cst_49 = arith.constant dense<0.000000e+00> : vector<64xf32>
    %44 = vector.multi_reduction <add>, %43, %cst_49 [1] : vector<64x32xf32> to vector<64xf32>
    %45 = vector.shape_cast %44 : vector<64xf32> to vector<64x1xf32>
    %cst_50 = arith.constant 3.200000e+01 : f32
    %46 = vector.broadcast %cst_50 : f32 to vector<64x1xf32>
    %47 = arith.divf %45, %46 : vector<64x1xf32>
    %48 = vector.broadcast %47 : vector<64x1xf32> to vector<64x32xf32>
    %49 = arith.subf %43, %48 : vector<64x32xf32>
    %50 = arith.mulf %49, %49 : vector<64x32xf32>
    %cst_51 = arith.constant dense<0.000000e+00> : vector<64xf32>
    %51 = vector.multi_reduction <add>, %50, %cst_51 [1] : vector<64x32xf32> to vector<64xf32>
    %52 = vector.shape_cast %51 : vector<64xf32> to vector<64x1xf32>
    %cst_52 = arith.constant 3.200000e+01 : f32
    %53 = vector.broadcast %cst_52 : f32 to vector<64x1xf32>
    %54 = arith.divf %52, %53 : vector<64x1xf32>
    %55 = vector.broadcast %47 : vector<64x1xf32> to vector<64x32xf32>
    %56 = arith.subf %43, %55 : vector<64x32xf32>
    %cst_53 = arith.constant 9.99999974E-6 : f32
    %57 = vector.broadcast %cst_53 : f32 to vector<64x1xf32>
    %58 = arith.addf %54, %57 : vector<64x1xf32>
    %59 = math.rsqrt %58 : vector<64x1xf32>
    %60 = vector.broadcast %59 : vector<64x1xf32> to vector<64x32xf32>
    %61 = arith.mulf %56, %60 : vector<64x32xf32>
    %62 = vector.broadcast %2 : vector<1x32xf32> to vector<64x32xf32>
    %63 = arith.mulf %61, %62 : vector<64x32xf32>
    %64 = vector.broadcast %3 : vector<1x32xf32> to vector<64x32xf32>
    %65 = arith.addf %63, %64 : vector<64x32xf32>
    %cst_54 = arith.constant dense<0.000000e+00> : vector<128x32xf32>
    %66 = tpu.matmul %4, %65, %cst_54 {dimension_numbers = #tpu.dot_dimension_numbers<[1], [0], [0], [1], [0, 0, 1, 1], [], []>} : vector<128x64xf32>, vector<64x32xf32>, vector<128x32xf32> -> vector<128x32xf32>
    %67 = vector.broadcast %5 : vector<128x1xf32> to vector<128x32xf32>
    %68 = arith.addf %66, %67 : vector<128x32xf32>
    %cst_55 = arith.constant 5.000000e-01 : f32
    %69 = vector.broadcast %cst_55 : f32 to vector<128x32xf32>
    %70 = arith.mulf %69, %68 : vector<128x32xf32>
    %cst_56 = arith.constant 0.707106769 : f32
    %71 = vector.broadcast %cst_56 : f32 to vector<128x32xf32>
    %72 = arith.mulf %68, %71 : vector<128x32xf32>
    %73 = math.absf %72 : vector<128x32xf32>
    %cst_57 = arith.constant 0.327591091 : f32
    %74 = vector.broadcast %cst_57 : f32 to vector<128x32xf32>
    %75 = arith.mulf %74, %73 : vector<128x32xf32>
    %cst_58 = arith.constant 1.000000e+00 : f32
    %76 = vector.broadcast %cst_58 : f32 to vector<128x32xf32>
    %77 = arith.addf %76, %75 : vector<128x32xf32>
    %cst_59 = arith.constant 1.000000e+00 : f32
    %78 = vector.broadcast %cst_59 : f32 to vector<128x32xf32>
    %79 = arith.divf %78, %77 : vector<128x32xf32>
    %cst_60 = arith.constant 1.06140542 : f32
    %80 = vector.broadcast %cst_60 : f32 to vector<128x32xf32>
    %81 = arith.mulf %80, %79 : vector<128x32xf32>
    %cst_61 = arith.constant -1.45315206 : f32
    %82 = vector.broadcast %cst_61 : f32 to vector<128x32xf32>
    %83 = arith.addf %81, %82 : vector<128x32xf32>
    %84 = arith.mulf %83, %79 : vector<128x32xf32>
    %cst_62 = arith.constant 1.42141378 : f32
    %85 = vector.broadcast %cst_62 : f32 to vector<128x32xf32>
    %86 = arith.addf %84, %85 : vector<128x32xf32>
    %87 = arith.mulf %86, %79 : vector<128x32xf32>
    %cst_63 = arith.constant -0.284496725 : f32
    %88 = vector.broadcast %cst_63 : f32 to vector<128x32xf32>
    %89 = arith.addf %87, %88 : vector<128x32xf32>
    %90 = arith.mulf %89, %79 : vector<128x32xf32>
    %cst_64 = arith.constant 0.254829586 : f32
    %91 = vector.broadcast %cst_64 : f32 to vector<128x32xf32>
    %92 = arith.addf %90, %91 : vector<128x32xf32>
    %93 = arith.mulf %92, %79 : vector<128x32xf32>
    %cst_65 = arith.constant 0.000000e+00 : f32
    %94 = vector.broadcast %cst_65 : f32 to vector<128x32xf32>
    %95 = arith.subf %94, %73 : vector<128x32xf32>
    %96 = arith.mulf %95, %73 : vector<128x32xf32>
    %97 = math.exp %96 : vector<128x32xf32>
    %98 = arith.mulf %93, %97 : vector<128x32xf32>
    %cst_66 = arith.constant 1.000000e+00 : f32
    %99 = vector.broadcast %cst_66 : f32 to vector<128x32xf32>
    %100 = arith.subf %99, %98 : vector<128x32xf32>
    %cst_67 = arith.constant 0.000000e+00 : f32
    %101 = vector.broadcast %cst_67 : f32 to vector<128x32xf32>
    %102 = arith.cmpf oge, %72, %101 : vector<128x32xf32>
    %cst_68 = arith.constant 0.000000e+00 : f32
    %103 = vector.broadcast %cst_68 : f32 to vector<128x32xf32>
    %104 = arith.subf %103, %100 : vector<128x32xf32>
    %105 = arith.select %102, %100, %104 : vector<128x32xi1>, vector<128x32xf32>
    %cst_69 = arith.constant 1.000000e+00 : f32
    %106 = vector.broadcast %cst_69 : f32 to vector<128x32xf32>
    %107 = arith.addf %106, %105 : vector<128x32xf32>
    %108 = arith.mulf %70, %107 : vector<128x32xf32>
    %cst_70 = arith.constant dense<0.000000e+00> : vector<64x32xf32>
    %109 = tpu.matmul %6, %108, %cst_70 {dimension_numbers = #tpu.dot_dimension_numbers<[1], [0], [0], [1], [0, 0, 1, 1], [], []>} : vector<64x128xf32>, vector<128x32xf32>, vector<64x32xf32> -> vector<64x32xf32>
    %110 = vector.broadcast %7 : vector<64x1xf32> to vector<64x32xf32>
    %111 = arith.addf %109, %110 : vector<64x32xf32>
    %112 = arith.addf %111, %19 : vector<64x32xf32>
    %c0_71 = arith.constant 0 : index
    %c0_72 = arith.constant 0 : index
    %113 = vector.load %arg21[%c0_71, %c0_72] : memref<64x32xf32, #tpu.memory_space<vmem>>, vector<64x32xf32>
    tpu.vector_store %arg21[%c0_71, %c0_72], %112 {strides = array<i32>} : memref<64x32xf32, #tpu.memory_space<vmem>>, vector<64x32xf32>,
    %c0_73 = arith.constant 0 : index
    %c0_74 = arith.constant 0 : index
    %114 = tpu.strided_load %arg21[%c0_73, %c0_74] {strides = array<i32: 2, 1>} : memref<64x32xf32, #tpu.memory_space<vmem>>, vector<32x32xf32>
    %c1_75 = arith.constant 1 : index
    %c0_76 = arith.constant 0 : index
    %115 = tpu.strided_load %arg21[%c1_75, %c0_76] {strides = array<i32: 2, 1>} : memref<64x32xf32, #tpu.memory_space<vmem>>, vector<32x32xf32>
    %116 = tpu.concatenate %114, %115 in 1 : vector<32x32xf32>, vector<32x32xf32> -> vector<32x64xf32>
    %cst_77 = arith.constant dense<0.000000e+00> : vector<32xf32>
    %117 = vector.multi_reduction <add>, %116, %cst_77 [1] : vector<32x64xf32> to vector<32xf32>
    %118 = vector.shape_cast %117 : vector<32xf32> to vector<32x1xf32>
    %cst_78 = arith.constant 6.400000e+01 : f32
    %119 = vector.broadcast %cst_78 : f32 to vector<32x1xf32>
    %120 = arith.divf %118, %119 : vector<32x1xf32>
    %cst_79 = arith.constant dense<0xFF800000> : vector<32xf32>
    %121 = vector.multi_reduction <maximumf>, %116, %cst_79 [1] : vector<32x64xf32> to vector<32xf32>
    %122 = vector.shape_cast %121 : vector<32xf32> to vector<32x1xf32>
    %123 = tpu.concatenate %120, %122 in 1 : vector<32x1xf32>, vector<32x1xf32> -> vector<32x2xf32>
    %cst_80 = arith.constant dense<0.000000e+00> : vector<2x2xf32>
    %124 = tpu.matmul %8, %123, %cst_80 {dimension_numbers = #tpu.dot_dimension_numbers<[1], [0], [0], [1], [0, 0, 1, 1], [], []>} : vector<2x32xf32>, vector<32x2xf32>, vector<2x2xf32> -> vector<2x2xf32>
    %125 = vector.broadcast %9 : vector<2x1xf32> to vector<2x2xf32>
    %126 = arith.addf %124, %125 : vector<2x2xf32>
    %cst_81 = arith.constant 0.000000e+00 : f32
    %127 = vector.broadcast %cst_81 : f32 to vector<2x2xf32>
    %128 = arith.maximumf %126, %127 : vector<2x2xf32>
    %cst_82 = arith.constant dense<0.000000e+00> : vector<32x2xf32>
    %129 = tpu.matmul %10, %128, %cst_82 {dimension_numbers = #tpu.dot_dimension_numbers<[1], [0], [0], [1], [0, 0, 1, 1], [], []>} : vector<32x2xf32>, vector<2x2xf32>, vector<32x2xf32> -> vector<32x2xf32>
    %130 = vector.broadcast %11 : vector<32x1xf32> to vector<32x2xf32>
    %131 = arith.addf %129, %130 : vector<32x2xf32>
    %132 = vector.extract_strided_slice %131 {offsets = [0, 0], sizes = [32, 1], strides = [1, 1]} : vector<32x2xf32> to vector<32x1xf32>
    %133 = vector.extract_strided_slice %131 {offsets = [0, 1], sizes = [32, 1], strides = [1, 1]} : vector<32x2xf32> to vector<32x1xf32>
    %134 = arith.addf %132, %133 : vector<32x1xf32>
    %cst_83 = arith.constant 0.000000e+00 : f32
    %135 = vector.broadcast %cst_83 : f32 to vector<32x1xf32>
    %136 = arith.subf %135, %134 : vector<32x1xf32>
    %137 = math.exp %136 : vector<32x1xf32>
    %cst_84 = arith.constant 1.000000e+00 : f32
    %138 = vector.broadcast %cst_84 : f32 to vector<32x1xf32>
    %139 = arith.addf %138, %137 : vector<32x1xf32>
    %cst_85 = arith.constant 1.000000e+00 : f32
    %140 = vector.broadcast %cst_85 : f32 to vector<32x1xf32>
    %141 = arith.divf %140, %139 : vector<32x1xf32>
    %142 = vector.broadcast %141 : vector<32x1xf32> to vector<32x64xf32>
    %143 = arith.mulf %116, %142 : vector<32x64xf32>
    %144 = tpu.transpose %143, [1, 0] : vector<32x64xf32> -> vector<64x32xf32>
    %145 = arith.addf %112, %144 : vector<64x32xf32>
    %cst_86 = arith.constant dense<0.000000e+00> : vector<64xf32>
    %146 = vector.multi_reduction <add>, %145, %cst_86 [1] : vector<64x32xf32> to vector<64xf32>
    %147 = vector.shape_cast %146 : vector<64xf32> to vector<64x1xf32>
    %cst_87 = arith.constant 3.200000e+01 : f32
    %148 = vector.broadcast %cst_87 : f32 to vector<64x1xf32>
    %149 = arith.divf %147, %148 : vector<64x1xf32>
    %150 = vector.broadcast %149 : vector<64x1xf32> to vector<64x32xf32>
    %151 = arith.subf %145, %150 : vector<64x32xf32>
    %152 = arith.mulf %151, %151 : vector<64x32xf32>
    %cst_88 = arith.constant dense<0.000000e+00> : vector<64xf32>
    %153 = vector.multi_reduction <add>, %152, %cst_88 [1] : vector<64x32xf32> to vector<64xf32>
    %154 = vector.shape_cast %153 : vector<64xf32> to vector<64x1xf32>
    %cst_89 = arith.constant 3.200000e+01 : f32
    %155 = vector.broadcast %cst_89 : f32 to vector<64x1xf32>
    %156 = arith.divf %154, %155 : vector<64x1xf32>
    %157 = vector.broadcast %149 : vector<64x1xf32> to vector<64x32xf32>
    %158 = arith.subf %145, %157 : vector<64x32xf32>
    %cst_90 = arith.constant 9.99999974E-6 : f32
    %159 = vector.broadcast %cst_90 : f32 to vector<64x1xf32>
    %160 = arith.addf %156, %159 : vector<64x1xf32>
    %161 = math.rsqrt %160 : vector<64x1xf32>
    %162 = vector.broadcast %161 : vector<64x1xf32> to vector<64x32xf32>
    %163 = arith.mulf %158, %162 : vector<64x32xf32>
    %164 = vector.broadcast %12 : vector<1x32xf32> to vector<64x32xf32>
    %165 = arith.mulf %163, %164 : vector<64x32xf32>
    %166 = vector.broadcast %13 : vector<1x32xf32> to vector<64x32xf32>
    %167 = arith.addf %165, %166 : vector<64x32xf32>
    %cst_91 = arith.constant dense<0.000000e+00> : vector<64x64xf32>
    %168 = tpu.matmul %167, %14, %cst_91 {dimension_numbers = #tpu.dot_dimension_numbers<[1], [0], [0], [1], [0, 0, 1, 1], [], []>} : vector<64x32xf32>, vector<32x64xf32>, vector<64x64xf32> -> vector<64x64xf32>
    %169 = vector.broadcast %15 : vector<1x64xf32> to vector<64x64xf32>
    %170 = arith.addf %168, %169 : vector<64x64xf32>
    %cst_92 = arith.constant 5.000000e-01 : f32
    %171 = vector.broadcast %cst_92 : f32 to vector<64x64xf32>
    %172 = arith.mulf %171, %170 : vector<64x64xf32>
    %cst_93 = arith.constant 0.707106769 : f32
    %173 = vector.broadcast %cst_93 : f32 to vector<64x64xf32>
    %174 = arith.mulf %170, %173 : vector<64x64xf32>
    %175 = math.absf %174 : vector<64x64xf32>
    %cst_94 = arith.constant 0.327591091 : f32
    %176 = vector.broadcast %cst_94 : f32 to vector<64x64xf32>
    %177 = arith.mulf %176, %175 : vector<64x64xf32>
    %cst_95 = arith.constant 1.000000e+00 : f32
    %178 = vector.broadcast %cst_95 : f32 to vector<64x64xf32>
    %179 = arith.addf %178, %177 : vector<64x64xf32>
    %cst_96 = arith.constant 1.000000e+00 : f32
    %180 = vector.broadcast %cst_96 : f32 to vector<64x64xf32>
    %181 = arith.divf %180, %179 : vector<64x64xf32>
    %cst_97 = arith.constant 1.06140542 : f32
    %182 = vector.broadcast %cst_97 : f32 to vector<64x64xf32>
    %183 = arith.mulf %182, %181 : vector<64x64xf32>
    %cst_98 = arith.constant -1.45315206 : f32
    %184 = vector.broadcast %cst_98 : f32 to vector<64x64xf32>
    %185 = arith.addf %183, %184 : vector<64x64xf32>
    %186 = arith.mulf %185, %181 : vector<64x64xf32>
    %cst_99 = arith.constant 1.42141378 : f32
    %187 = vector.broadcast %cst_99 : f32 to vector<64x64xf32>
    %188 = arith.addf %186, %187 : vector<64x64xf32>
    %189 = arith.mulf %188, %181 : vector<64x64xf32>
    %cst_100 = arith.constant -0.284496725 : f32
    %190 = vector.broadcast %cst_100 : f32 to vector<64x64xf32>
    %191 = arith.addf %189, %190 : vector<64x64xf32>
    %192 = arith.mulf %191, %181 : vector<64x64xf32>
    %cst_101 = arith.constant 0.254829586 : f32
    %193 = vector.broadcast %cst_101 : f32 to vector<64x64xf32>
    %194 = arith.addf %192, %193 : vector<64x64xf32>
    %195 = arith.mulf %194, %181 : vector<64x64xf32>
    %cst_102 = arith.constant 0.000000e+00 : f32
    %196 = vector.broadcast %cst_102 : f32 to vector<64x64xf32>
    %197 = arith.subf %196, %175 : vector<64x64xf32>
    %198 = arith.mulf %197, %175 : vector<64x64xf32>
    %199 = math.exp %198 : vector<64x64xf32>
    %200 = arith.mulf %195, %199 : vector<64x64xf32>
    %cst_103 = arith.constant 1.000000e+00 : f32
    %201 = vector.broadcast %cst_103 : f32 to vector<64x64xf32>
    %202 = arith.subf %201, %200 : vector<64x64xf32>
    %cst_104 = arith.constant 0.000000e+00 : f32
    %203 = vector.broadcast %cst_104 : f32 to vector<64x64xf32>
    %204 = arith.cmpf oge, %174, %203 : vector<64x64xf32>
    %cst_105 = arith.constant 0.000000e+00 : f32
    %205 = vector.broadcast %cst_105 : f32 to vector<64x64xf32>
    %206 = arith.subf %205, %202 : vector<64x64xf32>
    %207 = arith.select %204, %202, %206 : vector<64x64xi1>, vector<64x64xf32>
    %cst_106 = arith.constant 1.000000e+00 : f32
    %208 = vector.broadcast %cst_106 : f32 to vector<64x64xf32>
    %209 = arith.addf %208, %207 : vector<64x64xf32>
    %210 = arith.mulf %172, %209 : vector<64x64xf32>
    %cst_107 = arith.constant dense<0.000000e+00> : vector<64x32xf32>
    %211 = tpu.matmul %210, %16, %cst_107 {dimension_numbers = #tpu.dot_dimension_numbers<[1], [0], [0], [1], [0, 0, 1, 1], [], []>} : vector<64x64xf32>, vector<64x32xf32>, vector<64x32xf32> -> vector<64x32xf32>
    %212 = vector.broadcast %17 : vector<1x32xf32> to vector<64x32xf32>
    %213 = arith.addf %211, %212 : vector<64x32xf32>
    %214 = arith.addf %213, %112 : vector<64x32xf32>
    %c0_108 = arith.constant 0 : index
    %c0_109 = arith.constant 0 : index
    %c0_110 = arith.constant 0 : index
    %215 = vector.load %arg20[%c0_108, %c0_109, %c0_110] : memref<2x64x32xf32, #tpu.memory_space<vmem>>, vector<1x64x32xf32>
    %216 = vector.shape_cast %215 : vector<1x64x32xf32> to vector<64x32xf32>
    %217 = vector.shape_cast %214 : vector<64x32xf32> to vector<1x64x32xf32>
    tpu.vector_store %arg20[%c0_108, %c0_109, %c0_110], %217 {strides = array<i32>} : memref<2x64x32xf32, #tpu.memory_space<vmem>>, vector<1x64x32xf32>,
    %c1_111 = arith.constant 1 : index
    %c0_112 = arith.constant 0 : index
    %c0_113 = arith.constant 0 : index
    %218 = vector.load %arg1[%c1_111, %c0_112, %c0_113] : memref<2x64x32xf32, #tpu.memory_space<vmem>>, vector<1x64x32xf32>
    %219 = vector.shape_cast %218 : vector<1x64x32xf32> to vector<64x32xf32>
    %c0_114 = arith.constant 0 : index
    %c0_115 = arith.constant 0 : index
    %220 = vector.load %arg21[%c0_114, %c0_115] : memref<64x32xf32, #tpu.memory_space<vmem>>, vector<64x32xf32>
    tpu.vector_store %arg21[%c0_114, %c0_115], %219 {strides = array<i32>} : memref<64x32xf32, #tpu.memory_space<vmem>>, vector<64x32xf32>,
    %c0_116 = arith.constant 0 : index
    %c0_117 = arith.constant 0 : index
    %221 = tpu.strided_load %arg21[%c0_116, %c0_117] {strides = array<i32: 2, 1>} : memref<64x32xf32, #tpu.memory_space<vmem>>, vector<32x32xf32>
    %c1_118 = arith.constant 1 : index
    %c0_119 = arith.constant 0 : index
    %222 = tpu.strided_load %arg21[%c1_118, %c0_119] {strides = array<i32: 2, 1>} : memref<64x32xf32, #tpu.memory_space<vmem>>, vector<32x32xf32>
    %223 = tpu.concatenate %221, %222 in 1 : vector<32x32xf32>, vector<32x32xf32> -> vector<32x64xf32>
    %cst_120 = arith.constant dense<0xFF800000> : vector<64xf32>
    %224 = vector.multi_reduction <maximumf>, %223, %cst_120 [0] : vector<32x64xf32> to vector<64xf32>
    %225 = vector.shape_cast %224 : vector<64xf32> to vector<1x64xf32>
    %cst_121 = arith.constant dense<0.000000e+00> : vector<64xf32>
    %226 = vector.multi_reduction <add>, %223, %cst_121 [0] : vector<32x64xf32> to vector<64xf32>
    %227 = vector.shape_cast %226 : vector<64xf32> to vector<1x64xf32>
    %cst_122 = arith.constant 3.200000e+01 : f32
    %228 = vector.broadcast %cst_122 : f32 to vector<1x64xf32>
    %229 = arith.divf %227, %228 : vector<1x64xf32>
    %230 = tpu.concatenate %225, %229 in 1 : vector<1x64xf32>, vector<1x64xf32> -> vector<1x128xf32>
    %cst_123 = arith.constant dense<0.000000e+00> : vector<1x64xf32>
    %231 = tpu.matmul %230, %0, %cst_123 {dimension_numbers = #tpu.dot_dimension_numbers<[1], [0], [0], [1], [0, 0, 1, 1], [], []>} : vector<1x128xf32>, vector<128x64xf32>, vector<1x64xf32> -> vector<1x64xf32>
    %232 = arith.addf %231, %1 : vector<1x64xf32>
    %cst_124 = arith.constant 0.000000e+00 : f32
    %233 = vector.broadcast %cst_124 : f32 to vector<1x64xf32>
    %234 = arith.subf %233, %232 : vector<1x64xf32>
    %235 = math.exp %234 : vector<1x64xf32>
    %cst_125 = arith.constant 1.000000e+00 : f32
    %236 = vector.broadcast %cst_125 : f32 to vector<1x64xf32>
    %237 = arith.addf %236, %235 : vector<1x64xf32>
    %cst_126 = arith.constant 1.000000e+00 : f32
    %238 = vector.broadcast %cst_126 : f32 to vector<1x64xf32>
    %239 = arith.divf %238, %237 : vector<1x64xf32>
    %240 = vector.broadcast %239 : vector<1x64xf32> to vector<32x64xf32>
    %241 = arith.mulf %223, %240 : vector<32x64xf32>
    %242 = tpu.transpose %241, [1, 0] : vector<32x64xf32> -> vector<64x32xf32>
    %243 = arith.addf %219, %242 : vector<64x32xf32>
    %cst_127 = arith.constant dense<0.000000e+00> : vector<64xf32>
    %244 = vector.multi_reduction <add>, %243, %cst_127 [1] : vector<64x32xf32> to vector<64xf32>
    %245 = vector.shape_cast %244 : vector<64xf32> to vector<64x1xf32>
    %cst_128 = arith.constant 3.200000e+01 : f32
    %246 = vector.broadcast %cst_128 : f32 to vector<64x1xf32>
    %247 = arith.divf %245, %246 : vector<64x1xf32>
    %248 = vector.broadcast %247 : vector<64x1xf32> to vector<64x32xf32>
    %249 = arith.subf %243, %248 : vector<64x32xf32>
    %250 = arith.mulf %249, %249 : vector<64x32xf32>
    %cst_129 = arith.constant dense<0.000000e+00> : vector<64xf32>
    %251 = vector.multi_reduction <add>, %250, %cst_129 [1] : vector<64x32xf32> to vector<64xf32>
    %252 = vector.shape_cast %251 : vector<64xf32> to vector<64x1xf32>
    %cst_130 = arith.constant 3.200000e+01 : f32
    %253 = vector.broadcast %cst_130 : f32 to vector<64x1xf32>
    %254 = arith.divf %252, %253 : vector<64x1xf32>
    %255 = vector.broadcast %247 : vector<64x1xf32> to vector<64x32xf32>
    %256 = arith.subf %243, %255 : vector<64x32xf32>
    %cst_131 = arith.constant 9.99999974E-6 : f32
    %257 = vector.broadcast %cst_131 : f32 to vector<64x1xf32>
    %258 = arith.addf %254, %257 : vector<64x1xf32>
    %259 = math.rsqrt %258 : vector<64x1xf32>
    %260 = vector.broadcast %259 : vector<64x1xf32> to vector<64x32xf32>
    %261 = arith.mulf %256, %260 : vector<64x32xf32>
    %262 = vector.broadcast %2 : vector<1x32xf32> to vector<64x32xf32>
    %263 = arith.mulf %261, %262 : vector<64x32xf32>
    %264 = vector.broadcast %3 : vector<1x32xf32> to vector<64x32xf32>
    %265 = arith.addf %263, %264 : vector<64x32xf32>
    %cst_132 = arith.constant dense<0.000000e+00> : vector<128x32xf32>
    %266 = tpu.matmul %4, %265, %cst_132 {dimension_numbers = #tpu.dot_dimension_numbers<[1], [0], [0], [1], [0, 0, 1, 1], [], []>} : vector<128x64xf32>, vector<64x32xf32>, vector<128x32xf32> -> vector<128x32xf32>
    %267 = vector.broadcast %5 : vector<128x1xf32> to vector<128x32xf32>
    %268 = arith.addf %266, %267 : vector<128x32xf32>
    %cst_133 = arith.constant 5.000000e-01 : f32
    %269 = vector.broadcast %cst_133 : f32 to vector<128x32xf32>
    %270 = arith.mulf %269, %268 : vector<128x32xf32>
    %cst_134 = arith.constant 0.707106769 : f32
    %271 = vector.broadcast %cst_134 : f32 to vector<128x32xf32>
    %272 = arith.mulf %268, %271 : vector<128x32xf32>
    %273 = math.absf %272 : vector<128x32xf32>
    %cst_135 = arith.constant 0.327591091 : f32
    %274 = vector.broadcast %cst_135 : f32 to vector<128x32xf32>
    %275 = arith.mulf %274, %273 : vector<128x32xf32>
    %cst_136 = arith.constant 1.000000e+00 : f32
    %276 = vector.broadcast %cst_136 : f32 to vector<128x32xf32>
    %277 = arith.addf %276, %275 : vector<128x32xf32>
    %cst_137 = arith.constant 1.000000e+00 : f32
    %278 = vector.broadcast %cst_137 : f32 to vector<128x32xf32>
    %279 = arith.divf %278, %277 : vector<128x32xf32>
    %cst_138 = arith.constant 1.06140542 : f32
    %280 = vector.broadcast %cst_138 : f32 to vector<128x32xf32>
    %281 = arith.mulf %280, %279 : vector<128x32xf32>
    %cst_139 = arith.constant -1.45315206 : f32
    %282 = vector.broadcast %cst_139 : f32 to vector<128x32xf32>
    %283 = arith.addf %281, %282 : vector<128x32xf32>
    %284 = arith.mulf %283, %279 : vector<128x32xf32>
    %cst_140 = arith.constant 1.42141378 : f32
    %285 = vector.broadcast %cst_140 : f32 to vector<128x32xf32>
    %286 = arith.addf %284, %285 : vector<128x32xf32>
    %287 = arith.mulf %286, %279 : vector<128x32xf32>
    %cst_141 = arith.constant -0.284496725 : f32
    %288 = vector.broadcast %cst_141 : f32 to vector<128x32xf32>
    %289 = arith.addf %287, %288 : vector<128x32xf32>
    %290 = arith.mulf %289, %279 : vector<128x32xf32>
    %cst_142 = arith.constant 0.254829586 : f32
    %291 = vector.broadcast %cst_142 : f32 to vector<128x32xf32>
    %292 = arith.addf %290, %291 : vector<128x32xf32>
    %293 = arith.mulf %292, %279 : vector<128x32xf32>
    %cst_143 = arith.constant 0.000000e+00 : f32
    %294 = vector.broadcast %cst_143 : f32 to vector<128x32xf32>
    %295 = arith.subf %294, %273 : vector<128x32xf32>
    %296 = arith.mulf %295, %273 : vector<128x32xf32>
    %297 = math.exp %296 : vector<128x32xf32>
    %298 = arith.mulf %293, %297 : vector<128x32xf32>
    %cst_144 = arith.constant 1.000000e+00 : f32
    %299 = vector.broadcast %cst_144 : f32 to vector<128x32xf32>
    %300 = arith.subf %299, %298 : vector<128x32xf32>
    %cst_145 = arith.constant 0.000000e+00 : f32
    %301 = vector.broadcast %cst_145 : f32 to vector<128x32xf32>
    %302 = arith.cmpf oge, %272, %301 : vector<128x32xf32>
    %cst_146 = arith.constant 0.000000e+00 : f32
    %303 = vector.broadcast %cst_146 : f32 to vector<128x32xf32>
    %304 = arith.subf %303, %300 : vector<128x32xf32>
    %305 = arith.select %302, %300, %304 : vector<128x32xi1>, vector<128x32xf32>
    %cst_147 = arith.constant 1.000000e+00 : f32
    %306 = vector.broadcast %cst_147 : f32 to vector<128x32xf32>
    %307 = arith.addf %306, %305 : vector<128x32xf32>
    %308 = arith.mulf %270, %307 : vector<128x32xf32>
    %cst_148 = arith.constant dense<0.000000e+00> : vector<64x32xf32>
    %309 = tpu.matmul %6, %308, %cst_148 {dimension_numbers = #tpu.dot_dimension_numbers<[1], [0], [0], [1], [0, 0, 1, 1], [], []>} : vector<64x128xf32>, vector<128x32xf32>, vector<64x32xf32> -> vector<64x32xf32>
    %310 = vector.broadcast %7 : vector<64x1xf32> to vector<64x32xf32>
    %311 = arith.addf %309, %310 : vector<64x32xf32>
    %312 = arith.addf %311, %219 : vector<64x32xf32>
    %c0_149 = arith.constant 0 : index
    %c0_150 = arith.constant 0 : index
    %313 = vector.load %arg21[%c0_149, %c0_150] : memref<64x32xf32, #tpu.memory_space<vmem>>, vector<64x32xf32>
    tpu.vector_store %arg21[%c0_149, %c0_150], %312 {strides = array<i32>} : memref<64x32xf32, #tpu.memory_space<vmem>>, vector<64x32xf32>,
    %c0_151 = arith.constant 0 : index
    %c0_152 = arith.constant 0 : index
    %314 = tpu.strided_load %arg21[%c0_151, %c0_152] {strides = array<i32: 2, 1>} : memref<64x32xf32, #tpu.memory_space<vmem>>, vector<32x32xf32>
    %c1_153 = arith.constant 1 : index
    %c0_154 = arith.constant 0 : index
    %315 = tpu.strided_load %arg21[%c1_153, %c0_154] {strides = array<i32: 2, 1>} : memref<64x32xf32, #tpu.memory_space<vmem>>, vector<32x32xf32>
    %316 = tpu.concatenate %314, %315 in 1 : vector<32x32xf32>, vector<32x32xf32> -> vector<32x64xf32>
    %cst_155 = arith.constant dense<0.000000e+00> : vector<32xf32>
    %317 = vector.multi_reduction <add>, %316, %cst_155 [1] : vector<32x64xf32> to vector<32xf32>
    %318 = vector.shape_cast %317 : vector<32xf32> to vector<32x1xf32>
    %cst_156 = arith.constant 6.400000e+01 : f32
    %319 = vector.broadcast %cst_156 : f32 to vector<32x1xf32>
    %320 = arith.divf %318, %319 : vector<32x1xf32>
    %cst_157 = arith.constant dense<0xFF800000> : vector<32xf32>
    %321 = vector.multi_reduction <maximumf>, %316, %cst_157 [1] : vector<32x64xf32> to vector<32xf32>
    %322 = vector.shape_cast %321 : vector<32xf32> to vector<32x1xf32>
    %323 = tpu.concatenate %320, %322 in 1 : vector<32x1xf32>, vector<32x1xf32> -> vector<32x2xf32>
    %cst_158 = arith.constant dense<0.000000e+00> : vector<2x2xf32>
    %324 = tpu.matmul %8, %323, %cst_158 {dimension_numbers = #tpu.dot_dimension_numbers<[1], [0], [0], [1], [0, 0, 1, 1], [], []>} : vector<2x32xf32>, vector<32x2xf32>, vector<2x2xf32> -> vector<2x2xf32>
    %325 = vector.broadcast %9 : vector<2x1xf32> to vector<2x2xf32>
    %326 = arith.addf %324, %325 : vector<2x2xf32>
    %cst_159 = arith.constant 0.000000e+00 : f32
    %327 = vector.broadcast %cst_159 : f32 to vector<2x2xf32>
    %328 = arith.maximumf %326, %327 : vector<2x2xf32>
    %cst_160 = arith.constant dense<0.000000e+00> : vector<32x2xf32>
    %329 = tpu.matmul %10, %328, %cst_160 {dimension_numbers = #tpu.dot_dimension_numbers<[1], [0], [0], [1], [0, 0, 1, 1], [], []>} : vector<32x2xf32>, vector<2x2xf32>, vector<32x2xf32> -> vector<32x2xf32>
    %330 = vector.broadcast %11 : vector<32x1xf32> to vector<32x2xf32>
    %331 = arith.addf %329, %330 : vector<32x2xf32>
    %332 = vector.extract_strided_slice %331 {offsets = [0, 0], sizes = [32, 1], strides = [1, 1]} : vector<32x2xf32> to vector<32x1xf32>
    %333 = vector.extract_strided_slice %331 {offsets = [0, 1], sizes = [32, 1], strides = [1, 1]} : vector<32x2xf32> to vector<32x1xf32>
    %334 = arith.addf %332, %333 : vector<32x1xf32>
    %cst_161 = arith.constant 0.000000e+00 : f32
    %335 = vector.broadcast %cst_161 : f32 to vector<32x1xf32>
    %336 = arith.subf %335, %334 : vector<32x1xf32>
    %337 = math.exp %336 : vector<32x1xf32>
    %cst_162 = arith.constant 1.000000e+00 : f32
    %338 = vector.broadcast %cst_162 : f32 to vector<32x1xf32>
    %339 = arith.addf %338, %337 : vector<32x1xf32>
    %cst_163 = arith.constant 1.000000e+00 : f32
    %340 = vector.broadcast %cst_163 : f32 to vector<32x1xf32>
    %341 = arith.divf %340, %339 : vector<32x1xf32>
    %342 = vector.broadcast %341 : vector<32x1xf32> to vector<32x64xf32>
    %343 = arith.mulf %316, %342 : vector<32x64xf32>
    %344 = tpu.transpose %343, [1, 0] : vector<32x64xf32> -> vector<64x32xf32>
    %345 = arith.addf %312, %344 : vector<64x32xf32>
    %cst_164 = arith.constant dense<0.000000e+00> : vector<64xf32>
    %346 = vector.multi_reduction <add>, %345, %cst_164 [1] : vector<64x32xf32> to vector<64xf32>
    %347 = vector.shape_cast %346 : vector<64xf32> to vector<64x1xf32>
    %cst_165 = arith.constant 3.200000e+01 : f32
    %348 = vector.broadcast %cst_165 : f32 to vector<64x1xf32>
    %349 = arith.divf %347, %348 : vector<64x1xf32>
    %350 = vector.broadcast %349 : vector<64x1xf32> to vector<64x32xf32>
    %351 = arith.subf %345, %350 : vector<64x32xf32>
    %352 = arith.mulf %351, %351 : vector<64x32xf32>
    %cst_166 = arith.constant dense<0.000000e+00> : vector<64xf32>
    %353 = vector.multi_reduction <add>, %352, %cst_166 [1] : vector<64x32xf32> to vector<64xf32>
    %354 = vector.shape_cast %353 : vector<64xf32> to vector<64x1xf32>
    %cst_167 = arith.constant 3.200000e+01 : f32
    %355 = vector.broadcast %cst_167 : f32 to vector<64x1xf32>
    %356 = arith.divf %354, %355 : vector<64x1xf32>
    %357 = vector.broadcast %349 : vector<64x1xf32> to vector<64x32xf32>
    %358 = arith.subf %345, %357 : vector<64x32xf32>
    %cst_168 = arith.constant 9.99999974E-6 : f32
    %359 = vector.broadcast %cst_168 : f32 to vector<64x1xf32>
    %360 = arith.addf %356, %359 : vector<64x1xf32>
    %361 = math.rsqrt %360 : vector<64x1xf32>
    %362 = vector.broadcast %361 : vector<64x1xf32> to vector<64x32xf32>
    %363 = arith.mulf %358, %362 : vector<64x32xf32>
    %364 = vector.broadcast %12 : vector<1x32xf32> to vector<64x32xf32>
    %365 = arith.mulf %363, %364 : vector<64x32xf32>
    %366 = vector.broadcast %13 : vector<1x32xf32> to vector<64x32xf32>
    %367 = arith.addf %365, %366 : vector<64x32xf32>
    %cst_169 = arith.constant dense<0.000000e+00> : vector<64x64xf32>
    %368 = tpu.matmul %367, %14, %cst_169 {dimension_numbers = #tpu.dot_dimension_numbers<[1], [0], [0], [1], [0, 0, 1, 1], [], []>} : vector<64x32xf32>, vector<32x64xf32>, vector<64x64xf32> -> vector<64x64xf32>
    %369 = vector.broadcast %15 : vector<1x64xf32> to vector<64x64xf32>
    %370 = arith.addf %368, %369 : vector<64x64xf32>
    %cst_170 = arith.constant 5.000000e-01 : f32
    %371 = vector.broadcast %cst_170 : f32 to vector<64x64xf32>
    %372 = arith.mulf %371, %370 : vector<64x64xf32>
    %cst_171 = arith.constant 0.707106769 : f32
    %373 = vector.broadcast %cst_171 : f32 to vector<64x64xf32>
    %374 = arith.mulf %370, %373 : vector<64x64xf32>
    %375 = math.absf %374 : vector<64x64xf32>
    %cst_172 = arith.constant 0.327591091 : f32
    %376 = vector.broadcast %cst_172 : f32 to vector<64x64xf32>
    %377 = arith.mulf %376, %375 : vector<64x64xf32>
    %cst_173 = arith.constant 1.000000e+00 : f32
    %378 = vector.broadcast %cst_173 : f32 to vector<64x64xf32>
    %379 = arith.addf %378, %377 : vector<64x64xf32>
    %cst_174 = arith.constant 1.000000e+00 : f32
    %380 = vector.broadcast %cst_174 : f32 to vector<64x64xf32>
    %381 = arith.divf %380, %379 : vector<64x64xf32>
    %cst_175 = arith.constant 1.06140542 : f32
    %382 = vector.broadcast %cst_175 : f32 to vector<64x64xf32>
    %383 = arith.mulf %382, %381 : vector<64x64xf32>
    %cst_176 = arith.constant -1.45315206 : f32
    %384 = vector.broadcast %cst_176 : f32 to vector<64x64xf32>
    %385 = arith.addf %383, %384 : vector<64x64xf32>
    %386 = arith.mulf %385, %381 : vector<64x64xf32>
    %cst_177 = arith.constant 1.42141378 : f32
    %387 = vector.broadcast %cst_177 : f32 to vector<64x64xf32>
    %388 = arith.addf %386, %387 : vector<64x64xf32>
    %389 = arith.mulf %388, %381 : vector<64x64xf32>
    %cst_178 = arith.constant -0.284496725 : f32
    %390 = vector.broadcast %cst_178 : f32 to vector<64x64xf32>
    %391 = arith.addf %389, %390 : vector<64x64xf32>
    %392 = arith.mulf %391, %381 : vector<64x64xf32>
    %cst_179 = arith.constant 0.254829586 : f32
    %393 = vector.broadcast %cst_179 : f32 to vector<64x64xf32>
    %394 = arith.addf %392, %393 : vector<64x64xf32>
    %395 = arith.mulf %394, %381 : vector<64x64xf32>
    %cst_180 = arith.constant 0.000000e+00 : f32
    %396 = vector.broadcast %cst_180 : f32 to vector<64x64xf32>
    %397 = arith.subf %396, %375 : vector<64x64xf32>
    %398 = arith.mulf %397, %375 : vector<64x64xf32>
    %399 = math.exp %398 : vector<64x64xf32>
    %400 = arith.mulf %395, %399 : vector<64x64xf32>
    %cst_181 = arith.constant 1.000000e+00 : f32
    %401 = vector.broadcast %cst_181 : f32 to vector<64x64xf32>
    %402 = arith.subf %401, %400 : vector<64x64xf32>
    %cst_182 = arith.constant 0.000000e+00 : f32
    %403 = vector.broadcast %cst_182 : f32 to vector<64x64xf32>
    %404 = arith.cmpf oge, %374, %403 : vector<64x64xf32>
    %cst_183 = arith.constant 0.000000e+00 : f32
    %405 = vector.broadcast %cst_183 : f32 to vector<64x64xf32>
    %406 = arith.subf %405, %402 : vector<64x64xf32>
    %407 = arith.select %404, %402, %406 : vector<64x64xi1>, vector<64x64xf32>
    %cst_184 = arith.constant 1.000000e+00 : f32
    %408 = vector.broadcast %cst_184 : f32 to vector<64x64xf32>
    %409 = arith.addf %408, %407 : vector<64x64xf32>
    %410 = arith.mulf %372, %409 : vector<64x64xf32>
    %cst_185 = arith.constant dense<0.000000e+00> : vector<64x32xf32>
    %411 = tpu.matmul %410, %16, %cst_185 {dimension_numbers = #tpu.dot_dimension_numbers<[1], [0], [0], [1], [0, 0, 1, 1], [], []>} : vector<64x64xf32>, vector<64x32xf32>, vector<64x32xf32> -> vector<64x32xf32>
    %412 = vector.broadcast %17 : vector<1x32xf32> to vector<64x32xf32>
    %413 = arith.addf %411, %412 : vector<64x32xf32>
    %414 = arith.addf %413, %312 : vector<64x32xf32>
    %c1_186 = arith.constant 1 : index
    %c0_187 = arith.constant 0 : index
    %c0_188 = arith.constant 0 : index
    %415 = vector.load %arg20[%c1_186, %c0_187, %c0_188] : memref<2x64x32xf32, #tpu.memory_space<vmem>>, vector<1x64x32xf32>
    %416 = vector.shape_cast %415 : vector<1x64x32xf32> to vector<64x32xf32>
    %417 = vector.shape_cast %414 : vector<64x32xf32> to vector<1x64x32xf32>
    tpu.vector_store %arg20[%c1_186, %c0_187, %c0_188], %417 {strides = array<i32>} : memref<2x64x32xf32, #tpu.memory_space<vmem>>, vector<1x64x32xf32>,
    return
  }
  func.func @transform_0(%arg0: i32) -> (i32, i32, i32) {
    %c0_i32 = arith.constant 0 : i32
    %c0_i32_0 = arith.constant 0 : i32
    %c0_i32_1 = arith.constant 0 : i32
    return %arg0, %c0_i32, %c0_i32_0 : i32, i32, i32
  }
  func.func @transform_1(%arg0: i32) -> (i32, i32) {
    %c0_i32 = arith.constant 0 : i32
    %c0_i32_0 = arith.constant 0 : i32
    %c0_i32_1 = arith.constant 0 : i32
    return %c0_i32, %c0_i32_0 : i32, i32
  }
  func.func @transform_2(%arg0: i32) -> (i32, i32) {
    %c0_i32 = arith.constant 0 : i32
    %c0_i32_0 = arith.constant 0 : i32
    %c0_i32_1 = arith.constant 0 : i32
    return %c0_i32, %c0_i32_0 : i32, i32
  }
  func.func @transform_3(%arg0: i32) -> (i32, i32) {
    %c0_i32 = arith.constant 0 : i32
    %c0_i32_0 = arith.constant 0 : i32
    %c0_i32_1 = arith.constant 0 : i32
    return %c0_i32, %c0_i32_0 : i32, i32
  }
  func.func @transform_4(%arg0: i32) -> (i32, i32) {
    %c0_i32 = arith.constant 0 : i32
    %c0_i32_0 = arith.constant 0 : i32
    %c0_i32_1 = arith.constant 0 : i32
    return %c0_i32, %c0_i32_0 : i32, i32
  }
  func.func @transform_5(%arg0: i32) -> (i32, i32) {
    %c0_i32 = arith.constant 0 : i32
    %c0_i32_0 = arith.constant 0 : i32
    %c0_i32_1 = arith.constant 0 : i32
    return %c0_i32, %c0_i32_0 : i32, i32
  }
  func.func @transform_6(%arg0: i32) -> (i32, i32) {
    %c0_i32 = arith.constant 0 : i32
    %c0_i32_0 = arith.constant 0 : i32
    %c0_i32_1 = arith.constant 0 : i32
    return %c0_i32, %c0_i32_0 : i32, i32
  }
  func.func @transform_7(%arg0: i32) -> (i32, i32) {
    %c0_i32 = arith.constant 0 : i32
    %c0_i32_0 = arith.constant 0 : i32
    %c0_i32_1 = arith.constant 0 : i32
    return %c0_i32, %c0_i32_0 : i32, i32
  }
  func.func @transform_8(%arg0: i32) -> (i32, i32) {
    %c0_i32 = arith.constant 0 : i32
    %c0_i32_0 = arith.constant 0 : i32
    %c0_i32_1 = arith.constant 0 : i32
    return %c0_i32, %c0_i32_0 : i32, i32
  }
  func.func @transform_9(%arg0: i32) -> (i32, i32) {
    %c0_i32 = arith.constant 0 : i32
    %c0_i32_0 = arith.constant 0 : i32
    %c0_i32_1 = arith.constant 0 : i32
    return %c0_i32, %c0_i32_0 : i32, i32
  }
  func.func @transform_10(%arg0: i32) -> (i32, i32) {
    %c0_i32 = arith.constant 0 : i32
    %c0_i32_0 = arith.constant 0 : i32
    %c0_i32_1 = arith.constant 0 : i32
    return %c0_i32, %c0_i32_0 : i32, i32
  }
  func.func @transform_11(%arg0: i32) -> (i32, i32) {
    %c0_i32 = arith.constant 0 : i32
    %c0_i32_0 = arith.constant 0 : i32
    %c0_i32_1 = arith.constant 0 : i32
    return %c0_i32, %c0_i32_0 : i32, i32
  }
  func.func @transform_12(%arg0: i32) -> (i32, i32) {
    %c0_i32 = arith.constant 0 : i32
    %c0_i32_0 = arith.constant 0 : i32
    %c0_i32_1 = arith.constant 0 : i32
    return %c0_i32, %c0_i32_0 : i32, i32
  }
  func.func @transform_13(%arg0: i32) -> (i32, i32) {
    %c0_i32 = arith.constant 0 : i32
    %c0_i32_0 = arith.constant 0 : i32
    %c0_i32_1 = arith.constant 0 : i32
    return %c0_i32, %c0_i32_0 : i32, i32
  }
  func.func @transform_14(%arg0: i32) -> (i32, i32) {
    %c0_i32 = arith.constant 0 : i32
    %c0_i32_0 = arith.constant 0 : i32
    %c0_i32_1 = arith.constant 0 : i32
    return %c0_i32, %c0_i32_0 : i32, i32
  }
  func.func @transform_15(%arg0: i32) -> (i32, i32) {
    %c0_i32 = arith.constant 0 : i32
    %c0_i32_0 = arith.constant 0 : i32
    %c0_i32_1 = arith.constant 0 : i32
    return %c0_i32, %c0_i32_0 : i32, i32
  }
  func.func @transform_16(%arg0: i32) -> (i32, i32) {
    %c0_i32 = arith.constant 0 : i32
    %c0_i32_0 = arith.constant 0 : i32
    %c0_i32_1 = arith.constant 0 : i32
    return %c0_i32, %c0_i32_0 : i32, i32
  }
  func.func @transform_17(%arg0: i32) -> (i32, i32) {
    %c0_i32 = arith.constant 0 : i32
    %c0_i32_0 = arith.constant 0 : i32
    %c0_i32_1 = arith.constant 0 : i32
    return %c0_i32, %c0_i32_0 : i32, i32
  }
  func.func @transform_18(%arg0: i32) -> (i32, i32) {
    %c0_i32 = arith.constant 0 : i32
    %c0_i32_0 = arith.constant 0 : i32
    %c0_i32_1 = arith.constant 0 : i32
    return %c0_i32, %c0_i32_0 : i32, i32
  }
  func.func @transform_19(%arg0: i32) -> (i32, i32, i32) {
    %c0_i32 = arith.constant 0 : i32
    %c0_i32_0 = arith.constant 0 : i32
    %c0_i32_1 = arith.constant 0 : i32
    return %arg0, %c0_i32, %c0_i32_0 : i32, i32, i32
  }
}

</mosaic_0001>

<bundles_post_ra>
// kernel: tpu_custom_call.1
= control target key start
LH: loop header
LB: loop body
LE: loop exit
PB: predicated region body
PF: predicated region fallthrough
CT: control target
= control target key end

     0   :  { %vm163_vm0 = vcmask 261120   ;;  %s5549_s21 = smov 32   ;;  %v8038_v12 = vmov 0.0|0.0   ;;  %vm207_vm1 = vcmask 523264   ;;  %vm5551_vm2 = vmmov 0   ;;  %s5555_s27 = smov 127   ;;  %s8011_s0 = inlined_call_operand.vmem [shape: f32[2,64,32], index: 0, kind: input, shape index: {}]   ;;  %s8012_s1 = inlined_call_operand.vmem [shape: f32[128,64], index: 1, kind: input, shape index: {}]   ;;  %s8013_s2 = inlined_call_operand.vmem [shape: f32[1,64], index: 2, kind: input, shape index: {}]   ;;  %s8014_s5 = inlined_call_operand.vmem [shape: f32[128,64], index: 5, kind: input, shape index: {}]   ;;  %s8015_s6 = inlined_call_operand.vmem [shape: f32[128,1], index: 6, kind: input, shape index: {}]   ;;  %s8016_s8 = inlined_call_operand.vmem [shape: f32[64,1], index: 8, kind: input, shape index: {}]   ;;  %s8017_s3 = inlined_call_operand.vmem [shape: f32[1,32], index: 3, kind: input, shape index: {}]   ;;  %s8018_s4 = inlined_call_operand.vmem [shape: f32[1,32], index: 4, kind: input, shape index: {}]   ;;  %s8019_s7 = inlined_call_operand.vmem [shape: f32[64,128], index: 7, kind: input, shape index: {}]   ;;  %s8020_s12 = inlined_call_operand.vmem [shape: f32[32,1], index: 12, kind: input, shape index: {}]   ;;  %s8021_s10 = inlined_call_operand.vmem [shape: f32[2,1], index: 10, kind: input, shape index: {}]   ;;  %s8022_s9 = inlined_call_operand.vmem [shape: f32[2,32], index: 9, kind: input, shape index: {}]   ;;  %s8023_s11 = inlined_call_operand.vmem [shape: f32[32,2], index: 11, kind: input, shape index: {}]   ;;  %s8024_s15 = inlined_call_operand.vmem [shape: f32[32,64], index: 15, kind: input, shape index: {}]   ;;  %s8025_s13 = inlined_call_operand.vmem [shape: f32[1,32], index: 13, kind: input, shape index: {}]   ;;  %s8026_s14 = inlined_call_operand.vmem [shape: f32[1,32], index: 14, kind: input, shape index: {}]   ;;  %s8027_s17 = inlined_call_operand.vmem [shape: f32[64,32], index: 17, kind: input, shape index: {}]   ;;  %s8028_s16 = inlined_call_operand.vmem [shape: f32[1,64], index: 16, kind: input, shape index: {}]   ;;  %s8029_s18 = inlined_call_operand.vmem [shape: f32[1,32], index: 18, kind: input, shape index: {}]   ;;  %s8030_s19 = inlined_call_operand.vmem [shape: f32[2,64,32], index: 19, kind: output, shape index: {}]  }
   0x1   :  { %8095 = sst [smem:[#allocation45_spill]] %s8011_s0  ;;  %5005 = vmatprep.subr.bf16.mxu0 %v8038_v12  ;;  %v8036_v57 = vmov 0.0  }
   0x2   :  { %8096 = sst [smem:[#allocation46_spill]] %s8012_s1  ;;  %s8099_s20 = sld [smem:[#allocation45_spill]]  ;;  %4665 = vmatprep.mubr.msk.f32.mxu0 %vm5551_vm2, %v8036_v57 }
   0x3   :  { %8097 = sst [smem:[#allocation47_spill]] %s8013_s2  ;;  %s8102_s2 = sld [smem:[#allocation46_spill]] }
   0x4   :  { %8098 = sst [smem:[#allocation48_spill]] %s8014_s5  ;;  %s8111_s0 = sld [smem:[#allocation47_spill]] }
   0x5   :  { %s8113_s22 = sld [smem:[#allocation48_spill]] }
   0x8   :  { %v5659_v0 = vld [vmem:[%s8099_s20 + $0x20] sm:$0xff]  ;;  %v5664_v1 = vld [vmem:[%s8099_s20 + $0x28] sm:$0xff]  ;;  %v5685_v4 = vld [vmem:[%s8099_s20 + $0x30] sm:$0xff] }
   0x9   :  { %v5669_v2 = vld [vmem:[%s8099_s20] sm:$0xff]  ;;  %168 = vst.msk [vmem:[#allocation2 + $0x20] sm:$0xff] %vm163_vm0, %v5659_v0  ;;  %169 = vst.msk [vmem:[#allocation2 + $0x28] sm:$0xff] %vm163_vm0, %v5664_v1  ;;  %v5678_v3 = vld [vmem:[%s8099_s20 + $0x8] sm:$0xff] }
   0xa   :  { %164 = vst.msk [vmem:[#allocation2] sm:$0xff] %vm163_vm0, %v5669_v2  ;;  %8100 = vst [vmem:[#allocation3_spill] sm:$0xff] %v5685_v4  ;;  %v5690_v5 = vld [vmem:[%s8099_s20 + $0x38] sm:$0xff]  ;;  %v5701_v6 = vld [vmem:[%s8099_s20 + $0x10] sm:$0xff] }
   0xb   :  { %8101 = vst [vmem:[#allocation4_spill] sm:$0xff] %v5690_v5  ;;  %165 = vst.msk [vmem:[#allocation2 + $0x8] sm:$0xff] %vm163_vm0, %v5678_v3  ;;  %v5706_v7 = vld [vmem:[%s8099_s20 + $0x18] sm:$0xff]  ;;  %v62_v13 = vld [vmem:[%s8102_s2] sm:$0xff] }
   0xc   :  { %170 = vst.msk [vmem:[#allocation2 + $0x30] sm:$0xff] %vm163_vm0, %v5685_v4  ;;  %171 = vst.msk [vmem:[#allocation2 + $0x38] sm:$0xff] %vm163_vm0, %v5690_v5  ;;  %v63_v14 = vld [vmem:[%s8102_s2 + $0x8] sm:$0xff]  ;;  %v64_v15 = vld [vmem:[%s8102_s2 + $0x10] sm:$0xff] }
   0xd   :  { %166 = vst.msk [vmem:[#allocation2 + $0x10] sm:$0xff] %vm163_vm0, %v5701_v6  ;;  %167 = vst.msk [vmem:[#allocation2 + $0x18] sm:$0xff] %vm163_vm0, %v5706_v7  ;;  %v5726_v16 = vpack.c.bf16 %v63_v14, %v62_v13  ;;  %v65_v17 = vld [vmem:[%s8102_s2 + $0x18] sm:$0xff]  ;;  %v66_v19 = vld [vmem:[%s8102_s2 + $0x20] sm:$0xff] }
   0xe   :  { %v5732_v18 = vpack.c.bf16 %v65_v17, %v64_v15  ;;  %v67_v20 = vld [vmem:[%s8102_s2 + $0x28] sm:$0xff]  ;;  %v68_v22 = vld [vmem:[%s8102_s2 + $0x30] sm:$0xff]  ;;  %v69_v23 = vld [vmem:[%s8102_s2 + $0x38] sm:$0xff] }
   0xf   :  { %8103 = vst [vmem:[#allocation5_spill] sm:$0xff] %v5726_v16  ;;  %5007 = vmatpush3.bf16.msra.mxu0 %v5726_v16  ;;  %v5742_v21 = vpack.c.bf16 %v67_v20, %v66_v19  ;;  %v5752_v24 = vpack.c.bf16 %v69_v23, %v68_v22  ;;  %v70_v25 = vld [vmem:[%s8102_s2 + $0x40] sm:$0xff]  ;;  %v71_v26 = vld [vmem:[%s8102_s2 + $0x48] sm:$0xff]  ;;  %v72_v28 = vld [vmem:[%s8102_s2 + $0x50] sm:$0xff] }
  0x10   :  { %v184_v8 = vld [vmem:[#allocation2 + $0x21] ss:$2 sm:$0xff]  ;;  %8104 = vst [vmem:[#allocation6_spill] sm:$0xff] %v5732_v18  ;;  %5008 = vmatprep.subr.bf16.mxu0 %v8038_v12  ;;  %v5762_v27 = vpack.c.bf16 %v71_v26, %v70_v25  ;;  %v73_v29 = vld [vmem:[%s8102_s2 + $0x58] sm:$0xff]  ;;  %v76_v34 = vld [vmem:[%s8102_s2 + $0x70] sm:$0xff] }
  0x11   :  { %195 = vrot.lane.b32.xlu1 %v184_v8, %s5549_s21  ;;  %8105 = vst [vmem:[#allocation7_spill] sm:$0xff] %v5742_v21  ;;  %8106 = vst [vmem:[#allocation8_spill] sm:$0xff] %v5752_v24  ;;  %v5772_v30 = vpack.c.bf16 %v73_v29, %v72_v28  ;;  %v74_v31 = vld [vmem:[%s8102_s2 + $0x60] sm:$0xff]  ;;  %v75_v32 = vld [vmem:[%s8102_s2 + $0x68] sm:$0xff] }
  0x12   :  { %v180_v9 = vld [vmem:[#allocation2 + $0x1] ss:$2 sm:$0xff]  ;;  %8107 = vst [vmem:[#allocation9_spill] sm:$0xff] %v5762_v27  ;;  %v5782_v33 = vpack.c.bf16 %v75_v32, %v74_v31  ;;  %v77_v35 = vld [vmem:[%s8102_s2 + $0x78] sm:$0xff]  ;;  %v172_v39 = vld [vmem:[#allocation2] ss:$2 sm:$0xff] }
  0x13   :  { %191 = vrot.lane.b32.xlu0 %v180_v9, %s5549_s21  ;;  %v186_v10 = vld [vmem:[#allocation2 + $0x31] ss:$2 sm:$0xff]  ;;  %5010 = vmatpush3.bf16.msra.mxu0 %v5732_v18  ;;  %8108 = vst [vmem:[#allocation10_spill] sm:$0xff] %v5772_v30  ;;  %v5792_v36 = vpack.c.bf16 %v77_v35, %v76_v34  ;;  %v176_v40 = vld [vmem:[#allocation2 + $0x20] ss:$2 sm:$0xff]  ;;  %s5553_s2 = smov 64  }
  0x14   :  { %v182_v11 = vld [vmem:[#allocation2 + $0x11] ss:$2 sm:$0xff]  ;;  %5011 = vmatprep.subr.bf16.mxu0 %v8038_v12  ;;  %8109 = vst [vmem:[#allocation11_spill] sm:$0xff] %v5782_v33  ;;  %v174_v41 = vld [vmem:[#allocation2 + $0x10] ss:$2 sm:$0xff] }
  0x15   :  { %197 = vrot.lane.b32.xlu1 %v186_v10, %s5549_s21  ;;  %8110 = vst [vmem:[#allocation12_spill] sm:$0xff] %v5792_v36  ;;  %v178_v43 = vld [vmem:[#allocation2 + $0x30] ss:$2 sm:$0xff]  ;;  %v78_v29 = vld [vmem:[%s8111_s0] sm:$0x1] }
  0x17   :  { %193 = vrot.lane.b32.xlu0 %v182_v11, %s5549_s21  ;;  %5013 = vmatpush3.bf16.msra.mxu0 %v5742_v21 }
  0x18   :  { %5014 = vmatprep.subr.bf16.mxu0 %v8038_v12 }
  0x1b   :  { %5016 = vmatpush3.bf16.msra.mxu0 %v5752_v24 }
  0x1c   :  { %5017 = vmatprep.subr.bf16.mxu0 %v8038_v12 }
  0x1f   :  { %5019 = vmatpush3.bf16.msra.mxu0 %v5762_v27 }
  0x20   :  { %5020 = vmatprep.subr.bf16.mxu0 %v8038_v12 }
  0x23   :  { %5022 = vmatpush3.bf16.msra.mxu0 %v5772_v30 }
  0x24   :  { %5023 = vmatprep.subr.bf16.mxu0 %v8038_v12 }
  0x27   :  { %5025 = vmatpush3.bf16.msra.mxu0 %v5782_v33 }
  0x28   :  { %5026 = vmatprep.subr.bf16.mxu0 %v8038_v12 }
  0x2b   :  { %5028 = vmatpush3.bf16.msra.mxu0 %v5792_v36 }
  0x2c   :  { %5077 = vmatprep.subr.bf16.mxu0 %v8038_v12 }
  0x83   :  { %v196_v37 = vpop.permute.xlu1 %195 }
  0x84   :  { %v205_v46 = vsel %vm163_vm0, %v176_v40, %v196_v37  ;;  %v317_v40 = vlaneseq }
  0x85   :  { %v192_v38 = vpop.permute.xlu0 %191  ;;  %v224_v52 = vsel %vm207_vm1, %v205_v46, 0.0  ;;  %v210_v8 = vsel %vm207_vm1, %v205_v46, -inf }
  0x86   :  { %v203_v42 = vsel %vm163_vm0, %v172_v39, %v192_v38 }
  0x87   :  { %v198_v44 = vpop.permute.xlu1 %197  ;;  %v221_v48 = vsel %vm207_vm1, %v203_v42, 0.0  ;;  %v208_v11 = vsel %vm207_vm1, %v203_v42, -inf }
  0x88   :  { %v206_v50 = vsel %vm163_vm0, %v178_v43, %v198_v44 }
  0x89   :  { %v194_v45 = vpop.permute.xlu0 %193  ;;  %v226_v53 = vsel %vm207_vm1, %v206_v50, 0.0  ;;  %v211_v9 = vsel %vm207_vm1, %v206_v50, -inf }
  0x8a   :  { %v204_v47 = vsel %vm163_vm0, %v174_v41, %v194_v45  ;;  %v213_v13 = vmax.f32 %v210_v8, %v211_v9  ;;  %v5818_v41 = vshrl.u32 %v317_v40, 7 }
  0x8b   :  { %v222_v49 = vsel %vm207_vm1, %v204_v47, 0.0  ;;  %v209_v10 = vsel %vm207_vm1, %v204_v47, -inf }
  0x8c   :  { %v223_v51 = vadd.f32 %v222_v49, %v221_v48  ;;  %v212_v14 = vmax.f32 %v208_v11, %v209_v10  ;;  %8112 = vst [vmem:[#allocation13_spill] sm:$0xff] %v5818_v41  ;;  %v8035_v43 = vsub.s32 0, %v5818_v41 }
  0x8e   :  { %v225_v54 = vadd.f32 %v224_v52, %v223_v51  ;;  %v214_v15 = vmax.f32 %v212_v14, %v213_v13 }
  0x90   :  { %v227_v55 = vadd.f32 %v226_v53, %v225_v54  ;;  %v215_v17 = vrot.slane %v214_v15, 4 }
  0x92   :  { %v228_v56 = vrot.slane %v227_v55, 4  ;;  %v216_v19 = vmax.f32 %v214_v15, %v215_v17 }
  0x94   :  { %v229_v58 = vadd.f32 %v228_v56, %v227_v55  ;;  %v217_v20 = vrot.slane %v216_v19, 2 }
  0x96   :  { %v230_v59 = vrot.slane %v229_v58, 2  ;;  %v218_v22 = vmax.f32 %v216_v19, %v217_v20 }
  0x98   :  { %v231_v60 = vadd.f32 %v230_v59, %v229_v58  ;;  %v219_v23 = vrot.slane %v218_v22, 1 }
  0x9a   :  { %v232_v61 = vrot.slane %v231_v60, 1  ;;  %v220_v25 = vmax.f32 %v218_v22, %v219_v23 }
  0x9c   :  { %v233_v62 = vadd.f32 %v232_v61, %v231_v60 }
  0x9e   :  { %v235_v63 = vmul.f32 0.03125, %v233_v62 }
  0xa0   :  { %237 = vrot.lane.b32.xlu0 %v235_v63, %s5553_s2 }
 0x112   :  { %v238_v26 = vpop.permute.xlu0 %237 }
 0x113   :  { %v240_v28 = vsel %vm207_vm1, %v220_v25, %v238_v26 }
 0x114   :  { %4666 = vmatmul.mubr.f32.vlgmr.msra.gmra.mrb[0].mxu0 %v240_v28 }
 0x115   :  { %4760 = vmatprep.mubr.msk.f32.mxu0 %vm5551_vm2, %v8036_v57 }
 0x1e7   :  { %v307_v31 = vpop.f32.mrb[0].mxu0 }
 0x1e8   :  { %v308_v32 = vadd.f32 %v307_v31, %v78_v29  ;;  %v4667_v34 = vpop.f32.mrb[1].mxu0 }
 0x1ea   :  { %v311_v35 = vsub.f32 0.0, %v308_v32 }
 0x1ec   :  { %v312_v37 = vmul.f32 1.442695, %v311_v35 }
 0x1ee   :  { %5218 = vpow2.f32 %v312_v37 }
 0x1f8   :  { %v5219_v38 = vpop.eup %5218 }
 0x1f9   :  { %v314_v39 = vadd.f32 1.0, %v5219_v38 }
 0x1fb   :  { %5220 = vrcp.f32 %v314_v39 }
 0x205   :  { %v5221_v44 = vpop.eup %5220 }
 0x206   :  { %v320_v45 = vrot.slane %v5221_v44, %v8035_v43 }
 0x208   :  { %v321_v48 = vmul.f32 %v320_v45, %v203_v42  ;;  %v322_v49 = vmul.f32 %v320_v45, %v204_v47  ;;  %v323_v51 = vmul.f32 %v320_v45, %v205_v46  ;;  %v324_v52 = vmul.f32 %v320_v45, %v206_v50 }
 0x20a   :  { %325 = vxpose.xlu1.b32.start [1/4] (short) (narrow) %v321_v48, 64 }
 0x20e   :  { %326 = vxpose.xlu1.b32.cont [2/4] (short) (narrow) %v322_v49, 64 }
 0x212   :  { %327 = vxpose.xlu1.b32.cont [3/4] (short) (narrow) %v323_v51, 64 }
 0x216   :  { %328 = vxpose.xlu1.b32.end [4/4] (short) (narrow) %v324_v52, 64 }
 0x28a   :  { %v341_v53 = vpop.trf.xlu1 }
 0x28b   :  { %v357_v54 = vadd.f32 %v341_v53, %v5669_v2 }
 0x28d   :  { %v365_v55 = vsel %vm163_vm0, %v357_v54, 0.0 }
 0x28e   :  { %366 = vadd.xlane.f32.xlu0 %v365_v55  ;;  %v342_v56 = vpop.trf.xlu1 }
 0x28f   :  { %v358_v58 = vadd.f32 %v342_v56, %v5678_v3 }
 0x291   :  { %v368_v59 = vsel %vm163_vm0, %v358_v58, 0.0 }
 0x292   :  { %369 = vadd.xlane.f32.xlu0 %v368_v59  ;;  %v343_v42 = vpop.trf.xlu1 }
 0x293   :  { %v359_v47 = vadd.f32 %v343_v42, %v5701_v6 }
 0x295   :  { %v371_v46 = vsel %vm163_vm0, %v359_v47, 0.0 }
 0x296   :  { %372 = vadd.xlane.f32.xlu0 %v371_v46  ;;  %v344_v50 = vpop.trf.xlu1 }
 0x297   :  { %v360_v60 = vadd.f32 %v344_v50, %v5706_v7 }
 0x299   :  { %v374_v61 = vsel %vm163_vm0, %v360_v60, 0.0 }
 0x29a   :  { %375 = vadd.xlane.f32.xlu0 %v374_v61  ;;  %v345_v62 = vpop.trf.xlu1 }
 0x29b   :  { %v361_v63 = vadd.f32 %v345_v62, %v5659_v0 }
 0x29d   :  { %v377_v8 = vsel %vm163_vm0, %v361_v63, 0.0 }
 0x29e   :  { %378 = vadd.xlane.f32.xlu0 %v377_v8  ;;  %v346_v9 = vpop.trf.xlu1 }
 0x29f   :  { %v362_v10 = vadd.f32 %v346_v9, %v5664_v1 }
 0x2a1   :  { %v380_v11 = vsel %vm163_vm0, %v362_v10, 0.0 }
 0x2a2   :  { %381 = vadd.xlane.f32.xlu0 %v380_v11  ;;  %v347_v13 = vpop.trf.xlu1 }
 0x2a3   :  { %v363_v14 = vadd.f32 %v347_v13, %v5685_v4 }
 0x2a5   :  { %v383_v15 = vsel %vm163_vm0, %v363_v14, 0.0 }
 0x2a6   :  { %384 = vadd.xlane.f32.xlu1 %v383_v15  ;;  %v348_v17 = vpop.trf.xlu1 }
 0x2a7   :  { %v364_v19 = vadd.f32 %v348_v17, %v5690_v5  ;;  %v5554_v17 = vmov 0  }
 0x2a8   :  { %5217 = vset.pattern.permute.xlu1 %v5554_v17  ;;  %5216 = vset.pattern.permute.xlu0 %v5554_v17 }
 0x2a9   :  { %v386_v20 = vsel %vm163_vm0, %v364_v19, 0.0 }
 0x2aa   :  { %387 = vadd.xlane.f32.xlu0 %v386_v20  ;;  %v97_v20 = vld [vmem:[%s8015_s6] sm:$0xff] }
 0x31b   :  { %v367_v22 = vpop.xlane.xlu0 %366 }
 0x31c   :  { %v389_v23 = vmul.f32 0.03125, %v367_v22  ;;  %v99_v22 = vld [vmem:[%s8015_s6 + $0x10] sm:$0xff] }
 0x31e   :  { %v5839_v25 = vsub.f32 %v357_v54, %v389_v23  ;;  %v102_v23 = vld [vmem:[%s8015_s6 + $0x28] sm:$0xff] }
 0x31f   :  { %v370_v26 = vpop.xlane.xlu0 %369 }
 0x320   :  { %v390_v28 = vmul.f32 0.03125, %v370_v26  ;;  %v405_v29 = vmul.f32 %v5839_v25, %v5839_v25  ;;  %v100_v26 = vld [vmem:[%s8015_s6 + $0x18] sm:$0xff] }
 0x322   :  { %v5843_v31 = vsub.f32 %v358_v58, %v390_v28  ;;  %v413_v32 = vsel %vm163_vm0, %v405_v29, 0.0  ;;  %v104_v28 = vld [vmem:[%s8015_s6 + $0x38] sm:$0xff]  ;;  %v101_v29 = vld [vmem:[%s8015_s6 + $0x20] sm:$0xff] }
 0x323   :  { %v373_v34 = vpop.xlane.xlu0 %372  ;;  %414 = vadd.xlane.f32.xlu0 %v413_v32  ;;  %v106_v32 = vld [vmem:[%s8015_s6 + $0x48] sm:$0xff] }
 0x324   :  { %v391_v35 = vmul.f32 0.03125, %v373_v34  ;;  %v406_v37 = vmul.f32 %v5843_v31, %v5843_v31  ;;  %v103_v34 = vld [vmem:[%s8015_s6 + $0x30] sm:$0xff] }
 0x326   :  { %v5848_v38 = vsub.f32 %v359_v47, %v391_v35  ;;  %v416_v39 = vsel %vm163_vm0, %v406_v37, 0.0  ;;  %v108_v35 = vld [vmem:[%s8015_s6 + $0x58] sm:$0xff]  ;;  %v105_v37 = vld [vmem:[%s8015_s6 + $0x40] sm:$0xff] }
 0x327   :  { %v376_v40 = vpop.xlane.xlu0 %375  ;;  %417 = vadd.xlane.f32.xlu0 %v416_v39  ;;  %v110_v39 = vld [vmem:[%s8015_s6 + $0x68] sm:$0xff] }
 0x328   :  { %v392_v44 = vmul.f32 0.03125, %v376_v40  ;;  %v407_v45 = vmul.f32 %v5848_v38, %v5848_v38  ;;  %v107_v40 = vld [vmem:[%s8015_s6 + $0x50] sm:$0xff] }
 0x32a   :  { %v5853_v48 = vsub.f32 %v360_v60, %v392_v44  ;;  %v419_v49 = vsel %vm163_vm0, %v407_v45, 0.0  ;;  %v112_v44 = vld [vmem:[%s8015_s6 + $0x78] sm:$0xff]  ;;  %v109_v45 = vld [vmem:[%s8015_s6 + $0x60] sm:$0xff] }
 0x32b   :  { %v379_v51 = vpop.xlane.xlu0 %378  ;;  %420 = vadd.xlane.f32.xlu0 %v419_v49  ;;  %v122_v49 = vld [vmem:[%s8016_s8 + $0x8] sm:$0xff] }
 0x32c   :  { %v393_v52 = vmul.f32 0.03125, %v379_v51  ;;  %v408_v53 = vmul.f32 %v5853_v48, %v5853_v48  ;;  %v111_v51 = vld [vmem:[%s8015_s6 + $0x70] sm:$0xff] }
 0x32e   :  { %v5858_v54 = vsub.f32 %v361_v63, %v393_v52  ;;  %v422_v55 = vsel %vm163_vm0, %v408_v53, 0.0  ;;  %v124_v52 = vld [vmem:[%s8016_s8 + $0x18] sm:$0xff]  ;;  %v121_v53 = vld [vmem:[%s8016_s8] sm:$0xff] }
 0x32f   :  { %v382_v56 = vpop.xlane.xlu0 %381  ;;  %423 = vadd.xlane.f32.xlu0 %v422_v55  ;;  %v126_v55 = vld [vmem:[%s8016_s8 + $0x28] sm:$0xff] }
 0x330   :  { %v394_v58 = vmul.f32 0.03125, %v382_v56  ;;  %v409_v59 = vmul.f32 %v5858_v54, %v5858_v54  ;;  %v123_v56 = vld [vmem:[%s8016_s8 + $0x10] sm:$0xff] }
 0x332   :  { %v5863_v42 = vsub.f32 %v362_v10, %v394_v58  ;;  %v425_v47 = vsel %vm163_vm0, %v409_v59, 0.0  ;;  %v128_v58 = vld [vmem:[%s8016_s8 + $0x38] sm:$0xff]  ;;  %v125_v59 = vld [vmem:[%s8016_s8 + $0x20] sm:$0xff] }
 0x333   :  { %426 = vadd.xlane.f32.xlu0 %v425_v47  ;;  %v385_v46 = vpop.xlane.xlu1 %384 }
 0x334   :  { %v395_v50 = vmul.f32 0.03125, %v385_v46  ;;  %v410_v60 = vmul.f32 %v5863_v42, %v5863_v42 }
 0x336   :  { %v5868_v61 = vsub.f32 %v363_v14, %v395_v50  ;;  %v428_v62 = vsel %vm163_vm0, %v410_v60, 0.0  ;;  %v81_v14 = vld [vmem:[%s8113_s22] sm:$0xff]  ;;  %v127_v60 = vld [vmem:[%s8016_s8 + $0x30] sm:$0xff] }
 0x337   :  { %429 = vadd.xlane.f32.xlu0 %v428_v62  ;;  %v388_v63 = vpop.xlane.xlu0 %387  ;;  %4684 = vmatprep.mubr.msk.f32.mxu1 %vm207_vm1, %v81_v14 }
 0x338   :  { %v396_v8 = vmul.f32 0.03125, %v388_v63  ;;  %v411_v9 = vmul.f32 %v5868_v61, %v5868_v61 }
 0x33a   :  { %v5873_v10 = vsub.f32 %v364_v19, %v396_v8  ;;  %v431_v11 = vsel %vm163_vm0, %v411_v9, 0.0  ;;  %v98_v19 = vld [vmem:[%s8015_s6 + $0x8] sm:$0xff] }
 0x33b   :  { %432 = vadd.xlane.f32.xlu0 %v431_v11  ;;  %504 = vperm.xlu1 %5217, %v98_v19  }
 0x33c   :  { %v412_v13 = vmul.f32 %v5873_v10, %v5873_v10 }
 0x33e   :  { %v434_v15 = vsel %vm163_vm0, %v412_v13, 0.0 }
 0x33f   :  { %435 = vadd.xlane.f32.xlu0 %v434_v15  ;;  %509 = vperm.xlu1 %5217, %v99_v22  }
 0x343   :  { %514 = vperm.xlu1 %5217, %v100_v26   ;;  %v4329_v26 = vld [vmem:[%s8017_s3] ss:$0 sm:$0xff] }
 0x347   :  { %519 = vperm.xlu1 %5217, %v101_v29  }
 0x34b   :  { %529 = vperm.xlu1 %5217, %v103_v34  }
 0x34f   :  { %539 = vperm.xlu1 %5217, %v105_v37  }
 0x353   :  { %549 = vperm.xlu1 %5217, %v107_v40  }
 0x355   :  { %499 = vperm.xlu0 %5216, %v97_v20  }
 0x357   :  { %559 = vperm.xlu1 %5217, %v109_v45  }
 0x359   :  { %524 = vperm.xlu0 %5216, %v102_v23  }
 0x35b   :  { %569 = vperm.xlu1 %5217, %v111_v51  }
 0x35d   :  { %534 = vperm.xlu0 %5216, %v104_v28  }
 0x35f   :  { %1204 = vperm.xlu1 %5217, %v121_v53  }
 0x361   :  { %544 = vperm.xlu0 %5216, %v106_v32  }
 0x363   :  { %1214 = vperm.xlu1 %5217, %v123_v56  }
 0x365   :  { %554 = vperm.xlu0 %5216, %v108_v35  }
 0x367   :  { %1224 = vperm.xlu1 %5217, %v125_v59  }
 0x369   :  { %564 = vperm.xlu0 %5216, %v110_v39   ;;  %v4330_v39 = vld [vmem:[%s8018_s4] ss:$0 sm:$0xff] }
 0x36b   :  { %1234 = vperm.xlu1 %5217, %v127_v60  }
 0x36d   :  { %574 = vperm.xlu0 %5216, %v112_v44  }
 0x371   :  { %1209 = vperm.xlu0 %5216, %v122_v49  }
 0x375   :  { %1219 = vperm.xlu0 %5216, %v124_v52  }
 0x379   :  { %1229 = vperm.xlu0 %5216, %v126_v55  }
 0x37d   :  { %1239 = vperm.xlu0 %5216, %v128_v58  }
 0x3b0   :  { %v415_v47 = vpop.xlane.xlu0 %414 }
 0x3b1   :  { %v437_v46 = vmul.f32 0.03125, %v415_v47 }
 0x3b3   :  { %v445_v50 = vadd.f32 1e-05, %v437_v46 }
 0x3b4   :  { %v418_v62 = vpop.xlane.xlu0 %417 }
 0x3b5   :  { %5222 = vrsqrt.f32 %v445_v50  ;;  %v438_v63 = vmul.f32 0.03125, %v418_v62 }
 0x3b7   :  { %v446_v8 = vadd.f32 1e-05, %v438_v63 }
 0x3b8   :  { %v421_v9 = vpop.xlane.xlu0 %420 }
 0x3b9   :  { %5224 = vrsqrt.f32 %v446_v8  ;;  %v439_v11 = vmul.f32 0.03125, %v421_v9 }
 0x3bb   :  { %v447_v13 = vadd.f32 1e-05, %v439_v11 }
 0x3bc   :  { %v424_v15 = vpop.xlane.xlu0 %423 }
 0x3bd   :  { %5226 = vrsqrt.f32 %v447_v13  ;;  %v440_v14 = vmul.f32 0.03125, %v424_v15 }
 0x3bf   :  { %v5223_v17 = vpop.eup %5222  ;;  %v448_v19 = vadd.f32 1e-05, %v440_v14 }
 0x3c0   :  { %v427_v20 = vpop.xlane.xlu0 %426  ;;  %v461_v22 = vmul.f32 %v5223_v17, %v5839_v25 }
 0x3c1   :  { %5228 = vrsqrt.f32 %v448_v19  ;;  %v441_v23 = vmul.f32 0.03125, %v427_v20 }
 0x3c2   :  { %v475_v35 = vmul.f32 %v4329_v26, %v461_v22 }
 0x3c3   :  { %v5225_v28 = vpop.eup %5224  ;;  %v449_v29 = vadd.f32 1e-05, %v441_v23 }
 0x3c4   :  { %v430_v32 = vpop.xlane.xlu0 %429  ;;  %v462_v34 = vmul.f32 %v5225_v28, %v5843_v31  ;;  %v489_v49 = vadd.f32 %v4330_v39, %v475_v35 }
 0x3c5   :  { %5230 = vrsqrt.f32 %v449_v29  ;;  %v442_v37 = vmul.f32 0.03125, %v430_v32 }
 0x3c6   :  { %v476_v40 = vmul.f32 %v4329_v26, %v462_v34 }
 0x3c7   :  { %v5227_v25 = vpop.eup %5226  ;;  %v450_v44 = vadd.f32 1e-05, %v442_v37  ;;  %v86_v37 = vld [vmem:[%s8113_s22 + $0x28] sm:$0xff] }
 0x3c8   :  { %v433_v45 = vpop.xlane.xlu0 %432  ;;  %v490_v51 = vadd.f32 %v4330_v39, %v476_v40  ;;  %v463_v52 = vmul.f32 %v5227_v25, %v5848_v38  ;;  %v88_v40 = vld [vmem:[%s8113_s22 + $0x38] sm:$0xff]  ;;  %v89_v25 = vld [vmem:[%s8113_s22 + $0x40] sm:$0xff] }
 0x3c9   :  { %5232 = vrsqrt.f32 %v450_v44  ;;  %v443_v53 = vmul.f32 0.03125, %v433_v45  ;;  %v90_v44 = vld [vmem:[%s8113_s22 + $0x48] sm:$0xff]  ;;  %v91_v45 = vld [vmem:[%s8113_s22 + $0x50] sm:$0xff] }
 0x3ca   :  { %v5029_v55 = vpack.c.bf16 %v490_v51, %v489_v49  ;;  %v477_v47 = vmul.f32 %v4329_v26, %v463_v52  ;;  %v92_v49 = vld [vmem:[%s8113_s22 + $0x58] sm:$0xff]  ;;  %v93_v51 = vld [vmem:[%s8113_s22 + $0x60] sm:$0xff]  ;;  %v94_v52 = vld [vmem:[%s8113_s22 + $0x68] sm:$0xff] }
 0x3cb   :  { %v5229_v56 = vpop.eup %5228  ;;  %v451_v31 = vadd.f32 1e-05, %v443_v53  ;;  %v95_v53 = vld [vmem:[%s8113_s22 + $0x70] sm:$0xff] }
 0x3cc   :  { %5030 = vmatprep.subr.bf16.mxu1 %v5029_v55  ;;  %v436_v58 = vpop.xlane.xlu0 %435  ;;  %v464_v59 = vmul.f32 %v5229_v56, %v5853_v48  ;;  %v491_v63 = vadd.f32 %v4330_v39, %v477_v47  ;;  %v6029_v56 = vpop.permute.xlu1 %504 }
 0x3cd   :  { %5234 = vrsqrt.f32 %v451_v31  ;;  %v444_v46 = vmul.f32 0.03125, %v436_v58  ;;  %5032 = vmatpush3.bf16.msra.mxu1 %v5029_v55  ;;  %v96_v55 = vld [vmem:[%s8113_s22 + $0x78] sm:$0xff]  ;;  %8114 = vst [vmem:[#allocation14_spill] sm:$0xff] %v6029_v56 }
 0x3ce   :  { %v478_v50 = vmul.f32 %v4329_v26, %v464_v59 }
 0x3cf   :  { %v5231_v60 = vpop.eup %5230  ;;  %v452_v62 = vadd.f32 1e-05, %v444_v46 }
 0x3d0   :  { %v492_v8 = vadd.f32 %v4330_v39, %v478_v50  ;;  %v465_v38 = vmul.f32 %v5231_v60, %v5858_v54  ;;  %v6031_v31 = vpop.permute.xlu1 %509 }
 0x3d1   :  { %5236 = vrsqrt.f32 %v452_v62  ;;  %8115 = vst [vmem:[#allocation15_spill] sm:$0xff] %v6031_v31  ;;  %v113_v62 = vld [vmem:[%s8019_s7] sm:$0xff] }
 0x3d2   :  { %v5033_v9 = vpack.c.bf16 %v492_v8, %v491_v63  ;;  %v479_v15 = vmul.f32 %v4329_v26, %v465_v38 }
 0x3d3   :  { %v5233_v11 = vpop.eup %5232 }
 0x3d4   :  { %5034 = vmatprep.subr.bf16.mxu1 %v5033_v9  ;;  %v466_v13 = vmul.f32 %v5233_v11, %v5863_v42  ;;  %v493_v17 = vadd.f32 %v4330_v39, %v479_v15  ;;  %v82_v42 = vld [vmem:[%s8113_s22 + $0x8] sm:$0xff]  ;;  %v6033_v59 = vpop.permute.xlu0 %499  ;;  %v6044_v63 = vpop.permute.xlu1 %514 }
 0x3d5   :  { %5036 = vmatpush3.bf16.msra.mxu1 %v5033_v9  ;;  %8116 = vst [vmem:[#allocation16_spill] sm:$0xff] %v6033_v59  ;;  %8117 = vst [vmem:[#allocation17_spill] sm:$0xff] %v6044_v63 }
 0x3d6   :  { %v480_v48 = vmul.f32 %v4329_v26, %v466_v13 }
 0x3d7   :  { %v5235_v14 = vpop.eup %5234 }
 0x3d8   :  { %v494_v19 = vadd.f32 %v4330_v39, %v480_v48  ;;  %v467_v20 = vmul.f32 %v5235_v14, %v5868_v61  ;;  %v83_v61 = vld [vmem:[%s8113_s22 + $0x10] sm:$0xff] }
 0x3da   :  { %v5037_v22 = vpack.c.bf16 %v494_v19, %v493_v17  ;;  %v481_v54 = vmul.f32 %v4329_v26, %v467_v20 }
 0x3db   :  { %v5237_v23 = vpop.eup %5236 }
 0x3dc   :  { %5038 = vmatprep.subr.bf16.mxu1 %v5037_v22  ;;  %v468_v28 = vmul.f32 %v5237_v23, %v5873_v10  ;;  %v495_v32 = vadd.f32 %v4330_v39, %v481_v54  ;;  %v84_v10 = vld [vmem:[%s8113_s22 + $0x18] sm:$0xff]  ;;  %v6064_v54 = vpop.permute.xlu0 %524 }
 0x3dd   :  { %5040 = vmatpush3.bf16.msra.mxu1 %v5037_v22  ;;  %8118 = vst [vmem:[#allocation18_spill] sm:$0xff] %v6064_v54 }
 0x3de   :  { %v482_v29 = vmul.f32 %v4329_v26, %v468_v28  ;;  %v85_v26 = vld [vmem:[%s8113_s22 + $0x20] sm:$0xff] }
 0x3e0   :  { %v496_v34 = vadd.f32 %v4330_v39, %v482_v29  ;;  %v87_v39 = vld [vmem:[%s8113_s22 + $0x30] sm:$0xff] }
 0x3e2   :  { %v5041_v35 = vpack.c.bf16 %v496_v34, %v495_v32 }
 0x3e4   :  { %5042 = vmatprep.subr.bf16.mxu1 %v5041_v35 }
 0x3e5   :  { %5044 = vmatpush3.bf16.msra.mxu1 %v5041_v35 }
 0x3e8   :  { %4685 = vmatmul.mubr.msk.f32.vlgmr.msra.gmra.mrb[0].mxu1 %vm207_vm1, %v82_v42  ;;  %v6069_v42 = vpop.permute.xlu1 %519 }
 0x3e9   :  { %4687 = vmatprep.mubr.msk.f32.mxu1 %vm207_vm1, %v83_v61  ;;  %8119 = vst [vmem:[#allocation19_spill] sm:$0xff] %v6069_v42 }
 0x3ec   :  { %4688 = vmatmul.mubr.msk.f32.gmra.mrb[2].mxu1 %vm207_vm1, %v84_v10 }
 0x3ed   :  { %4690 = vmatprep.mubr.msk.f32.mxu1 %vm207_vm1, %v85_v26 }
 0x3f0   :  { %4691 = vmatmul.mubr.msk.f32.gmra.mrb[4].mxu1 %vm207_vm1, %v86_v37 }
 0x3f1   :  { %4693 = vmatprep.mubr.msk.f32.mxu1 %vm207_vm1, %v87_v39 }
 0x3f4   :  { %4694 = vmatmul.mubr.msk.f32.gmra.mrb[6].mxu1 %vm207_vm1, %v88_v40 }
 0x3f5   :  { %4696 = vmatprep.mubr.msk.f32.mxu1 %vm207_vm1, %v89_v25 }
 0x3f8   :  { %4697 = vmatmul.mubr.msk.f32.gmra.mrb[8].mxu1 %vm207_vm1, %v90_v44 }
 0x3f9   :  { %4699 = vmatprep.mubr.msk.f32.mxu1 %vm207_vm1, %v91_v45 }
 0x3fc   :  { %4700 = vmatmul.mubr.msk.f32.gmra.mrb[10].mxu1 %vm207_vm1, %v92_v49 }
 0x3fd   :  { %4702 = vmatprep.mubr.msk.f32.mxu1 %vm207_vm1, %v93_v51 }
 0x400   :  { %4703 = vmatmul.mubr.msk.f32.gmra.mrb[12].mxu1 %vm207_vm1, %v94_v52  ;;  %v6081_v52 = vpop.permute.xlu0 %534 }
 0x401   :  { %4705 = vmatprep.mubr.msk.f32.mxu1 %vm207_vm1, %v95_v53  ;;  %8120 = vst [vmem:[#allocation20_spill] sm:$0xff] %v6081_v52 }
 0x404   :  { %4706 = vmatmul.mubr.msk.f32.gmra.mrb[14].mxu1 %vm207_vm1, %v96_v55 }
 0x405   :  { %4740 = vmatprep.mubr.f32.mxu1 %v113_v62 }
 0x4bb   :  { %v4686_v58 = vpop.f32.mrb[0].mxu1 }
 0x4bc   :  { %v697_v47 = vadd.f32 %v4686_v58, %v6029_v56  ;;  %v691_v46 = vpop.f32.mrb[1].mxu1 }
 0x4bd   :  { %v6037_v50 = vadd.f32 %v691_v46, %v6033_v59  ;;  %v6088_v46 = vpop.permute.xlu1 %529 }
 0x4be   :  { %v6039_v60 = vmul.f32 0.70710677, %v697_v47  ;;  %8121 = vst [vmem:[#allocation21_spill] sm:$0xff] %v6088_v46 }
 0x4bf   :  { %v6047_v8 = vmul.f32 0.70710677, %v6037_v50  ;;  %v4689_v38 = vpop.f32.mrb[2].mxu1 }
 0x4c0   :  { %v803_v9 = vand.u32 2147483647, %v6039_v60  ;;  %v6051_v11 = vadd.f32 %v4689_v38, %v6044_v63  ;;  %v701_v13 = vpop.f32.mrb[3].mxu1  ;;  %vm1123_vm3 = vcmp.ge.f32.partialorder %v6039_v60, 0.0 }
 0x4c1   :  { %v802_v15 = vand.u32 2147483647, %v6047_v8  ;;  %v6055_v48 = vadd.f32 %v701_v13, %v6031_v31  ;;  %vm1122_vm4 = vcmp.ge.f32.partialorder %v6047_v8, 0.0 }
 0x4c2   :  { %v819_v14 = vmul.f32 0.3275911, %v803_v9  ;;  %v6058_v17 = vmul.f32 0.70710677, %v6051_v11  ;;  %v1027_v29 = vsub.f32 0.0, %v803_v9 }
 0x4c3   :  { %v818_v19 = vmul.f32 0.3275911, %v802_v15  ;;  %v6061_v20 = vmul.f32 0.70710677, %v6055_v48  ;;  %v4692_v28 = vpop.f32.mrb[4].mxu1  ;;  %v1026_v10 = vsub.f32 0.0, %v802_v15 }
 0x4c4   :  { %v835_v22 = vadd.f32 1.0, %v819_v14  ;;  %v805_v23 = vand.u32 2147483647, %v6058_v17  ;;  %v711_v35 = vpop.f32.mrb[5].mxu1  ;;  %v6073_v40 = vadd.f32 %v4692_v28, %v6064_v54  ;;  %v1043_v44 = vmul.f32 %v1027_v29, %v803_v9 }
 0x4c5   :  { %v834_v32 = vadd.f32 1.0, %v818_v19  ;;  %v6067_v34 = vand.u32 2147483647, %v6061_v20  ;;  %v6076_v49 = vadd.f32 %v711_v35, %v6069_v42  ;;  %v1042_v53 = vmul.f32 %v1026_v10, %v802_v15 }
 0x4c6   :  { %5238 = vrcp.f32 %v835_v22  ;;  %v821_v61 = vmul.f32 0.3275911, %v805_v23  ;;  %v6079_v51 = vmul.f32 0.70710677, %v6073_v40  ;;  %v1060_v13 = vmul.f32 1.442695, %v1043_v44 }
 0x4c7   :  { %5240 = vrcp.f32 %v834_v32  ;;  %v820_v26 = vmul.f32 0.3275911, %v6067_v34  ;;  %v4695_v37 = vpop.f32.mrb[6].mxu1  ;;  %v6084_v55 = vmul.f32 0.70710677, %v6076_v49  ;;  %v6100_v19 = vmul.f32 0.5, %v697_v47 }
 0x4c8   :  { %v837_v39 = vadd.f32 1.0, %v821_v61  ;;  %v721_v25 = vpop.f32.mrb[7].mxu1  ;;  %v807_v62 = vand.u32 2147483647, %v6079_v51  ;;  %v6092_v38 = vadd.f32 %v4695_v37, %v6081_v52  ;;  %v1029_v22 = vsub.f32 0.0, %v805_v23 }
 0x4c9   :  { %v836_v45 = vadd.f32 1.0, %v820_v26  ;;  %v806_v14 = vand.u32 2147483647, %v6084_v55  ;;  %v6098_v15 = vadd.f32 %v721_v25, %v6088_v46  ;;  %v1058_v32 = vmul.f32 1.442695, %v1042_v53 }
 0x4ca   :  { %5242 = vrcp.f32 %v837_v39  ;;  %v823_v28 = vmul.f32 0.3275911, %v807_v62  ;;  %v6103_v29 = vmul.f32 0.70710677, %v6092_v38  ;;  %v1028_v26 = vsub.f32 0.0, %v6067_v34 }
 0x4cb   :  { %5244 = vrcp.f32 %v836_v45  ;;  %v6086_v58 = vpop.f32.mrb[8].mxu1  ;;  %v822_v35 = vmul.f32 0.3275911, %v806_v14  ;;  %v6106_v61 = vmul.f32 0.70710677, %v6098_v15  ;;  %v1031_v39 = vsub.f32 0.0, %v807_v62 }
 0x4cc   :  { %v6094_v9 = vpop.f32.mrb[9].mxu1  ;;  %v839_v37 = vadd.f32 1.0, %v823_v28  ;;  %v809_v25 = vand.u32 2147483647, %v6103_v29  ;;  %v1045_v46 = vmul.f32 %v1029_v22, %v805_v23  ;;  %v1030_v42 = vsub.f32 0.0, %v806_v14 }
 0x4cd   :  { %v838_v43 = vadd.f32 1.0, %v822_v35  ;;  %v6118_v53 = vand.u32 2147483647, %v6106_v61  ;;  %vm1125_vm5 = vcmp.ge.f32.partialorder %v6058_v17, 0.0  ;;  %vm1124_vm6 = vcmp.ge.f32.partialorder %v6061_v20, 0.0 }
 0x4ce   :  { %5246 = vrcp.f32 %v839_v37  ;;  %v825_v28 = vmul.f32 0.3275911, %v809_v25  ;;  %v1033_v54 = vsub.f32 0.0, %v809_v25  ;;  %v1047_v37 = vmul.f32 %v1031_v39, %v807_v62 }
 0x4cf   :  { %v6112_v47 = vpop.f32.mrb[10].mxu1  ;;  %5248 = vrcp.f32 %v838_v43  ;;  %v824_v56 = vmul.f32 0.3275911, %v6118_v53  ;;  %v1044_v43 = vmul.f32 %v1028_v26, %v6067_v34  ;;  %v1064_v27 = vmul.f32 1.442695, %v1045_v46 }
 0x4d0   :  { %v6108_v10 = vpop.eup %5238  ;;  %v6120_v57 = vpop.f32.mrb[11].mxu1  ;;  %v841_v35 = vadd.f32 1.0, %v825_v28  ;;  %v1046_v24 = vmul.f32 %v1030_v42, %v806_v14  ;;  %v1049_v16 = vmul.f32 %v1033_v54, %v809_v25  ;;  %v6141_v34 = vmul.f32 0.5, %v6037_v50 }
 0x4d1   :  { %v6114_v44 = vpop.eup %5240  ;;  %v883_v45 = vmul.f32 1.0614054, %v6108_v10  ;;  %v1062_v46 = vmul.f32 1.442695, %v1044_v43  ;;  %vm1127_vm7 = vcmp.ge.f32.partialorder %v6079_v51, 0.0  ;;  %v6244_v8 = vmul.f32 0.5, %v6098_v15 }
 0x4d2   :  { %v882_v12 = vmul.f32 1.0614054, %v6114_v44  ;;  %5250 = vrcp.f32 %v841_v35  ;;  %v1066_v26 = vmul.f32 1.442695, %v1046_v24  ;;  %vm1126_vm8 = vcmp.ge.f32.partialorder %v6084_v55, 0.0 }
 0x4d3   :  { %v899_v52 = vadd.f32 -1.4531521, %v883_v45  ;;  %v6123_v31 = vpop.f32.mrb[12].mxu1  ;;  %vm1129_vm9 = vcmp.ge.f32.partialorder %v6103_v29, 0.0  ;;  %vm1128_vm10 = vcmp.ge.f32.partialorder %v6106_v61, 0.0 }
 0x4d4   :  { %v6125_v63 = vpop.eup %5242  ;;  %v898_v59 = vadd.f32 -1.4531521, %v882_v12  ;;  %v6128_v41 = vpop.f32.mrb[13].mxu1  ;;  %v840_v12 = vadd.f32 1.0, %v824_v56 }
 0x4d5   :  { %v6130_v36 = vpop.eup %5244  ;;  %v915_v23 = vmul.f32 %v6108_v10, %v899_v52  ;;  %v885_v22 = vmul.f32 1.0614054, %v6125_v63 }
 0x4d6   :  { %v914_v45 = vmul.f32 %v6114_v44, %v898_v59  ;;  %v884_v33 = vmul.f32 1.0614054, %v6130_v36  ;;  %5252 = vrcp.f32 %v840_v12 }
 0x4d7   :  { %v931_v28 = vadd.f32 1.4214138, %v915_v23  ;;  %v901_v30 = vadd.f32 -1.4531521, %v885_v22  ;;  %v6137_v52 = vpop.f32.mrb[14].mxu1  ;;  %5254 = vpow2.f32 %v1060_v13  ;;  %v6150_v13 = vpop.permute.xlu0 %544 }
 0x4d8   :  { %v930_v21 = vadd.f32 1.4214138, %v914_v45  ;;  %v900_v18 = vadd.f32 -1.4531521, %v884_v33  ;;  %v6144_v62 = vpop.f32.mrb[15].mxu1  ;;  %5256 = vpow2.f32 %v1058_v32  ;;  %v6148_v39 = vpop.eup %5246  ;;  %8122 = vst [vmem:[#allocation22_spill] sm:$0xff] %v6150_v13 }
 0x4d9   :  { %v947_v4 = vmul.f32 %v6108_v10, %v931_v28  ;;  %v917_v59 = vmul.f32 %v6125_v63, %v901_v30  ;;  %v1068_v33 = vmul.f32 1.442695, %v1047_v37  ;;  %5258 = vpow2.f32 %v1064_v27  ;;  %v6152_v35 = vpop.eup %5248 }
 0x4da   :  { %v946_v56 = vmul.f32 %v6114_v44, %v930_v21  ;;  %v916_v42 = vmul.f32 %v6130_v36, %v900_v18  ;;  %v1072_v30 = vmul.f32 1.442695, %v1049_v16  ;;  %v887_v23 = vmul.f32 1.0614054, %v6148_v39 }
 0x4db   :  { %v963_v54 = vadd.f32 -0.28449672, %v947_v4  ;;  %v933_v14 = vadd.f32 1.4214138, %v917_v59  ;;  %v6159_v4 = vadd.f32 %v6086_v58, %v6150_v13  ;;  %v886_v27 = vmul.f32 1.0614054, %v6152_v35 }
 0x4dc   :  { %v962_v50 = vadd.f32 -0.28449672, %v946_v56  ;;  %v932_v25 = vadd.f32 1.4214138, %v916_v42  ;;  %v1032_v16 = vsub.f32 0.0, %v6118_v53  ;;  %v6165_v45 = vpop.eup %5250  ;;  %5260 = vpow2.f32 %v1062_v46 }
 0x4dd   :  { %v979_v21 = vmul.f32 %v6108_v10, %v963_v54  ;;  %v949_v18 = vmul.f32 %v6125_v63, %v933_v14  ;;  %v903_v37 = vadd.f32 -1.4531521, %v887_v23  ;;  %v902_v59 = vadd.f32 -1.4531521, %v886_v27 }
 0x4de   :  { %v978_v24 = vmul.f32 %v6114_v44, %v962_v50  ;;  %v948_v32 = vmul.f32 %v6130_v36, %v932_v25  ;;  %v889_v42 = vmul.f32 1.0614054, %v6165_v45  ;;  %v6171_v54 = vmul.f32 0.70710677, %v6159_v4 }
 0x4df   :  { %v995_v22 = vadd.f32 0.2548296, %v979_v21  ;;  %v965_v43 = vadd.f32 -0.28449672, %v949_v18  ;;  %v919_v56 = vmul.f32 %v6148_v39, %v903_v37  ;;  %v918_v46 = vmul.f32 %v6152_v35, %v902_v59 }
 0x4e0   :  { %v994_v12 = vadd.f32 0.2548296, %v978_v24  ;;  %v964_v28 = vadd.f32 -0.28449672, %v948_v32  ;;  %v6173_v14 = vpop.eup %5252  ;;  %v905_v32 = vadd.f32 -1.4531521, %v889_v42  ;;  %5262 = vpow2.f32 %v1068_v33 }
 0x4e1   :  { %v981_v58 = vmul.f32 %v6125_v63, %v965_v43  ;;  %v1011_v50 = vmul.f32 %v6108_v10, %v995_v22  ;;  %v5255_v18 = vpop.eup %5254  ;;  %v935_v24 = vadd.f32 1.4214138, %v919_v56  ;;  %v934_v43 = vadd.f32 1.4214138, %v918_v46 }
 0x4e2   :  { %v1010_v25 = vmul.f32 %v6114_v44, %v994_v12  ;;  %v980_v21 = vmul.f32 %v6130_v36, %v964_v28  ;;  %v888_v37 = vmul.f32 1.0614054, %v6173_v14  ;;  %v5257_v13 = vpop.eup %5256  ;;  %v921_v44 = vmul.f32 %v6165_v45, %v905_v32 }
 0x4e3   :  { %v997_v23 = vadd.f32 0.2548296, %v981_v58  ;;  %v951_v10 = vmul.f32 %v6148_v39, %v935_v24  ;;  %v1048_v22 = vmul.f32 %v1032_v16, %v6118_v53  ;;  %v5259_v12 = vpop.eup %5258  ;;  %v1091_v28 = vmul.f32 %v5255_v18, %v1011_v50 }
 0x4e4   :  { %v996_v27 = vadd.f32 0.2548296, %v980_v21  ;;  %v1090_v59 = vmul.f32 %v5257_v13, %v1010_v25  ;;  %v950_v58 = vmul.f32 %v6152_v35, %v934_v43  ;;  %v904_v56 = vadd.f32 -1.4531521, %v888_v37  ;;  %v6196_v43 = vpop.permute.xlu1 %539 }
 0x4e5   :  { %v1013_v5 = vmul.f32 %v6125_v63, %v997_v23  ;;  %v967_v42 = vadd.f32 -0.28449672, %v951_v10  ;;  %v937_v21 = vadd.f32 1.4214138, %v921_v44  ;;  %v6187_v46 = vand.u32 2147483647, %v6171_v54 }
 0x4e6   :  { %v1012_v33 = vmul.f32 %v6130_v36, %v996_v27  ;;  %v966_v23 = vadd.f32 -0.28449672, %v950_v58  ;;  %5264 = vpow2.f32 %v1066_v26  ;;  %v920_v24 = vmul.f32 %v6173_v14, %v904_v56  ;;  %v5261_v16 = vpop.eup %5260 }
 0x4e7   :  { %v1093_v63 = vmul.f32 %v5259_v12, %v1013_v5  ;;  %v983_v53 = vmul.f32 %v6148_v39, %v967_v42  ;;  %v953_v13 = vmul.f32 %v6165_v45, %v937_v21  ;;  %5266 = vpow2.f32 %v1072_v30 }
 0x4e8   :  { %v1107_v50 = vsub.f32 1.0, %v1091_v28  ;;  %v1106_v36 = vsub.f32 1.0, %v1090_v59  ;;  %v982_v25 = vmul.f32 %v6152_v35, %v966_v23  ;;  %v1070_v18 = vmul.f32 1.442695, %v1048_v22 }
 0x4e9   :  { %v1092_v5 = vmul.f32 %v5261_v16, %v1012_v33  ;;  %v999_v32 = vadd.f32 0.2548296, %v983_v53  ;;  %v969_v26 = vadd.f32 -0.28449672, %v953_v13  ;;  %v827_v27 = vmul.f32 0.3275911, %v6187_v46  ;;  %v6213_v53 = vpop.permute.xlu0 %554 }
 0x4ea   :  { %v6199_v37 = vmul.f32 0.5, %v6051_v11  ;;  %v1109_v10 = vsub.f32 1.0, %v1093_v63  ;;  %v998_v30 = vadd.f32 0.2548296, %v982_v25  ;;  %v936_v44 = vadd.f32 1.4214138, %v920_v24  ;;  %v5263_v58 = vpop.eup %5262 }
 0x4eb   :  { %v6202_v12 = vmul.f32 0.5, %v6055_v48  ;;  %v1015_v28 = vmul.f32 %v6148_v39, %v999_v32  ;;  %v985_v22 = vmul.f32 %v6165_v45, %v969_v26  ;;  %v6208_v59 = vadd.f32 %v6094_v9, %v6196_v43 }
 0x4ec   :  { %v1139_v56 = vsub.f32 0.0, %v1107_v50  ;;  %v1138_v33 = vsub.f32 0.0, %v1106_v36  ;;  %v952_v11 = vmul.f32 %v6173_v14, %v936_v44  ;;  %5268 = vpow2.f32 %v1070_v18  ;;  %v6238_v44 = vpop.permute.xlu1 %549 }
 0x4ed   :  { %v1108_v42 = vsub.f32 1.0, %v1092_v5  ;;  %v1014_v21 = vmul.f32 %v6152_v35, %v998_v30  ;;  %v1001_v63 = vadd.f32 0.2548296, %v985_v22  ;;  %v843_v48 = vadd.f32 1.0, %v827_v27 }
 0x4ee   :  { %v1141_v39 = vsub.f32 0.0, %v1109_v10  ;;  %v1095_v23 = vmul.f32 %v5263_v58, %v1015_v28  ;;  %v968_v24 = vadd.f32 -0.28449672, %v952_v11  ;;  %v6217_v9 = vmul.f32 0.5, %v6073_v40 }
 0x4ef   :  { %v1017_v13 = vmul.f32 %v6165_v45, %v1001_v63  ;;  %5270 = vrcp.f32 %v843_v48  ;;  %v1155_v35 = vsel %vm1123_vm3, %v1107_v50, %v1139_v56  ;;  %v6223_v25 = vmul.f32 0.5, %v6076_v49 }
 0x4f0   :  { %v5265_v16 = vpop.eup %5264  ;;  %v984_v18 = vmul.f32 %v6173_v14, %v968_v24  ;;  %v6228_v5 = vadd.f32 %v6112_v47, %v6213_v53  ;;  %v1154_v40 = vsel %vm1122_vm4, %v1106_v36, %v1138_v33  ;;  %v1140_v26 = vsub.f32 0.0, %v1108_v42 }
 0x4f1   :  { %v5267_v32 = vpop.eup %5266  ;;  %v1094_v45 = vmul.f32 %v5265_v16, %v1014_v21  ;;  %v6234_v60 = vmul.f32 0.70710677, %v6208_v59  ;;  %v1157_v49 = vsel %vm1125_vm5, %v1109_v10, %v1141_v39  ;;  %v1111_v50 = vsub.f32 1.0, %v1095_v23  ;;  %v6257_v21 = vpop.permute.xlu0 %564 }
 0x4f2   :  { %v1097_v27 = vmul.f32 %v5267_v32, %v1017_v13  ;;  %v1000_v30 = vadd.f32 0.2548296, %v984_v18  ;;  %v6241_v47 = vmul.f32 0.5, %v6092_v38  ;;  %v1035_v36 = vsub.f32 0.0, %v6187_v46  ;;  %8123 = vst [vmem:[#allocation23_spill] sm:$0xff] %v6257_v21 }
 0x4f3   :  { %v810_v28 = vand.u32 2147483647, %v6234_v60  ;;  %v1171_v22 = vadd.f32 1.0, %v1155_v35  ;;  %v1170_v58 = vadd.f32 1.0, %v1154_v40  ;;  %v6252_v10 = vadd.f32 %v6120_v57, %v6238_v44 }
 0x4f4   :  { %v1016_v17 = vmul.f32 %v6173_v14, %v1000_v30  ;;  %v1173_v56 = vadd.f32 1.0, %v1157_v49  ;;  %v1156_v38 = vsel %vm1124_vm6, %v1108_v42, %v1140_v26  ;;  %v1110_v15 = vsub.f32 1.0, %v1094_v45  ;;  %v6289_v26 = vpop.permute.xlu1 %559 }
 0x4f5   :  { %v826_v33 = vmul.f32 0.3275911, %v810_v28  ;;  %v1143_v63 = vsub.f32 0.0, %v1111_v50  ;;  %v1113_v48 = vsub.f32 1.0, %v1097_v27  ;;  %v6260_v39 = vmul.f32 0.5, %v6159_v4  ;;  %8124 = vst [vmem:[#allocation24_spill] sm:$0xff] %v6289_v26 }
 0x4f6   :  { %v5269_v11 = vpop.eup %5268  ;;  %v6263_v14 = vmul.f32 0.70710677, %v6228_v5  ;;  %v1051_v23 = vmul.f32 %v1035_v36, %v6187_v46  ;;  %v6268_v42 = vadd.f32 %v6123_v31, %v6257_v21  ;;  %v6271_v24 = vmul.f32 %v1171_v22, %v6100_v19 }
 0x4f7   :  { %v1096_v57 = vmul.f32 %v5269_v11, %v1016_v17  ;;  %v842_v20 = vadd.f32 1.0, %v826_v33  ;;  %v6274_v13 = vmul.f32 %v1170_v58, %v6141_v34  ;;  %v1172_v16 = vadd.f32 1.0, %v1156_v38 }
 0x4f8   :  { %v813_v4 = vand.u32 2147483647, %v6263_v14  ;;  %v6280_v18 = vmul.f32 %v1173_v56, %v6199_v37  ;;  %v1142_v46 = vsub.f32 0.0, %v1110_v15  ;;  %v6283_v32 = vmul.f32 0.70710677, %v6252_v10 }
 0x4f9   :  { %v6277_v35 = vpop.eup %5270  ;;  %5272 = vrcp.f32 %v842_v20  ;;  %v1159_v31 = vsel %vm1127_vm7, %v1111_v50, %v1143_v63  ;;  %v1145_v19 = vsub.f32 0.0, %v1113_v48  ;;  %v1112_v45 = vsub.f32 1.0, %v1096_v57  ;;  %v6309_v20 = vpop.permute.xlu0 %574 }
 0x4fa   :  { %v891_v34 = vmul.f32 1.0614054, %v6277_v35  ;;  %v829_v40 = vmul.f32 0.3275911, %v813_v4  ;;  %v1076_v49 = vmul.f32 1.442695, %v1051_v23  ;;  %v6293_v30 = vmul.f32 %v1172_v16, %v6202_v12 }
 0x4fb   :  { %v1034_v37 = vsub.f32 0.0, %v810_v28  ;;  %v812_v27 = vand.u32 2147483647, %v6283_v32  ;;  %v6296_v51 = vmul.f32 0.70710677, %v6268_v42  ;;  %v1175_v50 = vadd.f32 1.0, %v1159_v31 }
 0x4fc   :  { %v907_v36 = vadd.f32 -1.4531521, %v891_v34  ;;  %v845_v22 = vadd.f32 1.0, %v829_v40  ;;  %v1158_v58 = vsel %vm1126_vm8, %v1110_v15, %v1142_v46  ;;  %v6301_v17 = vmul.f32 0.5, %v6208_v59  ;;  %8125 = vst [vmem:[#allocation25_spill] sm:$0xff] %v6309_v20  ;;  %v6316_v15 = vpop.permute.xlu1 %569 }
 0x4fd   :  { %v828_v56 = vmul.f32 0.3275911, %v812_v27  ;;  %v1161_v38 = vsel %vm1129_vm9, %v1113_v48, %v1145_v19  ;;  %v6307_v12 = vand.u32 2147483647, %v6296_v51  ;;  %v1144_v11 = vsub.f32 0.0, %v1112_v45  ;;  %8126 = vst [vmem:[#allocation26_spill] sm:$0xff] %v6316_v15 }
 0x4fe   :  { %v923_v33 = vmul.f32 %v6277_v35, %v907_v36  ;;  %5274 = vrcp.f32 %v845_v22  ;;  %v1050_v63 = vmul.f32 %v1034_v37, %v810_v28  ;;  %v1037_v57 = vsub.f32 0.0, %v813_v4 }
 0x4ff   :  { %v844_v23 = vadd.f32 1.0, %v828_v56  ;;  %5276 = vpow2.f32 %v1076_v49  ;;  %v831_v59 = vmul.f32 0.3275911, %v6307_v12  ;;  %v6314_v29 = vadd.f32 %v6128_v41, %v6289_v26 }
 0x500   :  { %v939_v55 = vadd.f32 1.4214138, %v923_v33  ;;  %v6319_v48 = vmul.f32 %v1175_v50, %v6217_v9  ;;  %v1174_v16 = vadd.f32 1.0, %v1158_v58  ;;  %v1177_v46 = vadd.f32 1.0, %v1161_v38 }
 0x501   :  { %v6323_v28 = vadd.f32 %v6137_v52, %v6309_v20  ;;  %5278 = vrcp.f32 %v844_v23  ;;  %v847_v19 = vadd.f32 1.0, %v831_v59  ;;  %v6328_v34 = vadd.f32 %v6144_v62, %v6316_v15 }
 0x502   :  { %v955_v31 = vmul.f32 %v6277_v35, %v939_v55  ;;  %v1160_v9 = vsel %vm1128_vm10, %v1112_v45, %v1144_v11  ;;  %v1074_v40 = vmul.f32 1.442695, %v1050_v63  ;;  %v1053_v49 = vmul.f32 %v1037_v57, %v813_v4 }
 0x503   :  { %v6330_v41 = vpop.eup %5272  ;;  %v6335_v37 = vmul.f32 0.70710677, %v6314_v29  ;;  %v1036_v22 = vsub.f32 0.0, %v812_v27  ;;  %5280 = vrcp.f32 %v847_v19  ;;  %v6339_v50 = vmul.f32 %v1174_v16, %v6223_v25 }
 0x504   :  { %v971_v52 = vadd.f32 -0.28449672, %v955_v31  ;;  %v890_v36 = vmul.f32 1.0614054, %v6330_v41  ;;  %v6342_v62 = vmul.f32 %v1177_v46, %v6241_v47  ;;  %v6346_v61 = vmul.f32 0.70710677, %v6323_v28 }
 0x505   :  { %v814_v58 = vand.u32 2147483647, %v6335_v37  ;;  %v1176_v4 = vadd.f32 1.0, %v1160_v9  ;;  %v6350_v38 = vmul.f32 0.70710677, %v6328_v34  ;;  %5282 = vpow2.f32 %v1074_v40 }
 0x506   :  { %v987_v45 = vmul.f32 %v6277_v35, %v971_v52  ;;  %v906_v56 = vadd.f32 -1.4531521, %v890_v36  ;;  %v1080_v33 = vmul.f32 1.442695, %v1053_v49  ;;  %v817_v25 = vand.u32 2147483647, %v6346_v61 }
 0x507   :  { %v830_v11 = vmul.f32 0.3275911, %v814_v58  ;;  %v1052_v23 = vmul.f32 %v1036_v22, %v812_v27  ;;  %v6357_v55 = vand.u32 2147483647, %v6350_v38  ;;  %v1039_v16 = vsub.f32 0.0, %v6307_v12 }
 0x508   :  { %v6353_v63 = vpop.eup %5274  ;;  %v1003_v47 = vadd.f32 0.2548296, %v987_v45  ;;  %v922_v57 = vmul.f32 %v6330_v41, %v906_v56  ;;  %v833_v31 = vmul.f32 0.3275911, %v817_v25  ;;  %v1038_v49 = vsub.f32 0.0, %v814_v58 }
 0x509   :  { %v893_v59 = vmul.f32 1.0614054, %v6353_v63  ;;  %v846_v46 = vadd.f32 1.0, %v830_v11  ;;  %v5277_v19 = vpop.eup %5276  ;;  %v832_v52 = vmul.f32 0.3275911, %v6357_v55  ;;  %v1192_v36 = vmul.f32 %v1176_v4, %v6244_v8 }
 0x50a   :  { %v1019_v9 = vmul.f32 %v6277_v35, %v1003_v47  ;;  %v938_v40 = vadd.f32 1.4214138, %v922_v57  ;;  %v849_v27 = vadd.f32 1.0, %v833_v31  ;;  %vm1131_vm11 = vcmp.ge.f32.partialorder %v6171_v54, 0.0 }
 0x50b   :  { %v909_v45 = vadd.f32 -1.4531521, %v893_v59  ;;  %5284 = vrcp.f32 %v846_v46  ;;  %v6364_v22 = vpop.eup %5278  ;;  %v1078_v15 = vmul.f32 1.442695, %v1052_v23  ;;  %v848_v20 = vadd.f32 1.0, %v832_v52 }
 0x50c   :  { %v1099_v56 = vmul.f32 %v5277_v19, %v1019_v9  ;;  %v954_v11 = vmul.f32 %v6330_v41, %v938_v40  ;;  %5286 = vpow2.f32 %v1080_v33  ;;  %v892_v47 = vmul.f32 1.0614054, %v6364_v22 }
 0x50d   :  { %v925_v35 = vmul.f32 %v6353_v63, %v909_v45  ;;  %v1055_v57 = vmul.f32 %v1039_v16, %v6307_v12  ;;  %v6371_v8 = vpop.eup %5280  ;;  %v1054_v46 = vmul.f32 %v1038_v49, %v814_v58  ;;  %5288 = vrcp.f32 %v849_v27 }
 0x50e   :  { %v1115_v4 = vsub.f32 1.0, %v1099_v56  ;;  %v970_v59 = vadd.f32 -0.28449672, %v954_v11  ;;  %v908_v19 = vadd.f32 -1.4531521, %v892_v47  ;;  %5290 = vrcp.f32 %v848_v20 }
 0x50f   :  { %v941_v31 = vadd.f32 1.4214138, %v925_v35  ;;  %v895_v9 = vmul.f32 1.0614054, %v6371_v8  ;;  %5292 = vpow2.f32 %v1078_v15  ;;  %v1041_v33 = vsub.f32 0.0, %v817_v25  ;;  %v5283_v52 = vpop.eup %5282 }
 0x510   :  { %v1147_v23 = vsub.f32 0.0, %v1115_v4  ;;  %v986_v40 = vmul.f32 %v6330_v41, %v970_v59  ;;  %v924_v12 = vmul.f32 %v6364_v22, %v908_v19  ;;  %v5045_v58 = vpack.c.bf16 %v6271_v24, %v6274_v13 }
 0x511   :  { %v957_v45 = vmul.f32 %v6353_v63, %v941_v31  ;;  %v911_v16 = vadd.f32 -1.4531521, %v895_v9  ;;  %v1084_v27 = vmul.f32 1.442695, %v1055_v57  ;;  %v1040_v56 = vsub.f32 0.0, %v6357_v55 }
 0x512   :  { %v1002_v49 = vadd.f32 0.2548296, %v986_v40  ;;  %v5049_v20 = vpack.c.bf16 %v6280_v18, %v6293_v30  ;;  %vm1130_vm12 = vcmp.ge.f32.partialorder %v6234_v60, 0.0  ;;  %v940_v11 = vadd.f32 1.4214138, %v924_v12  ;;  %5046 = vmatprep.subr.bf16.mxu1 %v5045_v58 }
 0x513   :  { %v973_v15 = vadd.f32 -0.28449672, %v957_v45  ;;  %v927_v35 = vmul.f32 %v6371_v8, %v911_v16  ;;  %v1082_v47 = vmul.f32 1.442695, %v1054_v46  ;;  %v1057_v31 = vmul.f32 %v1041_v33, %v817_v25  ;;  %5048 = vmatpush3.bf16.msra.mxu1 %v5045_v58 }
 0x514   :  { %v1018_v59 = vmul.f32 %v6330_v41, %v1002_v49  ;;  %v5053_v24 = vpack.c.bf16 %v6319_v48, %v6339_v50  ;;  %v5057_v13 = vpack.c.bf16 %v6342_v62, %v1192_v36  ;;  %v1163_v18 = vsel %vm1131_vm11, %v1115_v4, %v1147_v23  ;;  %5050 = vmatprep.subr.bf16.mxu1 %v5049_v20 }
 0x515   :  { %v6388_v57 = vpop.eup %5284  ;;  %v989_v30 = vmul.f32 %v6353_v63, %v973_v15  ;;  %v956_v19 = vmul.f32 %v6364_v22, %v940_v11  ;;  %v943_v46 = vadd.f32 1.4214138, %v927_v35  ;;  %5294 = vpow2.f32 %v1084_v27 }
 0x516   :  { %v1098_v9 = vmul.f32 %v5283_v52, %v1018_v59  ;;  %v894_v41 = vmul.f32 1.0614054, %v6388_v57  ;;  %v1056_v25 = vmul.f32 %v1040_v56, %v6357_v55  ;;  %v5287_v48 = vpop.eup %5286  ;;  %5296 = vpow2.f32 %v1082_v47 }
 0x517   :  { %v1005_v50 = vadd.f32 0.2548296, %v989_v30  ;;  %v972_v62 = vadd.f32 -0.28449672, %v956_v19  ;;  %v959_v36 = vmul.f32 %v6371_v8, %v943_v46  ;;  %v6397_v54 = vpop.eup %5288  ;;  %v1179_v4 = vadd.f32 1.0, %v1163_v18  ;;  %5052 = vmatpush3.bf16.msra.mxu1 %v5049_v20 }
 0x518   :  { %v1114_v23 = vsub.f32 1.0, %v1098_v9  ;;  %vm1133_vm13 = vcmp.ge.f32.partialorder %v6263_v14, 0.0  ;;  %v910_v40 = vadd.f32 -1.4531521, %v894_v41  ;;  %v1088_v33 = vmul.f32 1.442695, %v1057_v31  ;;  %v6400_v52 = vpop.eup %5290  ;;  %5054 = vmatprep.subr.bf16.mxu1 %v5053_v24 }
 0x519   :  { %v1021_v45 = vmul.f32 %v6353_v63, %v1005_v50  ;;  %v988_v55 = vmul.f32 %v6364_v22, %v972_v62  ;;  %v975_v12 = vadd.f32 -0.28449672, %v959_v36  ;;  %v897_v16 = vmul.f32 1.0614054, %v6397_v54  ;;  %v5293_v58 = vpop.eup %5292 }
 0x51a   :  { %v1146_v49 = vsub.f32 0.0, %v1114_v23  ;;  %v926_v27 = vmul.f32 %v6388_v57, %v910_v40  ;;  %v896_v56 = vmul.f32 1.0614054, %v6400_v52  ;;  %v1086_v15 = vmul.f32 1.442695, %v1056_v25 }
 0x51b   :  { %v1101_v11 = vmul.f32 %v5287_v48, %v1021_v45  ;;  %v1004_v35 = vadd.f32 0.2548296, %v988_v55  ;;  %v991_v20 = vmul.f32 %v6371_v8, %v975_v12  ;;  %v913_v47 = vadd.f32 -1.4531521, %v897_v16  ;;  %5056 = vmatpush3.bf16.msra.mxu1 %v5053_v24 }
 0x51c   :  { %v1195_v63 = vmul.f32 %v1179_v4, %v6260_v39  ;;  %v1162_v59 = vsel %vm1130_vm12, %v1114_v23, %v1146_v49  ;;  %v942_v31 = vadd.f32 1.4214138, %v926_v27  ;;  %v912_v18 = vadd.f32 -1.4531521, %v896_v56  ;;  %5058 = vmatprep.subr.bf16.mxu1 %v5057_v13 }
 0x51d   :  { %v1178_v30 = vadd.f32 1.0, %v1162_v59  ;;  %v1117_v19 = vsub.f32 1.0, %v1101_v11  ;;  %v1020_v46 = vmul.f32 %v6364_v22, %v1004_v35  ;;  %v1007_v9 = vadd.f32 0.2548296, %v991_v20 }
 0x51e   :  { %v958_v41 = vmul.f32 %v6388_v57, %v942_v31  ;;  %v929_v25 = vmul.f32 %v6397_v54, %v913_v47  ;;  %5298 = vpow2.f32 %v1088_v33  ;;  %v928_v48 = vmul.f32 %v6400_v52, %v912_v18 }
 0x51f   :  { %v1194_v39 = vmul.f32 %v1178_v30, %v6301_v17  ;;  %v1149_v60 = vsub.f32 0.0, %v1117_v19  ;;  %v1100_v50 = vmul.f32 %v5293_v58, %v1020_v46  ;;  %v1023_v62 = vmul.f32 %v6371_v8, %v1007_v9  ;;  %v5295_v24 = vpop.eup %5294  ;;  %5060 = vmatpush3.bf16.msra.mxu1 %v5057_v13 }
 0x520   :  { %v974_v36 = vadd.f32 -0.28449672, %v958_v41  ;;  %v945_v4 = vadd.f32 1.4214138, %v929_v25  ;;  %v944_v23 = vadd.f32 1.4214138, %v928_v48  ;;  %5300 = vpow2.f32 %v1086_v15  ;;  %v5297_v22 = vpop.eup %5296 }
 0x521   :  { %v1165_v40 = vsel %vm1133_vm13, %v1117_v19, %v1149_v60  ;;  %v1116_v45 = vsub.f32 1.0, %v1100_v50  ;;  %v1103_v33 = vmul.f32 %v5295_v24, %v1023_v62  ;;  %v5061_v55 = vpack.c.bf16 %v1195_v63, %v1194_v39 }
 0x522   :  { %v1181_v12 = vadd.f32 1.0, %v1165_v40  ;;  %v990_v17 = vmul.f32 %v6388_v57, %v974_v36  ;;  %v961_v16 = vmul.f32 %v6397_v54, %v945_v4  ;;  %v960_v8 = vmul.f32 %v6400_v52, %v944_v23 }
 0x523   :  { %v781_v58 = vmul.f32 0.5, %v6228_v5  ;;  %vm1132_vm14 = vcmp.ge.f32.partialorder %v6283_v32, 0.0  ;;  %v1148_v49 = vsub.f32 0.0, %v1116_v45  ;;  %v1119_v13 = vsub.f32 1.0, %v1103_v33  ;;  %5062 = vmatprep.subr.bf16.mxu1 %v5061_v55 }
 0x524   :  { %v1006_v27 = vadd.f32 0.2548296, %v990_v17  ;;  %v977_v14 = vadd.f32 -0.28449672, %v961_v16  ;;  %v976_v56 = vadd.f32 -0.28449672, %v960_v8  ;;  %5064 = vmatpush3.bf16.msra.mxu1 %v5061_v55 }
 0x525   :  { %v1197_v15 = vmul.f32 %v1181_v12, %v781_v58  ;;  %v780_v11 = vmul.f32 0.5, %v6252_v10  ;;  %v1164_v35 = vsel %vm1132_vm14, %v1116_v45, %v1148_v49  ;;  %v1151_v20 = vsub.f32 0.0, %v1119_v13  ;;  %v118_v58 = vld [vmem:[%s8019_s7 + $0x28] sm:$0xff]  ;;  %v119_v49 = vld [vmem:[%s8019_s7 + $0x30] sm:$0xff] }
 0x526   :  { %v1180_v47 = vadd.f32 1.0, %v1164_v35  ;;  %v1022_v63 = vmul.f32 %v6388_v57, %v1006_v27  ;;  %v993_v59 = vmul.f32 %v6397_v54, %v977_v14  ;;  %v992_v5 = vmul.f32 %v6400_v52, %v976_v56  ;;  %v6459_v27 = vpop.permute.xlu0 %1209  ;;  %v6461_v14 = vpop.permute.xlu1 %1204 }
 0x527   :  { %vm1135_vm15 = vcmp.ge.f32.partialorder %v6296_v51, 0.0  ;;  %v783_v50 = vmul.f32 0.5, %v6268_v42  ;;  %vm1134_vm3 = vcmp.ge.f32.partialorder %v6335_v37, 0.0  ;;  %v782_v4 = vmul.f32 0.5, %v6314_v29  ;;  %8127 = vst [vmem:[#allocation27_spill] sm:$0xff] %v6459_v27  ;;  %8128 = vst [vmem:[#allocation28_spill] sm:$0xff] %v6461_v14 }
 0x528   :  { %v5299_v32 = vpop.eup %5298  ;;  %v1196_v31 = vmul.f32 %v1180_v47, %v780_v11  ;;  %v1167_v18 = vsel %vm1135_vm15, %v1119_v13, %v1151_v20  ;;  %v1102_v30 = vmul.f32 %v5297_v22, %v1022_v63  ;;  %v1009_v19 = vadd.f32 0.2548296, %v993_v59  ;;  %v120_v13 = vld [vmem:[%s8019_s7 + $0x38] sm:$0xff] }
 0x529   :  { %v1008_v46 = vadd.f32 0.2548296, %v992_v5  ;;  %v1183_v48 = vadd.f32 1.0, %v1167_v18  ;;  %vm1137_vm4 = vcmp.ge.f32.partialorder %v6346_v61, 0.0  ;;  %vm1136_vm5 = vcmp.ge.f32.partialorder %v6350_v38, 0.0  ;;  %v114_v61 = vld [vmem:[%s8019_s7 + $0x8] sm:$0xff] }
 0x52a   :  { %v5301_v9 = vpop.eup %5300  ;;  %v1118_v41 = vsub.f32 1.0, %v1102_v30  ;;  %v1025_v10 = vmul.f32 %v6397_v54, %v1009_v19  ;;  %v5065_v25 = vpack.c.bf16 %v1197_v15, %v1196_v31  ;;  %v785_v42 = vmul.f32 0.5, %v6323_v28  ;;  %v115_v28 = vld [vmem:[%s8019_s7 + $0x10] sm:$0xff]  ;;  %v117_v38 = vld [vmem:[%s8019_s7 + $0x20] sm:$0xff]  ;;  %v6463_v56 = vpop.permute.xlu0 %1219 }
 0x52b   :  { %v1024_v57 = vmul.f32 %v6400_v52, %v1008_v46  ;;  %v1199_v36 = vmul.f32 %v1183_v48, %v783_v50  ;;  %v784_v12 = vmul.f32 0.5, %v6328_v34  ;;  %v116_v34 = vld [vmem:[%s8019_s7 + $0x18] sm:$0xff]  ;;  %8129 = vst [vmem:[#allocation29_spill] sm:$0xff] %v6463_v56  ;;  %v6465_v11 = vpop.permute.xlu1 %1214  ;;  %vm1420_vm6 = vcmask 7168  }
 0x52c   :  { %v1150_v39 = vsub.f32 0.0, %v1118_v41  ;;  %v1105_v60 = vmul.f32 %v5299_v32, %v1025_v10  ;;  %5066 = vmatprep.subr.bf16.mxu1 %v5065_v25  ;;  %8130 = vst [vmem:[#allocation30_spill] sm:$0xff] %v6465_v11  ;;  %vm1524_vm7 = vcmask 15360   ;;  %vm1537_vm8 = vcmask 1041408  }
 0x52d   :  { %v1104_v51 = vmul.f32 %v5301_v9, %v1024_v57  ;;  %5068 = vmatpush3.bf16.msra.mxu1 %v5065_v25 }
 0x52e   :  { %v1166_v62 = vsel %vm1134_vm3, %v1118_v41, %v1150_v39  ;;  %v1121_v24 = vsub.f32 1.0, %v1105_v60  ;;  %v6478_v18 = vpop.permute.xlu0 %1229 }
 0x52f   :  { %v1182_v23 = vadd.f32 1.0, %v1166_v62  ;;  %v1120_v54 = vsub.f32 1.0, %v1104_v51  ;;  %8131 = vst [vmem:[#allocation31_spill] sm:$0xff] %v6478_v18  ;;  %v6483_v19 = vpop.permute.xlu1 %1224 }
 0x530   :  { %v1153_v22 = vsub.f32 0.0, %v1121_v24  ;;  %8132 = vst [vmem:[#allocation32_spill] sm:$0xff] %v6483_v19 }
 0x531   :  { %v1198_v40 = vmul.f32 %v1182_v23, %v782_v4  ;;  %v1152_v52 = vsub.f32 0.0, %v1120_v54  ;;  %v6534_v4 = vld [vmem:[%s8099_s20 + $0x50] sm:$0xff]  ;;  %v6539_v23 = vld [vmem:[%s8099_s20 + $0x58] sm:$0xff] }
 0x532   :  { %v1169_v45 = vsel %vm1137_vm4, %v1121_v24, %v1153_v22  ;;  %v6510_v48 = vpop.permute.xlu0 %1239 }
 0x533   :  { %v1185_v37 = vadd.f32 1.0, %v1169_v45  ;;  %v1168_v33 = vsel %vm1136_vm5, %v1120_v54, %v1152_v52  ;;  %v5069_v55 = vpack.c.bf16 %v1199_v36, %v1198_v40  ;;  %8133 = vst [vmem:[#allocation33_spill] sm:$0xff] %v6510_v48  ;;  %v6515_v60 = vpop.permute.xlu1 %1234  ;;  %v8137_v54 = vld [vmem:[#allocation3_spill] sm:$0xff] }
 0x534   :  { %v1184_v17 = vadd.f32 1.0, %v1168_v33  ;;  %8134 = vst [vmem:[#allocation34_spill] sm:$0xff] %v6515_v60  ;;  %v6556_v45 = vld [vmem:[%s8099_s20 + $0x60] sm:$0xff] }
 0x535   :  { %v1201_v16 = vmul.f32 %v1185_v37, %v785_v42  ;;  %5070 = vmatprep.subr.bf16.mxu1 %v5069_v55  ;;  %8138 = vst [vmem:[#allocation3_spill] sm:$0xff] %v6556_v45  ;;  %v6561_v42 = vld [vmem:[%s8099_s20 + $0x68] sm:$0xff] }
 0x536   :  { %v1200_v29 = vmul.f32 %v1184_v17, %v784_v12  ;;  %5072 = vmatpush3.bf16.msra.mxu1 %v5069_v55  ;;  %8139 = vst [vmem:[#allocation35_spill] sm:$0xff] %v6561_v42  ;;  %v6571_v55 = vld [vmem:[%s8099_s20 + $0x70] sm:$0xff]  ;;  %v6576_v12 = vld [vmem:[%s8099_s20 + $0x78] sm:$0xff] }
 0x537   :  { %8140 = vst [vmem:[#allocation36_spill] sm:$0xff] %v6571_v55  ;;  %8141 = vst [vmem:[#allocation37_spill] sm:$0xff] %v6576_v12 }
 0x538   :  { %v5073_v8 = vpack.c.bf16 %v1201_v16, %v1200_v29 }
 0x53a   :  { %5074 = vmatprep.subr.bf16.mxu1 %v5073_v8 }
 0x53b   :  { %5076 = vmatpush3.bf16.msra.mxu1 %v5073_v8 }
 0x53e   :  { %4741 = vmatmul.mubr.f32.vlgmr.msra.gmra.mrb[16].mxu1 %v114_v61 }
 0x53f   :  { %4743 = vmatprep.mubr.f32.mxu1 %v115_v28 }
 0x542   :  { %4744 = vmatmul.mubr.f32.gmra.mrb[18].mxu1 %v116_v34 }
 0x543   :  { %4746 = vmatprep.mubr.f32.mxu1 %v117_v38 }
 0x546   :  { %4747 = vmatmul.mubr.f32.gmra.mrb[20].mxu1 %v118_v58 }
 0x547   :  { %4749 = vmatprep.mubr.f32.mxu1 %v119_v49 }
 0x54a   :  { %4750 = vmatmul.mubr.f32.gmra.mrb[22].mxu1 %v120_v13 }
 0x611   :  { %v4742_v15 = vpop.f32.mrb[16].mxu1 }
 0x612   :  { %v1314_v35 = vadd.f32 %v4742_v15, %v6459_v27  ;;  %v1308_v20 = vpop.f32.mrb[17].mxu1 }
 0x613   :  { %v1309_v47 = vadd.f32 %v1308_v20, %v6461_v14 }
 0x614   :  { %v6470_v63 = vadd.f32 %v1314_v35, %v5678_v3 }
 0x615   :  { %v6473_v59 = vadd.f32 %v1309_v47, %v5669_v2  ;;  %v4745_v5 = vpop.f32.mrb[18].mxu1 }
 0x616   :  { %1356 = vst.msk [vmem:[#allocation2 + $0x8] sm:$0xff] %vm163_vm0, %v6470_v63  ;;  %v1324_v32 = vadd.f32 %v4745_v5, %v6463_v56  ;;  %v1318_v31 = vpop.f32.mrb[19].mxu1 }
 0x617   :  { %1355 = vst.msk [vmem:[#allocation2] sm:$0xff] %vm163_vm0, %v6473_v59  ;;  %v1319_v30 = vadd.f32 %v1318_v31, %v6465_v11 }
 0x618   :  { %v6486_v3 = vadd.f32 %v1324_v32, %v5706_v7  ;;  %v6508_v7 = vld [vmem:[%s8099_s20 + $0x48] sm:$0xff] }
 0x619   :  { %v6489_v2 = vadd.f32 %v1319_v30, %v5701_v6  ;;  %v4748_v46 = vpop.f32.mrb[20].mxu1  ;;  %v6503_v6 = vld [vmem:[%s8099_s20 + $0x40] sm:$0xff] }
 0x61a   :  { %1358 = vst.msk [vmem:[#allocation2 + $0x18] sm:$0xff] %vm163_vm0, %v6486_v3  ;;  %v1334_v9 = vadd.f32 %v4748_v46, %v6478_v18  ;;  %v1328_v41 = vpop.f32.mrb[21].mxu1  ;;  %v135_v30 = vld [vmem:[%s8020_s12] sm:$0xff] }
 0x61b   :  { %1357 = vst.msk [vmem:[#allocation2 + $0x10] sm:$0xff] %vm163_vm0, %v6489_v2  ;;  %v1329_v10 = vadd.f32 %v1328_v41, %v6483_v19  ;;  %v130_v46 = vld [vmem:[%s8021_s10] sm:$0x3]  ;;  %v137_v41 = vld [vmem:[%s8020_s12 + $0x10] sm:$0xff] }
 0x61c   :  { %v6498_v25 = vadd.f32 %v1334_v9, %v5664_v1  ;;  %v136_v9 = vld [vmem:[%s8020_s12 + $0x8] sm:$0xff] }
 0x61d   :  { %v6513_v57 = vadd.f32 %v1329_v10, %v5659_v0  ;;  %v4751_v39 = vpop.f32.mrb[22].mxu1  ;;  %v8135_v0 = vld [vmem:[#allocation4_spill] sm:$0xff]  ;;  %v138_v10 = vld [vmem:[%s8020_s12 + $0x18] sm:$0xff] }
 0x61e   :  { %1360 = vst.msk [vmem:[#allocation2 + $0x28] sm:$0xff] %vm163_vm0, %v6498_v25  ;;  %v1344_v1 = vadd.f32 %v4751_v39, %v6510_v48  ;;  %v1338_v50 = vpop.f32.mrb[23].mxu1  ;;  %v1367_v51 = vld [vmem:[#allocation2 + $0x1] ss:$2 sm:$0xff]  ;;  %v1363_v62 = vld [vmem:[#allocation2] ss:$2 sm:$0xff] }
 0x61f   :  { %1359 = vst.msk [vmem:[#allocation2 + $0x20] sm:$0xff] %vm163_vm0, %v6513_v57  ;;  %v1339_v24 = vadd.f32 %v1338_v50, %v6515_v60  ;;  %1375 = vrot.lane.b32.xlu1 %v1367_v51, %s5549_s21  ;;  %2377 = vst.msk [vmem:[#allocation2] sm:$0xff] %vm163_vm0, %v6503_v6 }
 0x620   :  { %2378 = vst.msk [vmem:[#allocation2 + $0x8] sm:$0xff] %vm163_vm0, %v6508_v7  ;;  %v6529_v36 = vadd.f32 %v1344_v1, %v8135_v0  ;;  %8136 = vst [vmem:[#allocation4_spill] sm:$0xff] %v6534_v4 }
 0x621   :  { %v6542_v22 = vadd.f32 %v1339_v24, %v8137_v54 }
 0x622   :  { %1362 = vst.msk [vmem:[#allocation2 + $0x38] sm:$0xff] %vm163_vm0, %v6529_v36  ;;  %v1368_v40 = vld [vmem:[#allocation2 + $0x11] ss:$2 sm:$0xff]  ;;  %v1364_v52 = vld [vmem:[#allocation2 + $0x10] ss:$2 sm:$0xff] }
 0x623   :  { %1361 = vst.msk [vmem:[#allocation2 + $0x30] sm:$0xff] %vm163_vm0, %v6542_v22  ;;  %1377 = vrot.lane.b32.xlu0 %v1368_v40, %s5549_s21  ;;  %2379 = vst.msk [vmem:[#allocation2 + $0x10] sm:$0xff] %vm163_vm0, %v6534_v4 }
 0x624   :  { %2380 = vst.msk [vmem:[#allocation2 + $0x18] sm:$0xff] %vm163_vm0, %v6539_v23 }
 0x626   :  { %v1369_v37 = vld [vmem:[#allocation2 + $0x21] ss:$2 sm:$0xff]  ;;  %v1365_v33 = vld [vmem:[#allocation2 + $0x20] ss:$2 sm:$0xff] }
 0x627   :  { %1379 = vrot.lane.b32.xlu1 %v1369_v37, %s5549_s21  ;;  %2381 = vst.msk [vmem:[#allocation2 + $0x20] sm:$0xff] %vm163_vm0, %v6556_v45  ;;  %2382 = vst.msk [vmem:[#allocation2 + $0x28] sm:$0xff] %vm163_vm0, %v6561_v42  ;;  %v8142_v37 = vmov 0.0|0.0  }
 0x62a   :  { %v1370_v17 = vld [vmem:[#allocation2 + $0x31] ss:$2 sm:$0xff]  ;;  %v1366_v16 = vld [vmem:[#allocation2 + $0x30] ss:$2 sm:$0xff] }
 0x62b   :  { %1381 = vrot.lane.b32.xlu0 %v1370_v17, %s5549_s21  ;;  %2383 = vst.msk [vmem:[#allocation2 + $0x30] sm:$0xff] %vm163_vm0, %v6571_v55  ;;  %2384 = vst.msk [vmem:[#allocation2 + $0x38] sm:$0xff] %vm163_vm0, %v6576_v12 }
 0x691   :  { %v1376_v29 = vpop.permute.xlu1 %1375 }
 0x692   :  { %v6584_v8 = vsel %vm163_vm0, %v1363_v62, %v1376_v29 }
 0x693   :  { %v1408_v61 = vsel %vm207_vm1, %v6584_v8, -inf  ;;  %v1391_v28 = vsel %vm207_vm1, %v6584_v8, 0.0 }
 0x694   :  { %1409 = vmax.xlane.f32.xlu0 %v1408_v61  ;;  %1392 = vadd.xlane.f32.xlu1 %v1391_v28 }
 0x695   :  { %v1378_v34 = vpop.permute.xlu0 %1377 }
 0x696   :  { %v6591_v38 = vsel %vm163_vm0, %v1364_v52, %v1378_v34 }
 0x697   :  { %v1394_v58 = vsel %vm207_vm1, %v6591_v38, 0.0  ;;  %v1411_v49 = vsel %vm207_vm1, %v6591_v38, -inf }
 0x698   :  { %1395 = vadd.xlane.f32.xlu0 %v1394_v58  ;;  %1412 = vmax.xlane.f32.xlu1 %v1411_v49  ;;  %v129_v49 = vld [vmem:[%s8022_s9] sm:$0x3] }
 0x699   :  { %v1380_v13 = vpop.permute.xlu1 %1379 }
 0x69a   :  { %v6598_v15 = vsel %vm163_vm0, %v1365_v33, %v1380_v13  ;;  %v6638_v13 = vld [vmem:[%s8023_s11] sm:$0xff] }
 0x69b   :  { %v1397_v35 = vsel %vm207_vm1, %v6598_v15, 0.0  ;;  %v1414_v32 = vsel %vm207_vm1, %v6598_v15, -inf }
 0x69c   :  { %1398 = vadd.xlane.f32.xlu0 %v1397_v35 }
 0x69d   :  { %v1382_v20 = vpop.permute.xlu0 %1381 }
 0x69e   :  { %v6603_v47 = vsel %vm163_vm0, %v1366_v16, %v1382_v20 }
 0x69f   :  { %v1400_v5 = vsel %vm207_vm1, %v6603_v47, 0.0  ;;  %v1417_v31 = vsel %vm207_vm1, %v6603_v47, -inf }
 0x6a0   :  { %1401 = vadd.xlane.f32.xlu1 %v1400_v5  ;;  %1415 = vmax.xlane.f32.xlu0 %v1414_v32 }
 0x6a4   :  { %1418 = vmax.xlane.f32.xlu1 %v1417_v31 }
 0x6b5   :  { %1506 = vperm.xlu1 %5217, %v135_v30   ;;  %v132_v30 = vld [vmem:[%s8023_s11 + $0x8] sm:$0xff] }
 0x6b6   :  { %1427 = vperm.xlu0 %5216, %v130_v46   ;;  %v133_v46 = vld [vmem:[%s8023_s11 + $0x10] sm:$0xff] }
 0x6b9   :  { %1511 = vperm.xlu1 %5217, %v136_v9   ;;  %v134_v9 = vld [vmem:[%s8023_s11 + $0x18] sm:$0xff] }
 0x6ba   :  { %1516 = vperm.xlu0 %5216, %v137_v41  }
 0x6bd   :  { %1521 = vperm.xlu1 %5217, %v138_v10  }
 0x721   :  { %v1410_v39 = vpop.xlane.xlu0 %1409  ;;  %v1393_v1 = vpop.xlane.xlu1 %1392 }
 0x722   :  { %v1404_v50 = vmul.f32 0.015625, %v1393_v1 }
 0x724   :  { %v1421_v0 = vsel %vm1420_vm6, %v1404_v50, %v1410_v39 }
 0x725   :  { %v1396_v51 = vpop.xlane.xlu0 %1395  ;;  %v1413_v24 = vpop.xlane.xlu1 %1412 }
 0x726   :  { %v1405_v62 = vmul.f32 0.015625, %v1396_v51 }
 0x728   :  { %v1422_v54 = vsel %vm1420_vm6, %v1405_v62, %v1413_v24 }
 0x729   :  { %v5078_v40 = vpack.c.bf16 %v1422_v54, %v1421_v0  ;;  %v1399_v52 = vpop.xlane.xlu0 %1398 }
 0x72a   :  { %v1406_v16 = vmul.f32 0.015625, %v1399_v52 }
 0x72b   :  { %5079 = vmatpush3.bf16.msra.mxu0 %v5078_v40 }
 0x72c   :  { %5080 = vmatprep.subr.bf16.mxu0 %v8142_v37 }
 0x72d   :  { %v1402_v33 = vpop.xlane.xlu1 %1401  ;;  %v1416_v17 = vpop.xlane.xlu0 %1415 }
 0x72e   :  { %v1407_v29 = vmul.f32 0.015625, %v1402_v33  ;;  %v1423_v28 = vsel %vm1420_vm6, %v1406_v16, %v1416_v17 }
 0x731   :  { %v1419_v61 = vpop.xlane.xlu1 %1418 }
 0x732   :  { %v1424_v34 = vsel %vm1420_vm6, %v1407_v29, %v1419_v61 }
 0x733   :  { %v5081_v58 = vpack.c.bf16 %v1424_v34, %v1423_v28 }
 0x735   :  { %5082 = vmatpush3.bf16.msra.mxu0 %v5081_v58  ;;  %v6642_v35 = vpop.permute.xlu0 %1427  ;;  %v6659_v41 = vpop.permute.xlu1 %1506 }
 0x736   :  { %8143 = vst [vmem:[#allocation38_spill] sm:$0xff] %v6642_v35  ;;  %8144 = vst [vmem:[#allocation39_spill] sm:$0xff] %v6659_v41 }
 0x738   :  { %4761 = vmatmul.mubr.msk.f32.vlgmr.msra.gmra.mrb[2].mxu0 %vm163_vm0, %v129_v49 }
 0x739   :  { %4765 = vmatprep.mubr.msk.f32.mxu0 %vm1524_vm7, %v6638_v13  ;;  %v6661_v10 = vpop.permute.xlu1 %1511  ;;  %v6669_v0 = vpop.permute.xlu0 %1516 }
 0x73a   :  { %8145 = vst [vmem:[#allocation40_spill] sm:$0xff] %v6661_v10  ;;  %8147 = vst [vmem:[#allocation42_spill] sm:$0xff] %v6669_v0 }
 0x73d   :  { %v6666_v62 = vpop.permute.xlu1 %1521 }
 0x73e   :  { %8146 = vst [vmem:[#allocation41_spill] sm:$0xff] %v6666_v62 }
 0x80b   :  { %v1499_v20 = vpop.f32.mrb[2].mxu0 }
 0x80c   :  { %v1500_v5 = vadd.f32 %v1499_v20, %v6642_v35  ;;  %v4762_v32 = vpop.f32.mrb[3].mxu0 }
 0x80e   :  { %v1503_v31 = vmax.f32 %v1500_v5, 0.0 }
 0x810   :  { %4763 = vmatprep.subr.msk.mxu0 %vm1537_vm8, %v1503_v31 }
 0x811   :  { %4764 = vmatpush3.msk.msra.mxu0 %vm1537_vm8, %v1503_v31 }
 0x812   :  { %4766 = vmatmul.mubr.msk.f32.vlgmr.msra.gmra.mrb[4].mxu0 %vm1524_vm7, %v132_v30 }
 0x813   :  { %4768 = vmatprep.mubr.msk.f32.mxu0 %vm1524_vm7, %v133_v46 }
 0x816   :  { %4769 = vmatmul.mubr.msk.f32.gmra.mrb[6].mxu0 %vm1524_vm7, %v134_v9 }
 0x8e5   :  { %v4767_v39 = vpop.f32.mrb[4].mxu0 }
 0x8e6   :  { %v1613_v1 = vadd.f32 %v4767_v39, %v6661_v10  ;;  %v1607_v50 = vpop.f32.mrb[5].mxu0 }
 0x8e7   :  { %v1608_v51 = vadd.f32 %v1607_v50, %v6659_v41 }
 0x8e8   :  { %1632 = vrot.lane.b32.xlu1 %v1613_v1, %s5555_s27 }
 0x8e9   :  { %v4770_v24 = vpop.f32.mrb[6].mxu0  ;;  %1630 = vrot.lane.b32.xlu0 %v1608_v51, %s5555_s27 }
 0x8ea   :  { %v1623_v54 = vadd.f32 %v4770_v24, %v6666_v62  ;;  %v1617_v40 = vpop.f32.mrb[7].mxu0 }
 0x8eb   :  { %v1618_v52 = vadd.f32 %v1617_v40, %v6669_v0 }
 0x8ec   :  { %1636 = vrot.lane.b32.xlu1 %v1623_v54, %s5555_s27 }
 0x8ed   :  { %1634 = vrot.lane.b32.xlu0 %v1618_v52, %s5555_s27 }
 0x95a   :  { %v1633_v33 = vpop.permute.xlu1 %1632 }
 0x95b   :  { %v1643_v17 = vadd.f32 %v1633_v33, %v1613_v1  ;;  %v1631_v16 = vpop.permute.xlu0 %1630 }
 0x95c   :  { %v1642_v29 = vadd.f32 %v1631_v16, %v1608_v51 }
 0x95d   :  { %v1647_v61 = vsub.f32 0.0, %v1643_v17 }
 0x95e   :  { %v1646_v28 = vsub.f32 0.0, %v1642_v29  ;;  %v1637_v34 = vpop.permute.xlu1 %1636 }
 0x95f   :  { %v1652_v58 = vmul.f32 1.442695, %v1647_v61  ;;  %v1645_v49 = vadd.f32 %v1637_v34, %v1623_v54  ;;  %v1635_v20 = vpop.permute.xlu0 %1634 }
 0x960   :  { %v1650_v5 = vmul.f32 1.442695, %v1646_v28  ;;  %v1644_v32 = vadd.f32 %v1635_v20, %v1618_v52 }
 0x961   :  { %5302 = vpow2.f32 %v1652_v58  ;;  %v1649_v31 = vsub.f32 0.0, %v1645_v49 }
 0x962   :  { %5304 = vpow2.f32 %v1650_v5  ;;  %v1648_v30 = vsub.f32 0.0, %v1644_v32 }
 0x963   :  { %v1656_v46 = vmul.f32 1.442695, %v1649_v31 }
 0x964   :  { %v1654_v9 = vmul.f32 1.442695, %v1648_v30 }
 0x965   :  { %5306 = vpow2.f32 %v1656_v46 }
 0x966   :  { %5308 = vpow2.f32 %v1654_v9 }
 0x96b   :  { %v5303_v39 = vpop.eup %5302 }
 0x96c   :  { %v5305_v1 = vpop.eup %5304  ;;  %v1659_v50 = vadd.f32 1.0, %v5303_v39 }
 0x96d   :  { %v1658_v51 = vadd.f32 1.0, %v5305_v1 }
 0x96e   :  { %5310 = vrcp.f32 %v1659_v50  ;;  %v2390_v50 = vld [vmem:[#allocation2 + $0x11] ss:$2 sm:$0xff] }
 0x96f   :  { %v5307_v24 = vpop.eup %5306  ;;  %5312 = vrcp.f32 %v1658_v51  ;;  %v2391_v51 = vld [vmem:[#allocation2 + $0x21] ss:$2 sm:$0xff] }
 0x970   :  { %v5309_v40 = vpop.eup %5308  ;;  %v1661_v54 = vadd.f32 1.0, %v5307_v24 }
 0x971   :  { %v1660_v33 = vadd.f32 1.0, %v5309_v40 }
 0x972   :  { %5314 = vrcp.f32 %v1661_v54 }
 0x973   :  { %5316 = vrcp.f32 %v1660_v33 }
 0x978   :  { %v5311_v52 = vpop.eup %5310 }
 0x979   :  { %v5313_v17 = vpop.eup %5312  ;;  %1677 = vperm.xlu1 %5217, %v5311_v52  }
 0x97a   :  { %1672 = vperm.xlu0 %5216, %v5313_v17  }
 0x97c   :  { %v5315_v16 = vpop.eup %5314 }
 0x97d   :  { %v5317_v29 = vpop.eup %5316  ;;  %1687 = vperm.xlu1 %5217, %v5315_v16  }
 0x97e   :  { %1682 = vperm.xlu0 %5216, %v5317_v29  }
 0x9f8   :  { %v1678_v34 = vpop.permute.xlu1 %1677 }
 0x9f9   :  { %v1673_v61 = vpop.permute.xlu0 %1672  ;;  %v1691_v58 = vmul.f32 %v1678_v34, %v6591_v38 }
 0x9fa   :  { %v1690_v28 = vmul.f32 %v1673_v61, %v6584_v8 }
 0x9fc   :  { %1694 = vxpose.xlu0.b32.start [1/4] (short) (narrow) %v1690_v28, 64  ;;  %v1688_v5 = vpop.permute.xlu1 %1687 }
 0x9fd   :  { %v1683_v49 = vpop.permute.xlu0 %1682  ;;  %v1693_v32 = vmul.f32 %v1688_v5, %v6603_v47  ;;  %v2389_v47 = vld [vmem:[#allocation2 + $0x1] ss:$2 sm:$0xff] }
 0x9fe   :  { %v1692_v20 = vmul.f32 %v1683_v49, %v6598_v15 }
 0xa00   :  { %1695 = vxpose.xlu0.b32.cont [2/4] (short) (narrow) %v1691_v58, 64 }
 0xa04   :  { %1696 = vxpose.xlu0.b32.cont [3/4] (short) (narrow) %v1692_v20, 64 }
 0xa08   :  { %1697 = vxpose.xlu0.b32.end [4/4] (short) (narrow) %v1693_v32, 64  ;;  %v2392_v32 = vld [vmem:[#allocation2 + $0x31] ss:$2 sm:$0xff] }
 0xa7c   :  { %v1710_v31 = vpop.trf.xlu0 }
 0xa7d   :  { %v1726_v30 = vadd.f32 %v1710_v31, %v6473_v59 }
 0xa7f   :  { %v1734_v46 = vsel %vm163_vm0, %v1726_v30, 0.0 }
 0xa80   :  { %1735 = vadd.xlane.f32.xlu1 %v1734_v46  ;;  %v1711_v8 = vpop.trf.xlu0 }
 0xa81   :  { %v1727_v9 = vadd.f32 %v1711_v8, %v6470_v63 }
 0xa83   :  { %v1737_v38 = vsel %vm163_vm0, %v1727_v9, 0.0 }
 0xa84   :  { %1738 = vadd.xlane.f32.xlu1 %v1737_v38  ;;  %v1712_v39 = vpop.trf.xlu0 }
 0xa85   :  { %v1728_v15 = vadd.f32 %v1712_v39, %v6489_v2 }
 0xa87   :  { %v1740_v1 = vsel %vm163_vm0, %v1728_v15, 0.0 }
 0xa88   :  { %1741 = vadd.xlane.f32.xlu0 %v1740_v1  ;;  %v1713_v24 = vpop.trf.xlu0 }
 0xa89   :  { %v1729_v54 = vadd.f32 %v1713_v24, %v6486_v3 }
 0xa8b   :  { %v1743_v17 = vsel %vm163_vm0, %v1729_v54, 0.0 }
 0xa8c   :  { %v1714_v40 = vpop.trf.xlu0 }
 0xa8d   :  { %v1730_v52 = vadd.f32 %v1714_v40, %v6513_v57 }
 0xa8f   :  { %v1746_v61 = vsel %vm163_vm0, %v1730_v52, 0.0 }
 0xa90   :  { %v1715_v33 = vpop.trf.xlu0 }
 0xa91   :  { %v1731_v29 = vadd.f32 %v1715_v33, %v6498_v25 }
 0xa93   :  { %v1749_v34 = vsel %vm163_vm0, %v1731_v29, 0.0 }
 0xa94   :  { %v1716_v16 = vpop.trf.xlu0 }
 0xa95   :  { %2397 = vrot.lane.b32.xlu1 %v2389_v47, %s5549_s21  ;;  %v6694_v28 = vadd.f32 %v1716_v16, %v6542_v22 }
 0xa97   :  { %v1752_v20 = vsel %vm163_vm0, %v6694_v28, 0.0 }
 0xa98   :  { %v1717_v58 = vpop.trf.xlu0 }
 0xa99   :  { %2399 = vrot.lane.b32.xlu1 %v2390_v50, %s5549_s21  ;;  %v6698_v49 = vadd.f32 %v1717_v58, %v6529_v36  ;;  %v144_v58 = vld [vmem:[%s8024_s15 + $0x18] sm:$0xff] }
 0xa9b   :  { %v1755_v5 = vsel %vm163_vm0, %v6698_v49, 0.0 }
 0xa9d   :  { %2401 = vrot.lane.b32.xlu1 %v2391_v51, %s5549_s21 }
 0xac1   :  { %1744 = vadd.xlane.f32.xlu1 %v1743_v17 }
 0xac5   :  { %1747 = vadd.xlane.f32.xlu1 %v1746_v61  ;;  %v142_v61 = vld [vmem:[%s8024_s15 + $0x8] sm:$0xff] }
 0xac9   :  { %1750 = vadd.xlane.f32.xlu1 %v1749_v34 }
 0xacd   :  { %1753 = vadd.xlane.f32.xlu1 %v1752_v20 }
 0xad1   :  { %1756 = vadd.xlane.f32.xlu1 %v1755_v5 }
 0xae2   :  { %2403 = vrot.lane.b32.xlu1 %v2392_v32, %s5549_s21 }
 0xb0d   :  { %v1736_v31 = vpop.xlane.xlu1 %1735 }
 0xb0e   :  { %v1758_v46 = vmul.f32 0.03125, %v1736_v31 }
 0xb10   :  { %v6705_v8 = vsub.f32 %v1726_v30, %v1758_v46 }
 0xb11   :  { %v1739_v38 = vpop.xlane.xlu1 %1738 }
 0xb12   :  { %v1759_v39 = vmul.f32 0.03125, %v1739_v38  ;;  %v1774_v1 = vmul.f32 %v6705_v8, %v6705_v8 }
 0xb14   :  { %v6709_v47 = vsub.f32 %v1727_v9, %v1759_v39  ;;  %v1782_v50 = vsel %vm163_vm0, %v1774_v1, 0.0  ;;  %v141_v9 = vld [vmem:[%s8024_s15] sm:$0xff] }
 0xb15   :  { %1783 = vadd.xlane.f32.xlu1 %v1782_v50  ;;  %v1742_v51 = vpop.xlane.xlu0 %1741  ;;  %v6726_v34 = vpack.c.bf16 %v142_v61, %v141_v9  ;;  %v2398_v5 = vpop.permute.xlu1 %2397  ;;  %v2386_v9 = vld [vmem:[#allocation2 + $0x10] ss:$2 sm:$0xff] }
 0xb16   :  { %v1760_v24 = vmul.f32 0.03125, %v1742_v51  ;;  %v1775_v40 = vmul.f32 %v6709_v47, %v6709_v47 }
 0xb17   :  { %8148 = vst [vmem:[#allocation43_spill] sm:$0xff] %v6726_v34  ;;  %5084 = vmatprep.subr.bf16.mxu0 %v6726_v34 }
 0xb18   :  { %v6714_v33 = vsub.f32 %v1728_v15, %v1760_v24  ;;  %v1785_v30 = vsel %vm163_vm0, %v1775_v40, 0.0  ;;  %5086 = vmatpush3.bf16.msra.mxu0 %v6726_v34  ;;  %v143_v15 = vld [vmem:[%s8024_s15 + $0x10] sm:$0xff] }
 0xb19   :  { %1786 = vadd.xlane.f32.xlu0 %v1785_v30  ;;  %v6736_v20 = vpack.c.bf16 %v144_v58, %v143_v15  ;;  %v2400_v32 = vpop.permute.xlu1 %2399  ;;  %v2385_v15 = vld [vmem:[#allocation2] ss:$2 sm:$0xff] }
 0xb1a   :  { %v1776_v17 = vmul.f32 %v6714_v33, %v6714_v33  ;;  %v2387_v58 = vld [vmem:[#allocation2 + $0x20] ss:$2 sm:$0xff] }
 0xb1b   :  { %8149 = vst [vmem:[#allocation44_spill] sm:$0xff] %v6736_v20  ;;  %5088 = vmatprep.subr.bf16.mxu0 %v6736_v20 }
 0xb1c   :  { %v1788_v16 = vsel %vm163_vm0, %v1776_v17, 0.0  ;;  %5090 = vmatpush3.bf16.msra.mxu0 %v6736_v20 }
 0xb1d   :  { %1789 = vadd.xlane.f32.xlu0 %v1788_v16  ;;  %5107 = vmatprep.subr.bf16.mxu0 %v8142_v37  ;;  %v2402_v31 = vpop.permute.xlu1 %2401 }
 0xb4e   :  { %v1745_v46 = vpop.xlane.xlu1 %1744 }
 0xb4f   :  { %v1761_v38 = vmul.f32 0.03125, %v1745_v46 }
 0xb51   :  { %v6741_v39 = vsub.f32 %v1729_v54, %v1761_v38 }
 0xb52   :  { %v1748_v1 = vpop.xlane.xlu1 %1747 }
 0xb53   :  { %v1762_v50 = vmul.f32 0.03125, %v1748_v1  ;;  %v1777_v51 = vmul.f32 %v6741_v39, %v6741_v39 }
 0xb55   :  { %v6745_v24 = vsub.f32 %v1730_v52, %v1762_v50  ;;  %v1791_v40 = vsel %vm163_vm0, %v1777_v51, 0.0  ;;  %v6754_v52 = vsel %vm163_vm0, %v2386_v9, %v2400_v32  ;;  %v6759_v50 = vsel %vm163_vm0, %v2385_v15, %v2398_v5  ;;  %v2388_v9 = vld [vmem:[#allocation2 + $0x30] ss:$2 sm:$0xff] }
 0xb56   :  { %v1751_v30 = vpop.xlane.xlu1 %1750  ;;  %1792 = vadd.xlane.f32.xlu0 %v1791_v40  ;;  %v6762_v51 = vsel %vm163_vm0, %v2387_v58, %v2402_v31  ;;  %v2426_v5 = vsel %vm207_vm1, %v6759_v50, 0.0 }
 0xb57   :  { %v1763_v17 = vmul.f32 0.03125, %v1751_v30  ;;  %v1778_v16 = vmul.f32 %v6745_v24, %v6745_v24  ;;  %v2427_v30 = vsel %vm207_vm1, %v6754_v52, 0.0  ;;  %v2429_v31 = vsel %vm207_vm1, %v6762_v51, 0.0 }
 0xb59   :  { %v6750_v61 = vsub.f32 %v1731_v29, %v1763_v17  ;;  %v1794_v54 = vsel %vm163_vm0, %v1778_v16, 0.0 }
 0xb5a   :  { %v1754_v46 = vpop.xlane.xlu1 %1753  ;;  %1795 = vadd.xlane.f32.xlu0 %v1794_v54 }
 0xb5b   :  { %v1764_v38 = vmul.f32 0.03125, %v1754_v46  ;;  %v1779_v1 = vmul.f32 %v6750_v61, %v6750_v61 }
 0xb5d   :  { %v6765_v29 = vsub.f32 %v6694_v28, %v1764_v38  ;;  %v1797_v40 = vsel %vm163_vm0, %v1779_v1, 0.0  ;;  %v2428_v28 = vadd.f32 %v2427_v30, %v2426_v5 }
 0xb5e   :  { %v1757_v32 = vpop.xlane.xlu1 %1756  ;;  %1798 = vadd.xlane.f32.xlu0 %v1797_v40 }
 0xb5f   :  { %v1765_v17 = vmul.f32 0.03125, %v1757_v32  ;;  %v1780_v16 = vmul.f32 %v6765_v29, %v6765_v29  ;;  %v2430_v46 = vadd.f32 %v2429_v31, %v2428_v28 }
 0xb61   :  { %v6777_v54 = vsub.f32 %v6698_v49, %v1765_v17  ;;  %v1800_v15 = vsel %vm163_vm0, %v1780_v16, 0.0 }
 0xb62   :  { %v2404_v58 = vpop.permute.xlu1 %2403  ;;  %1801 = vadd.xlane.f32.xlu0 %v1800_v15 }
 0xb63   :  { %v6781_v38 = vsel %vm163_vm0, %v2388_v9, %v2404_v58  ;;  %v1781_v1 = vmul.f32 %v6777_v54, %v6777_v54 }
 0xb64   :  { %v2431_v40 = vsel %vm207_vm1, %v6781_v38, 0.0 }
 0xb65   :  { %v2432_v32 = vadd.f32 %v2431_v40, %v2430_v46  ;;  %v1803_v30 = vsel %vm163_vm0, %v1781_v1, 0.0 }
 0xb66   :  { %1804 = vadd.xlane.f32.xlu0 %v1803_v30 }
 0xb67   :  { %v2433_v49 = vrot.slane %v2432_v32, 4 }
 0xb69   :  { %v2434_v17 = vadd.f32 %v2433_v49, %v2432_v32  ;;  %v6798_v49 = vld [vmem:[%s8026_s14] ss:$0 sm:$0xff] }
 0xb6b   :  { %v2435_v5 = vrot.slane %v2434_v17, 2 }
 0xb6d   :  { %v2436_v16 = vadd.f32 %v2435_v5, %v2434_v17 }
 0xb6f   :  { %v2437_v0 = vrot.slane %v2436_v16, 1 }
 0xb71   :  { %v2438_v15 = vadd.f32 %v2437_v0, %v2436_v16  ;;  %v6792_v0 = vld [vmem:[%s8025_s13] ss:$0 sm:$0xff] }
 0xb73   :  { %v2439_v31 = vmul.f32 0.03125, %v2438_v15 }
 0xb75   :  { %2441 = vrot.lane.b32.xlu1 %v2439_v31, %s5553_s2 }
 0xba2   :  { %v1784_v9 = vpop.xlane.xlu1 %1783 }
 0xba3   :  { %v1806_v28 = vmul.f32 0.03125, %v1784_v9  ;;  %v8150_v9 = vld [vmem:[#allocation5_spill] sm:$0xff] }
 0xba5   :  { %v1814_v58 = vadd.f32 1e-05, %v1806_v28 }
 0xba6   :  { %v1787_v62 = vpop.xlane.xlu0 %1786 }
 0xba7   :  { %5318 = vrsqrt.f32 %v1814_v58  ;;  %v1807_v41 = vmul.f32 0.03125, %v1787_v62  ;;  %v8152_v58 = vld [vmem:[#allocation7_spill] sm:$0xff] }
 0xba9   :  { %v1815_v10 = vadd.f32 1e-05, %v1807_v41 }
 0xbaa   :  { %v1790_v46 = vpop.xlane.xlu0 %1789 }
 0xbab   :  { %5320 = vrsqrt.f32 %v1815_v10  ;;  %v1808_v1 = vmul.f32 0.03125, %v1790_v46  ;;  %v8154_v46 = vld [vmem:[#allocation9_spill] sm:$0xff] }
 0xbad   :  { %v1816_v40 = vadd.f32 1e-05, %v1808_v1  ;;  %v8155_v1 = vld [vmem:[#allocation10_spill] sm:$0xff] }
 0xbaf   :  { %5322 = vrsqrt.f32 %v1816_v40  ;;  %v8156_v40 = vld [vmem:[#allocation11_spill] sm:$0xff] }
 0xbb1   :  { %v5319_v32 = vpop.eup %5318 }
 0xbb2   :  { %v1830_v30 = vmul.f32 %v5319_v32, %v6705_v8  ;;  %v8157_v32 = vld [vmem:[#allocation12_spill] sm:$0xff] }
 0xbb4   :  { %v1844_v41 = vmul.f32 %v6792_v0, %v1830_v30 }
 0xbb5   :  { %v5321_v62 = vpop.eup %5320 }
 0xbb6   :  { %v1831_v10 = vmul.f32 %v5321_v62, %v6709_v47  ;;  %v1858_v17 = vadd.f32 %v6798_v49, %v1844_v41  ;;  %v8151_v47 = vld [vmem:[#allocation6_spill] sm:$0xff] }
 0xbb8   :  { %v1845_v5 = vmul.f32 %v6792_v0, %v1831_v10  ;;  %4779 = vmatprep.mubr.msk.f32.mxu0 %vm163_vm0, %v1858_v17 }
 0xbb9   :  { %v5323_v16 = vpop.eup %5322 }
 0xbba   :  { %v1859_v15 = vadd.f32 %v6798_v49, %v1845_v5  ;;  %v1832_v8 = vmul.f32 %v5323_v16, %v6714_v33  ;;  %v8153_v33 = vld [vmem:[#allocation8_spill] sm:$0xff]  ;;  %v2416_v16 = vsel %vm207_vm1, %v6781_v38, -inf }
 0xbbc   :  { %4780 = vmatmul.mubr.msk.f32.vlgmr.msra.gmra.mrb[8].mxu0 %vm163_vm0, %v1859_v15  ;;  %v1846_v31 = vmul.f32 %v6792_v0, %v1832_v8 }
 0xbbd   :  { %5109 = vmatpush3.bf16.msra.mxu0 %v8150_v9  ;;  %v2415_v9 = vsel %vm207_vm1, %v6762_v51, -inf }
 0xbbe   :  { %v1860_v28 = vadd.f32 %v6798_v49, %v1846_v31  ;;  %5110 = vmatprep.subr.bf16.mxu0 %v8142_v37  ;;  %v2414_v31 = vsel %vm207_vm1, %v6754_v52, -inf }
 0xbc0   :  { %4782 = vmatprep.mubr.msk.f32.mxu0 %vm163_vm0, %v1860_v28  ;;  %v2418_v28 = vmax.f32 %v2415_v9, %v2416_v16 }
 0xbc1   :  { %5112 = vmatpush3.bf16.msra.mxu0 %v8151_v47 }
 0xbc2   :  { %5113 = vmatprep.subr.bf16.mxu0 %v8142_v37 }
 0xbc5   :  { %5115 = vmatpush3.bf16.msra.mxu0 %v8152_v58  ;;  %v2413_v58 = vsel %vm207_vm1, %v6759_v50, -inf }
 0xbc6   :  { %5116 = vmatprep.subr.bf16.mxu0 %v8142_v37 }
 0xbc9   :  { %5118 = vmatpush3.bf16.msra.mxu0 %v8153_v33 }
 0xbca   :  { %5119 = vmatprep.subr.bf16.mxu0 %v8142_v37 }
 0xbcd   :  { %5121 = vmatpush3.bf16.msra.mxu0 %v8154_v46  ;;  %v2417_v46 = vmax.f32 %v2413_v58, %v2414_v31 }
 0xbce   :  { %5122 = vmatprep.subr.bf16.mxu0 %v8142_v37 }
 0xbd1   :  { %5124 = vmatpush3.bf16.msra.mxu0 %v8155_v1 }
 0xbd2   :  { %5125 = vmatprep.subr.bf16.mxu0 %v8142_v37 }
 0xbd5   :  { %5127 = vmatpush3.bf16.msra.mxu0 %v8156_v40 }
 0xbd6   :  { %5128 = vmatprep.subr.bf16.mxu0 %v8142_v37 }
 0xbd9   :  { %5130 = vmatpush3.bf16.msra.mxu0 %v8157_v32  ;;  %v2419_v32 = vmax.f32 %v2417_v46, %v2418_v28 }
 0xbdb   :  { %v2420_v16 = vrot.slane %v2419_v32, 4 }
 0xbe3   :  { %v1793_v30 = vpop.xlane.xlu0 %1792 }
 0xbe4   :  { %v1809_v41 = vmul.f32 0.03125, %v1793_v30 }
 0xbe6   :  { %v1817_v62 = vadd.f32 1e-05, %v1809_v41 }
 0xbe7   :  { %v1796_v10 = vpop.xlane.xlu0 %1795 }
 0xbe8   :  { %5324 = vrsqrt.f32 %v1817_v62  ;;  %v1810_v17 = vmul.f32 0.03125, %v1796_v10 }
 0xbea   :  { %v1818_v5 = vadd.f32 1e-05, %v1810_v17 }
 0xbeb   :  { %v1799_v15 = vpop.xlane.xlu0 %1798 }
 0xbec   :  { %5326 = vrsqrt.f32 %v1818_v5  ;;  %v1811_v8 = vmul.f32 0.03125, %v1799_v15 }
 0xbee   :  { %v1819_v47 = vadd.f32 1e-05, %v1811_v8 }
 0xbef   :  { %v1802_v33 = vpop.xlane.xlu0 %1801 }
 0xbf0   :  { %5328 = vrsqrt.f32 %v1819_v47  ;;  %v1812_v1 = vmul.f32 0.03125, %v1802_v33  ;;  %v2421_v47 = vmax.f32 %v2419_v32, %v2420_v16  ;;  %v2442_v16 = vpop.permute.xlu1 %2441 }
 0xbf2   :  { %v5325_v40 = vpop.eup %5324  ;;  %v1820_v30 = vadd.f32 1e-05, %v1812_v1  ;;  %v2422_v1 = vrot.slane %v2421_v47, 2 }
 0xbf3   :  { %v1805_v41 = vpop.xlane.xlu0 %1804  ;;  %v1833_v62 = vmul.f32 %v5325_v40, %v6741_v39 }
 0xbf4   :  { %5330 = vrsqrt.f32 %v1820_v30  ;;  %v1813_v10 = vmul.f32 0.03125, %v1805_v41  ;;  %v2423_v32 = vmax.f32 %v2421_v47, %v2422_v1  ;;  %v151_v47 = vld [vmem:[%s8027_s17 + $0x28] sm:$0xff]  ;;  %v6902_v1 = vld [vmem:[%s8028_s16] ss:$0 sm:$0xff] }
 0xbf5   :  { %v1847_v17 = vmul.f32 %v6792_v0, %v1833_v62 }
 0xbf6   :  { %v5327_v5 = vpop.eup %5326  ;;  %v1821_v15 = vadd.f32 1e-05, %v1813_v10 }
 0xbf7   :  { %v1861_v8 = vadd.f32 %v6798_v49, %v1847_v17  ;;  %v1834_v9 = vmul.f32 %v5327_v5, %v6745_v24  ;;  %v2424_v17 = vrot.slane %v2423_v32, 1 }
 0xbf8   :  { %5332 = vrsqrt.f32 %v1821_v15  ;;  %v8158_v15 = vmov 0.0  }
 0xbf9   :  { %4783 = vmatmul.mubr.msk.f32.gmra.mrb[10].mxu0 %vm163_vm0, %v1861_v8  ;;  %v1848_v31 = vmul.f32 %v6792_v0, %v1834_v9  ;;  %v148_v9 = vld [vmem:[%s8027_s17 + $0x10] sm:$0xff] }
 0xbfa   :  { %v5329_v28 = vpop.eup %5328 }
 0xbfb   :  { %v1862_v39 = vadd.f32 %v6798_v49, %v1848_v31  ;;  %v1835_v58 = vmul.f32 %v5329_v28, %v6750_v61  ;;  %v150_v28 = vld [vmem:[%s8027_s17 + $0x20] sm:$0xff] }
 0xbfd   :  { %4785 = vmatprep.mubr.msk.f32.mxu0 %vm163_vm0, %v1862_v39  ;;  %v1849_v33 = vmul.f32 %v6792_v0, %v1835_v58  ;;  %v6885_v39 = vpack.c.bf16 %v151_v47, %v150_v28  ;;  %v152_v58 = vld [vmem:[%s8027_s17 + $0x30] sm:$0xff] }
 0xbfe   :  { %v5331_v46 = vpop.eup %5330 }
 0xbff   :  { %v1863_v40 = vadd.f32 %v6798_v49, %v1849_v33  ;;  %v1836_v24 = vmul.f32 %v5331_v46, %v6765_v29  ;;  %v2425_v29 = vmax.f32 %v2423_v32, %v2424_v17  ;;  %8161 = vst [vmem:[#allocation7_spill] sm:$0xff] %v6885_v39  ;;  %v153_v33 = vld [vmem:[%s8027_s17 + $0x38] sm:$0xff] }
 0xc00   :  { %v6895_v46 = vpack.c.bf16 %v153_v33, %v152_v58 }
 0xc01   :  { %4786 = vmatmul.mubr.msk.f32.gmra.mrb[12].mxu0 %vm163_vm0, %v1863_v40  ;;  %v1850_v30 = vmul.f32 %v6792_v0, %v1836_v24  ;;  %v2444_v8 = vsel %vm207_vm1, %v2425_v29, %v2442_v16 }
 0xc02   :  { %v5333_v41 = vpop.eup %5332  ;;  %8162 = vst [vmem:[#allocation8_spill] sm:$0xff] %v6895_v46 }
 0xc03   :  { %v1864_v62 = vadd.f32 %v6798_v49, %v1850_v30  ;;  %v1837_v61 = vmul.f32 %v5333_v41, %v6777_v54  ;;  %v146_v54 = vld [vmem:[%s8027_s17] sm:$0xff] }
 0xc05   :  { %4788 = vmatprep.mubr.msk.f32.mxu0 %vm163_vm0, %v1864_v62  ;;  %v1851_v10 = vmul.f32 %v6792_v0, %v1837_v61  ;;  %v147_v0 = vld [vmem:[%s8027_s17 + $0x8] sm:$0xff] }
 0xc07   :  { %v1865_v5 = vadd.f32 %v6798_v49, %v1851_v10  ;;  %v6865_v49 = vpack.c.bf16 %v147_v0, %v146_v54 }
 0xc09   :  { %4789 = vmatmul.mubr.msk.f32.gmra.mrb[14].mxu0 %vm163_vm0, %v1865_v5  ;;  %8159 = vst [vmem:[#allocation5_spill] sm:$0xff] %v6865_v49  ;;  %5092 = vmatprep.subr.bf16.mxu1 %v6865_v49 }
 0xc0a   :  { %4851 = vmatprep.mubr.msk.f32.mxu0 %vm5551_vm2, %v8158_v15  ;;  %5094 = vmatpush3.bf16.msra.mxu1 %v6865_v49 }
 0xc0d   :  { %4852 = vmatmul.mubr.f32.vlgmr.msra.gmra.mrb[16].mxu0 %v2444_v8 }
 0xc0e   :  { %4951 = vmatprep.mubr.msk.f32.mxu0 %vm1524_vm7, %v6638_v13  ;;  %v149_v13 = vld [vmem:[%s8027_s17 + $0x18] sm:$0xff] }
 0xc0f   :  { %v6875_v31 = vpack.c.bf16 %v149_v13, %v148_v9 }
 0xc11   :  { %8160 = vst [vmem:[#allocation6_spill] sm:$0xff] %v6875_v31  ;;  %5096 = vmatprep.subr.bf16.mxu1 %v6875_v31 }
 0xc12   :  { %5098 = vmatpush3.bf16.msra.mxu1 %v6875_v31 }
 0xc13   :  { %5100 = vmatprep.subr.bf16.mxu1 %v6885_v39 }
 0xc16   :  { %5102 = vmatpush3.bf16.msra.mxu1 %v6885_v39 }
 0xc17   :  { %5104 = vmatprep.subr.bf16.mxu1 %v6895_v46 }
 0xc1a   :  { %5106 = vmatpush3.bf16.msra.mxu1 %v6895_v46 }
 0xc8f   :  { %v4781_v40 = vpop.f32.mrb[8].mxu0 }
 0xc90   :  { %v1968_v24 = vadd.f32 %v4781_v40, %v6902_v1  ;;  %v1962_v30 = vpop.f32.mrb[9].mxu0 }
 0xc91   :  { %v1963_v41 = vadd.f32 %v6902_v1, %v1962_v30 }
 0xc92   :  { %v2010_v32 = vmul.f32 0.70710677, %v1968_v24 }
 0xc93   :  { %v2009_v62 = vmul.f32 0.70710677, %v1963_v41 }
 0xc94   :  { %v2018_v61 = vand.u32 2147483647, %v2010_v32  ;;  %vm2178_vm9 = vcmp.ge.f32.partialorder %v2010_v32, 0.0 }
 0xc95   :  { %v2017_v10 = vand.u32 2147483647, %v2009_v62  ;;  %vm2177_vm10 = vcmp.ge.f32.partialorder %v2009_v62, 0.0 }
 0xc96   :  { %v2026_v17 = vmul.f32 0.3275911, %v2018_v61  ;;  %v2130_v8 = vsub.f32 0.0, %v2018_v61 }
 0xc97   :  { %v2025_v5 = vmul.f32 0.3275911, %v2017_v10  ;;  %v2129_v54 = vsub.f32 0.0, %v2017_v10 }
 0xc98   :  { %v2034_v16 = vadd.f32 1.0, %v2026_v17  ;;  %v2138_v9 = vmul.f32 %v2130_v8, %v2018_v61 }
 0xc99   :  { %v2033_v29 = vadd.f32 1.0, %v2025_v5  ;;  %v2137_v47 = vmul.f32 %v2129_v54, %v2017_v10 }
 0xc9a   :  { %5334 = vrcp.f32 %v2034_v16  ;;  %v2147_v40 = vmul.f32 1.442695, %v2138_v9 }
 0xc9b   :  { %5336 = vrcp.f32 %v2033_v29  ;;  %v2145_v39 = vmul.f32 1.442695, %v2137_v47 }
 0xc9c   :  { %5338 = vpow2.f32 %v2147_v40 }
 0xc9d   :  { %5340 = vpow2.f32 %v2145_v39 }
 0xca4   :  { %v5335_v0 = vpop.eup %5334 }
 0xca5   :  { %v5337_v13 = vpop.eup %5336  ;;  %v2058_v28 = vmul.f32 1.0614054, %v5335_v0 }
 0xca6   :  { %v2057_v58 = vmul.f32 1.0614054, %v5337_v13  ;;  %v5339_v54 = vpop.eup %5338 }
 0xca7   :  { %v2066_v33 = vadd.f32 -1.4531521, %v2058_v28  ;;  %v5341_v9 = vpop.eup %5340 }
 0xca8   :  { %v2065_v30 = vadd.f32 -1.4531521, %v2057_v58 }
 0xca9   :  { %v2074_v46 = vmul.f32 %v5335_v0, %v2066_v33 }
 0xcaa   :  { %v2073_v31 = vmul.f32 %v5337_v13, %v2065_v30 }
 0xcab   :  { %v2082_v49 = vadd.f32 1.4214138, %v2074_v46 }
 0xcac   :  { %v2081_v17 = vadd.f32 1.4214138, %v2073_v31 }
 0xcad   :  { %v2090_v5 = vmul.f32 %v5335_v0, %v2082_v49 }
 0xcae   :  { %v2089_v16 = vmul.f32 %v5337_v13, %v2081_v17  ;;  %v2001_v17 = vmul.f32 0.5, %v1963_v41 }
 0xcaf   :  { %v2098_v29 = vadd.f32 -0.28449672, %v2090_v5 }
 0xcb0   :  { %v2097_v20 = vadd.f32 -0.28449672, %v2089_v16 }
 0xcb1   :  { %v2106_v34 = vmul.f32 %v5335_v0, %v2098_v29 }
 0xcb2   :  { %v2105_v61 = vmul.f32 %v5337_v13, %v2097_v20  ;;  %v2002_v20 = vmul.f32 0.5, %v1968_v24 }
 0xcb3   :  { %v2114_v8 = vadd.f32 0.2548296, %v2106_v34 }
 0xcb4   :  { %v2113_v35 = vadd.f32 0.2548296, %v2105_v61 }
 0xcb5   :  { %v2122_v10 = vmul.f32 %v5335_v0, %v2114_v8 }
 0xcb6   :  { %v2121_v28 = vmul.f32 %v5337_v13, %v2113_v35 }
 0xcb7   :  { %v2162_v58 = vmul.f32 %v5339_v54, %v2122_v10 }
 0xcb8   :  { %v2161_v33 = vmul.f32 %v5341_v9, %v2121_v28 }
 0xcb9   :  { %v2170_v47 = vsub.f32 1.0, %v2162_v58 }
 0xcba   :  { %v2169_v30 = vsub.f32 1.0, %v2161_v33 }
 0xcbb   :  { %v2186_v46 = vsub.f32 0.0, %v2170_v47 }
 0xcbc   :  { %v2185_v31 = vsub.f32 0.0, %v2169_v30 }
 0xcbd   :  { %v2194_v49 = vsel %vm2178_vm9, %v2170_v47, %v2186_v46 }
 0xcbe   :  { %v2202_v39 = vadd.f32 1.0, %v2194_v49  ;;  %v2193_v40 = vsel %vm2177_vm10, %v2169_v30, %v2185_v31 }
 0xcbf   :  { %v2201_v5 = vadd.f32 1.0, %v2193_v40 }
 0xcc0   :  { %v2210_v16 = vmul.f32 %v2202_v39, %v2002_v20 }
 0xcc1   :  { %v2209_v34 = vmul.f32 %v2201_v5, %v2001_v17 }
 0xcc3   :  { %4807 = vmatprep.mubr.msk.f32.mxu1 %vm207_vm1, %v2209_v34 }
 0xcc4   :  { %4808 = vmatmul.mubr.msk.f32.vlgmr.msra.gmra.mrb[24].mxu1 %vm207_vm1, %v2210_v16 }
 0xccc   :  { %v4784_v35 = vpop.f32.mrb[10].mxu0 }
 0xccd   :  { %v6909_v0 = vadd.f32 %v4784_v35, %v6902_v1  ;;  %v1972_v13 = vpop.f32.mrb[11].mxu0 }
 0xcce   :  { %v6912_v32 = vadd.f32 %v6902_v1, %v1972_v13 }
 0xccf   :  { %v6915_v62 = vmul.f32 0.70710677, %v6909_v0 }
 0xcd0   :  { %v6918_v41 = vmul.f32 0.70710677, %v6912_v32 }
 0xcd1   :  { %v2020_v24 = vand.u32 2147483647, %v6915_v62  ;;  %vm2180_vm11 = vcmp.ge.f32.partialorder %v6915_v62, 0.0 }
 0xcd2   :  { %v2019_v29 = vand.u32 2147483647, %v6918_v41  ;;  %vm2179_vm12 = vcmp.ge.f32.partialorder %v6918_v41, 0.0 }
 0xcd3   :  { %v2028_v61 = vmul.f32 0.3275911, %v2020_v24  ;;  %v2132_v17 = vsub.f32 0.0, %v2020_v24 }
 0xcd4   :  { %v2027_v8 = vmul.f32 0.3275911, %v2019_v29  ;;  %v4787_v10 = vpop.f32.mrb[12].mxu0  ;;  %v2131_v16 = vsub.f32 0.0, %v2019_v29 }
 0xcd5   :  { %v2036_v54 = vadd.f32 1.0, %v2028_v61  ;;  %v6923_v28 = vadd.f32 %v4787_v10, %v6902_v1  ;;  %v1982_v9 = vpop.f32.mrb[13].mxu0 }
 0xcd6   :  { %v2035_v58 = vadd.f32 1.0, %v2027_v8  ;;  %v6926_v33 = vadd.f32 %v6902_v1, %v1982_v9  ;;  %v2140_v9 = vmul.f32 %v2132_v17, %v2020_v24 }
 0xcd7   :  { %5342 = vrcp.f32 %v2036_v54  ;;  %v6929_v47 = vmul.f32 0.70710677, %v6923_v28 }
 0xcd8   :  { %5344 = vrcp.f32 %v2035_v58  ;;  %v6932_v30 = vmul.f32 0.70710677, %v6926_v33  ;;  %v2151_v24 = vmul.f32 1.442695, %v2140_v9 }
 0xcd9   :  { %v2022_v46 = vand.u32 2147483647, %v6929_v47  ;;  %vm2182_vm13 = vcmp.ge.f32.partialorder %v6929_v47, 0.0  ;;  %v2005_v47 = vmul.f32 0.5, %v6926_v33 }
 0xcda   :  { %v2021_v31 = vand.u32 2147483647, %v6932_v30  ;;  %vm2181_vm14 = vcmp.ge.f32.partialorder %v6932_v30, 0.0 }
 0xcdb   :  { %v2030_v49 = vmul.f32 0.3275911, %v2022_v46  ;;  %v2134_v48 = vsub.f32 0.0, %v2022_v46 }
 0xcdc   :  { %v2029_v39 = vmul.f32 0.3275911, %v2021_v31  ;;  %v4790_v40 = vpop.f32.mrb[14].mxu0  ;;  %v2133_v37 = vsub.f32 0.0, %v2021_v31 }
 0xcdd   :  { %v2038_v5 = vadd.f32 1.0, %v2030_v49  ;;  %v6937_v20 = vadd.f32 %v4790_v40, %v6902_v1  ;;  %v1992_v34 = vpop.f32.mrb[15].mxu0  ;;  %v5514_v49 = vld [vmem:[%s8111_s0] sm:$0x1] }
 0xcde   :  { %v2037_v35 = vadd.f32 1.0, %v2029_v39  ;;  %v6940_v13 = vadd.f32 %v6902_v1, %v1992_v34  ;;  %v2139_v34 = vmul.f32 %v2131_v16, %v2019_v29 }
 0xcdf   :  { %5346 = vrcp.f32 %v2038_v5  ;;  %v6943_v61 = vmul.f32 0.70710677, %v6937_v20 }
 0xce0   :  { %5348 = vrcp.f32 %v2037_v35  ;;  %v6946_v8 = vmul.f32 0.70710677, %v6940_v13  ;;  %v2511_v10 = vpop.f32.mrb[16].mxu0  ;;  %v2149_v15 = vmul.f32 1.442695, %v2139_v34 }
 0xce1   :  { %v5343_v54 = vpop.eup %5342  ;;  %v2024_v58 = vand.u32 2147483647, %v6943_v61  ;;  %v2512_v39 = vadd.f32 %v5514_v49, %v2511_v10  ;;  %v4853_v1 = vpop.f32.mrb[17].mxu0  ;;  %v2142_v49 = vmul.f32 %v2134_v48, %v2022_v46  ;;  %vm2184_vm15 = vcmp.ge.f32.partialorder %v6943_v61, 0.0 }
 0xce2   :  { %v5345_v40 = vpop.eup %5344  ;;  %v2060_v5 = vmul.f32 1.0614054, %v5343_v54  ;;  %v2023_v60 = vand.u32 2147483647, %v6946_v8  ;;  %vm2183_vm3 = vcmp.ge.f32.partialorder %v6946_v8, 0.0  ;;  %v5515_v8 = vld [vmem:[%s8113_s22] sm:$0xff] }
 0xce3   :  { %v2059_v35 = vmul.f32 1.0614054, %v5345_v40  ;;  %v2032_v19 = vmul.f32 0.3275911, %v2024_v58  ;;  %v2515_v18 = vsub.f32 0.0, %v2512_v39 }
 0xce4   :  { %v2068_v11 = vadd.f32 -1.4531521, %v2060_v5  ;;  %v2031_v56 = vmul.f32 0.3275911, %v2023_v60  ;;  %v2155_v34 = vmul.f32 1.442695, %v2142_v49 }
 0xce5   :  { %v2067_v17 = vadd.f32 -1.4531521, %v2059_v35  ;;  %v2040_v14 = vadd.f32 1.0, %v2032_v19  ;;  %v2516_v1 = vmul.f32 1.442695, %v2515_v18  ;;  %v2135_v46 = vsub.f32 0.0, %v2023_v60 }
 0xce6   :  { %v2076_v27 = vmul.f32 %v5343_v54, %v2068_v11  ;;  %v2039_v26 = vadd.f32 1.0, %v2031_v56  ;;  %v2141_v11 = vmul.f32 %v2133_v37, %v2021_v31 }
 0xce7   :  { %v2075_v10 = vmul.f32 %v5345_v40, %v2067_v17  ;;  %5350 = vrcp.f32 %v2040_v14 }
 0xce8   :  { %v2084_v29 = vadd.f32 1.4214138, %v2076_v27  ;;  %5352 = vrcp.f32 %v2039_v26  ;;  %v2136_v27 = vsub.f32 0.0, %v2024_v58  ;;  %v2153_v17 = vmul.f32 1.442695, %v2141_v11 }
 0xce9   :  { %v6953_v16 = vpop.eup %5346  ;;  %5354 = vpow2.f32 %v2151_v24  ;;  %v2083_v21 = vadd.f32 1.4214138, %v2075_v10 }
 0xcea   :  { %v6955_v39 = vpop.eup %5348  ;;  %v2092_v5 = vmul.f32 %v5343_v54, %v2084_v29  ;;  %5356 = vpow2.f32 %v2149_v15  ;;  %v2062_v19 = vmul.f32 1.0614054, %v6953_v16 }
 0xceb   :  { %v2091_v9 = vmul.f32 %v5345_v40, %v2083_v21  ;;  %v2061_v56 = vmul.f32 1.0614054, %v6955_v39  ;;  %5358 = vpow2.f32 %v2516_v1  ;;  %v2144_v21 = vmul.f32 %v2136_v27, %v2024_v58 }
 0xcec   :  { %v2100_v14 = vadd.f32 -0.28449672, %v2092_v5  ;;  %v2070_v18 = vadd.f32 -1.4531521, %v2062_v19  ;;  %5360 = vpow2.f32 %v2155_v34  ;;  %v2143_v5 = vmul.f32 %v2135_v46, %v2023_v60 }
 0xced   :  { %v2099_v26 = vadd.f32 -0.28449672, %v2091_v9  ;;  %v2069_v48 = vadd.f32 -1.4531521, %v2061_v56  ;;  %5362 = vpow2.f32 %v2153_v17  ;;  %v2159_v46 = vmul.f32 1.442695, %v2144_v21 }
 0xcee   :  { %v2108_v35 = vmul.f32 %v5343_v54, %v2100_v14  ;;  %v2078_v24 = vmul.f32 %v6953_v16, %v2070_v18  ;;  %v2157_v17 = vmul.f32 1.442695, %v2143_v5 }
 0xcef   :  { %v2107_v10 = vmul.f32 %v5345_v40, %v2099_v26  ;;  %v2077_v15 = vmul.f32 %v6955_v39, %v2069_v48 }
 0xcf0   :  { %v2116_v29 = vadd.f32 0.2548296, %v2108_v35  ;;  %v2086_v37 = vadd.f32 1.4214138, %v2078_v24 }
 0xcf1   :  { %v6961_v31 = vpop.eup %5350  ;;  %v2115_v49 = vadd.f32 0.2548296, %v2107_v10  ;;  %v2085_v1 = vadd.f32 1.4214138, %v2077_v15 }
 0xcf2   :  { %v6963_v19 = vpop.eup %5352  ;;  %v2124_v9 = vmul.f32 %v5343_v54, %v2116_v29  ;;  %v2094_v56 = vmul.f32 %v6953_v16, %v2086_v37  ;;  %v2064_v11 = vmul.f32 1.0614054, %v6961_v31 }
 0xcf3   :  { %v5355_v14 = vpop.eup %5354  ;;  %v2123_v18 = vmul.f32 %v5345_v40, %v2115_v49  ;;  %v2093_v58 = vmul.f32 %v6955_v39, %v2085_v1  ;;  %v2063_v27 = vmul.f32 1.0614054, %v6963_v19 }
 0xcf4   :  { %v5357_v26 = vpop.eup %5356  ;;  %v2164_v34 = vmul.f32 %v5355_v14, %v2124_v9  ;;  %v2102_v48 = vadd.f32 -0.28449672, %v2094_v56  ;;  %v2072_v60 = vadd.f32 -1.4531521, %v2064_v11 }
 0xcf5   :  { %v5359_v35 = vpop.eup %5358  ;;  %v2163_v54 = vmul.f32 %v5357_v26, %v2123_v18  ;;  %v2101_v24 = vadd.f32 -0.28449672, %v2093_v58  ;;  %v2071_v10 = vadd.f32 -1.4531521, %v2063_v27 }
 0xcf6   :  { %v2172_v15 = vsub.f32 1.0, %v2164_v34  ;;  %v2110_v29 = vmul.f32 %v6953_v16, %v2102_v48  ;;  %v2080_v37 = vmul.f32 %v6961_v31, %v2072_v60  ;;  %v2518_v40 = vadd.f32 1.0, %v5359_v35  ;;  %v5361_v34 = vpop.eup %5360 }
 0xcf7   :  { %v2171_v49 = vsub.f32 1.0, %v2163_v54  ;;  %v2109_v1 = vmul.f32 %v6955_v39, %v2101_v24  ;;  %v2079_v9 = vmul.f32 %v6963_v19, %v2071_v10  ;;  %v5363_v24 = vpop.eup %5362 }
 0xcf8   :  { %v2188_v56 = vsub.f32 0.0, %v2172_v15  ;;  %v2118_v21 = vadd.f32 0.2548296, %v2110_v29  ;;  %v2088_v11 = vadd.f32 1.4214138, %v2080_v37  ;;  %5364 = vrcp.f32 %v2518_v40 }
 0xcf9   :  { %v2187_v14 = vsub.f32 0.0, %v2171_v49  ;;  %v2117_v18 = vadd.f32 0.2548296, %v2109_v1  ;;  %5366 = vpow2.f32 %v2159_v46  ;;  %v2087_v5 = vadd.f32 1.4214138, %v2079_v9 }
 0xcfa   :  { %v2196_v58 = vsel %vm2180_vm11, %v2172_v15, %v2188_v56  ;;  %v2126_v27 = vmul.f32 %v6953_v16, %v2118_v21  ;;  %v2096_v26 = vmul.f32 %v6961_v31, %v2088_v11  ;;  %5368 = vpow2.f32 %v2157_v17 }
 0xcfb   :  { %v2204_v48 = vadd.f32 1.0, %v2196_v58  ;;  %v2195_v60 = vsel %vm2179_vm12, %v2171_v49, %v2187_v14  ;;  %v2125_v35 = vmul.f32 %v6955_v39, %v2117_v18  ;;  %v2095_v54 = vmul.f32 %v6963_v19, %v2087_v5 }
 0xcfc   :  { %v2003_v46 = vmul.f32 0.5, %v6912_v32  ;;  %v2203_v10 = vadd.f32 1.0, %v2195_v60  ;;  %v2166_v62 = vmul.f32 %v5361_v34, %v2126_v27  ;;  %v2104_v15 = vadd.f32 -0.28449672, %v2096_v26  ;;  %v8163_v26 = vld [vmem:[#allocation13_spill] sm:$0xff] }
 0xcfd   :  { %v2004_v16 = vmul.f32 0.5, %v6909_v0  ;;  %v2165_v29 = vmul.f32 %v5363_v24, %v2125_v35  ;;  %v2103_v37 = vadd.f32 -0.28449672, %v2095_v54  ;;  %v8164_v34 = vsub.s32 0, %v8163_v26 }
 0xcfe   :  { %v2211_v17 = vmul.f32 %v2203_v10, %v2003_v46  ;;  %v2174_v40 = vsub.f32 1.0, %v2166_v62  ;;  %v2112_v1 = vmul.f32 %v6961_v31, %v2104_v15  ;;  %v2006_v24 = vmul.f32 0.5, %v6923_v28 }
 0xcff   :  { %v2212_v41 = vmul.f32 %v2204_v48, %v2004_v16  ;;  %v2173_v49 = vsub.f32 1.0, %v2165_v29  ;;  %v2111_v39 = vmul.f32 %v6963_v19, %v2103_v37  ;;  %v2007_v37 = vmul.f32 0.5, %v6940_v13 }
 0xd00   :  { %v2190_v9 = vsub.f32 0.0, %v2174_v40  ;;  %v2120_v56 = vadd.f32 0.2548296, %v2112_v1  ;;  %4810 = vmatprep.mubr.msk.f32.mxu1 %vm207_vm1, %v2211_v17 }
 0xd01   :  { %v2189_v32 = vsub.f32 0.0, %v2173_v49  ;;  %v2119_v21 = vadd.f32 0.2548296, %v2111_v39  ;;  %4811 = vmatmul.mubr.msk.f32.gmra.mrb[26].mxu1 %vm207_vm1, %v2212_v41 }
 0xd02   :  { %v5365_v0 = vpop.eup %5364  ;;  %v2198_v11 = vsel %vm2182_vm13, %v2174_v40, %v2190_v9  ;;  %v2128_v14 = vmul.f32 %v6961_v31, %v2120_v56  ;;  %v2008_v40 = vmul.f32 0.5, %v6937_v20 }
 0xd03   :  { %v5367_v18 = vpop.eup %5366  ;;  %v2206_v5 = vadd.f32 1.0, %v2198_v11  ;;  %v2197_v58 = vsel %vm2181_vm14, %v2173_v49, %v2189_v32  ;;  %v2127_v27 = vmul.f32 %v6963_v19, %v2119_v21  ;;  %v2524_v48 = vrot.slane %v5365_v0, %v8164_v34  ;;  %v4364_v11 = vld [vmem:[%s8029_s18] ss:$0 sm:$0xff] }
 0xd04   :  { %v5369_v60 = vpop.eup %5368  ;;  %v2205_v35 = vadd.f32 1.0, %v2197_v58  ;;  %v2168_v54 = vmul.f32 %v5367_v18, %v2128_v14 }
 0xd05   :  { %v2167_v46 = vmul.f32 %v5369_v60, %v2127_v27  ;;  %v2525_v30 = vmul.f32 %v2524_v48, %v6759_v50  ;;  %v2214_v62 = vmul.f32 %v2206_v5, %v2006_v24  ;;  %v2526_v33 = vmul.f32 %v2524_v48, %v6754_v52 }
 0xd06   :  { %v2213_v10 = vmul.f32 %v2205_v35, %v2005_v47  ;;  %v2176_v31 = vsub.f32 1.0, %v2168_v54  ;;  %v2527_v1 = vmul.f32 %v2524_v48, %v6762_v51  ;;  %v2528_v52 = vmul.f32 %v2524_v48, %v6781_v38 }
 0xd07   :  { %v2175_v15 = vsub.f32 1.0, %v2167_v46  ;;  %2529 = vxpose.xlu0.b32.start [1/4] (short) (narrow) %v2525_v30, 64 }
 0xd08   :  { %v2192_v16 = vsub.f32 0.0, %v2176_v31  ;;  %4813 = vmatprep.mubr.msk.f32.mxu1 %vm207_vm1, %v2213_v10 }
 0xd09   :  { %v2191_v19 = vsub.f32 0.0, %v2175_v15  ;;  %4814 = vmatmul.mubr.msk.f32.gmra.mrb[28].mxu1 %vm207_vm1, %v2214_v62 }
 0xd0a   :  { %v2200_v29 = vsel %vm2184_vm15, %v2176_v31, %v2192_v16 }
 0xd0b   :  { %v2208_v28 = vadd.f32 1.0, %v2200_v29  ;;  %v2199_v50 = vsel %vm2183_vm3, %v2175_v15, %v2191_v19  ;;  %2530 = vxpose.xlu0.b32.cont [2/4] (short) (narrow) %v2526_v33, 64 }
 0xd0c   :  { %v2207_v17 = vadd.f32 1.0, %v2199_v50 }
 0xd0d   :  { %v2216_v61 = vmul.f32 %v2208_v28, %v2008_v40 }
 0xd0e   :  { %v2215_v41 = vmul.f32 %v2207_v17, %v2007_v37 }
 0xd0f   :  { %2531 = vxpose.xlu0.b32.cont [3/4] (short) (narrow) %v2527_v1, 64 }
 0xd10   :  { %4816 = vmatprep.mubr.msk.f32.mxu1 %vm207_vm1, %v2215_v41 }
 0xd11   :  { %4817 = vmatmul.mubr.msk.f32.gmra.mrb[30].mxu1 %vm207_vm1, %v2216_v61 }
 0xd12   :  { %4870 = vmatprep.mubr.msk.f32.mxu1 %vm207_vm1, %v5515_v8 }
 0xd13   :  { %2532 = vxpose.xlu0.b32.end [4/4] (short) (narrow) %v2528_v52, 64 }
 0xd87   :  { %v2545_v13 = vpop.trf.xlu0 }
 0xd88   :  { %v7014_v20 = vadd.f32 %v6503_v6, %v2545_v13 }
 0xd8a   :  { %v2569_v51 = vsel %vm163_vm0, %v7014_v20, 0.0 }
 0xd8b   :  { %2570 = vadd.xlane.f32.xlu1 %v2569_v51  ;;  %v2546_v49 = vpop.trf.xlu0 }
 0xd8c   :  { %v7019_v38 = vadd.f32 %v6508_v7, %v2546_v49 }
 0xd8e   :  { %v2572_v39 = vsel %vm163_vm0, %v7019_v38, 0.0 }
 0xd8f   :  { %2573 = vadd.xlane.f32.xlu1 %v2572_v39  ;;  %v2547_v9 = vpop.trf.xlu0 }
 0xd90   :  { %v7024_v56 = vadd.f32 %v6534_v4, %v2547_v9 }
 0xd92   :  { %v2575_v32 = vsel %vm163_vm0, %v7024_v56, 0.0 }
 0xd93   :  { %2576 = vadd.xlane.f32.xlu1 %v2575_v32  ;;  %v2548_v21 = vpop.trf.xlu0 }
 0xd94   :  { %v7029_v0 = vadd.f32 %v6539_v23, %v2548_v21 }
 0xd96   :  { %v2578_v14 = vsel %vm163_vm0, %v7029_v0, 0.0 }
 0xd97   :  { %2579 = vadd.xlane.f32.xlu0 %v2578_v14  ;;  %v2549_v18 = vpop.trf.xlu0  ;;  %v4809_v5 = vpop.f32.mrb[24].mxu1 }
 0xd98   :  { %v7037_v58 = vadd.f32 %v6556_v45, %v2549_v18  ;;  %v2319_v27 = vadd.f32 %v4809_v5, %v4364_v11  ;;  %v2313_v26 = vpop.f32.mrb[25].mxu1 }
 0xd99   :  { %v2314_v34 = vadd.f32 %v4364_v11, %v2313_v26 }
 0xd9a   :  { %v2353_v48 = vadd.f32 %v2319_v27, %v6470_v63  ;;  %v2581_v60 = vsel %vm163_vm0, %v7037_v58, 0.0 }
 0xd9b   :  { %2582 = vadd.xlane.f32.xlu1 %v2581_v60  ;;  %v2550_v47 = vpop.trf.xlu0  ;;  %v2352_v35 = vadd.f32 %v2314_v34, %v6473_v59 }
 0xd9c   :  { %2361 = vst.msk [vmem:[%s8030_s19 + $0x8] sm:$0xff] %vm163_vm0, %v2353_v48  ;;  %v7048_v54 = vadd.f32 %v6561_v42, %v2550_v47 }
 0xd9d   :  { %2360 = vst.msk [vmem:[%s8030_s19] sm:$0xff] %vm163_vm0, %v2352_v35 }
 0xd9e   :  { %v2584_v63 = vsel %vm163_vm0, %v7048_v54, 0.0 }
 0xd9f   :  { %2585 = vadd.xlane.f32.xlu1 %v2584_v63  ;;  %v2551_v24 = vpop.trf.xlu0 }
 0xda0   :  { %v7057_v59 = vadd.f32 %v6571_v55, %v2551_v24 }
 0xda2   :  { %v2587_v46 = vsel %vm163_vm0, %v7057_v59, 0.0 }
 0xda3   :  { %2588 = vadd.xlane.f32.xlu1 %v2587_v46  ;;  %v2552_v30 = vpop.trf.xlu0 }
 0xda4   :  { %v7062_v10 = vadd.f32 %v6576_v12, %v2552_v30 }
 0xda6   :  { %v2590_v31 = vsel %vm163_vm0, %v7062_v10, 0.0 }
 0xda7   :  { %2591 = vadd.xlane.f32.xlu1 %v2590_v31 }
 0xdd4   :  { %v4812_v62 = vpop.f32.mrb[26].mxu1 }
 0xdd5   :  { %v2329_v15 = vadd.f32 %v4812_v62, %v4364_v11  ;;  %v2323_v16 = vpop.f32.mrb[27].mxu1 }
 0xdd6   :  { %v2324_v19 = vadd.f32 %v4364_v11, %v2323_v16 }
 0xdd7   :  { %v2355_v33 = vadd.f32 %v2329_v15, %v6486_v3 }
 0xdd8   :  { %v2354_v29 = vadd.f32 %v2324_v19, %v6489_v2 }
 0xdd9   :  { %2363 = vst.msk [vmem:[%s8030_s19 + $0x18] sm:$0xff] %vm163_vm0, %v2355_v33 }
 0xdda   :  { %2362 = vst.msk [vmem:[%s8030_s19 + $0x10] sm:$0xff] %vm163_vm0, %v2354_v29 }
 0xddc   :  { %v4815_v28 = vpop.f32.mrb[28].mxu1 }
 0xddd   :  { %v2339_v50 = vadd.f32 %v4815_v28, %v4364_v11  ;;  %v2333_v37 = vpop.f32.mrb[29].mxu1 }
 0xdde   :  { %v2334_v17 = vadd.f32 %v4364_v11, %v2333_v37 }
 0xddf   :  { %v2357_v40 = vadd.f32 %v2339_v50, %v6498_v25 }
 0xde0   :  { %v2356_v3 = vadd.f32 %v2334_v17, %v6513_v57 }
 0xde1   :  { %2365 = vst.msk [vmem:[%s8030_s19 + $0x28] sm:$0xff] %vm163_vm0, %v2357_v40 }
 0xde2   :  { %2364 = vst.msk [vmem:[%s8030_s19 + $0x20] sm:$0xff] %vm163_vm0, %v2356_v3 }
 0xde4   :  { %v4818_v2 = vpop.f32.mrb[30].mxu1 }
 0xde5   :  { %v2349_v1 = vadd.f32 %v4818_v2, %v4364_v11  ;;  %v2343_v41 = vpop.f32.mrb[31].mxu1 }
 0xde6   :  { %v2344_v61 = vadd.f32 %v4364_v11, %v2343_v41 }
 0xde7   :  { %v2359_v52 = vadd.f32 %v2349_v1, %v6529_v36 }
 0xde8   :  { %v2358_v25 = vadd.f32 %v2344_v61, %v6542_v22 }
 0xde9   :  { %2367 = vst.msk [vmem:[%s8030_s19 + $0x38] sm:$0xff] %vm163_vm0, %v2359_v52 }
 0xdea   :  { %2366 = vst.msk [vmem:[%s8030_s19 + $0x30] sm:$0xff] %vm163_vm0, %v2358_v25 }
 0xe18   :  { %v2571_v57 = vpop.xlane.xlu1 %2570 }
 0xe19   :  { %v2593_v8 = vmul.f32 0.03125, %v2571_v57 }
 0xe1b   :  { %v7097_v13 = vsub.f32 %v7014_v20, %v2593_v8 }
 0xe1c   :  { %v2574_v51 = vpop.xlane.xlu1 %2573 }
 0xe1d   :  { %v2594_v49 = vmul.f32 0.03125, %v2574_v51  ;;  %v2609_v36 = vmul.f32 %v7097_v13, %v7097_v13 }
 0xe1f   :  { %v7102_v22 = vsub.f32 %v7019_v38, %v2594_v49  ;;  %v2617_v39 = vsel %vm163_vm0, %v2609_v36, 0.0 }
 0xe20   :  { %v2577_v9 = vpop.xlane.xlu1 %2576  ;;  %2618 = vadd.xlane.f32.xlu1 %v2617_v39 }
 0xe21   :  { %v2595_v32 = vmul.f32 0.03125, %v2577_v9  ;;  %v2610_v21 = vmul.f32 %v7102_v22, %v7102_v22 }
 0xe23   :  { %v7108_v11 = vsub.f32 %v7024_v56, %v2595_v32  ;;  %v2620_v20 = vsel %vm163_vm0, %v2610_v21, 0.0  ;;  %v5516_v32 = vld [vmem:[%s8017_s3] ss:$0 sm:$0xff] }
 0xe24   :  { %2621 = vadd.xlane.f32.xlu1 %v2620_v20  ;;  %v2580_v14 = vpop.xlane.xlu0 %2579 }
 0xe25   :  { %v2596_v18 = vmul.f32 0.03125, %v2580_v14  ;;  %v2611_v38 = vmul.f32 %v7108_v11, %v7108_v11 }
 0xe27   :  { %v7114_v5 = vsub.f32 %v7029_v0, %v2596_v18  ;;  %v2623_v27 = vsel %vm163_vm0, %v2611_v38, 0.0 }
 0xe28   :  { %v2583_v26 = vpop.xlane.xlu1 %2582  ;;  %2624 = vadd.xlane.f32.xlu1 %v2623_v27 }
 0xe29   :  { %v2597_v34 = vmul.f32 0.03125, %v2583_v26  ;;  %v2612_v56 = vmul.f32 %v7114_v5, %v7114_v5 }
 0xe2b   :  { %v7120_v48 = vsub.f32 %v7037_v58, %v2597_v34  ;;  %v2626_v60 = vsel %vm163_vm0, %v2612_v56, 0.0 }
 0xe2c   :  { %v2586_v47 = vpop.xlane.xlu1 %2585  ;;  %2627 = vadd.xlane.f32.xlu1 %v2626_v60 }
 0xe2d   :  { %v2598_v35 = vmul.f32 0.03125, %v2586_v47  ;;  %v2613_v0 = vmul.f32 %v7120_v48, %v7120_v48 }
 0xe2f   :  { %v7126_v63 = vsub.f32 %v7048_v54, %v2598_v35  ;;  %v2629_v24 = vsel %vm163_vm0, %v2613_v0, 0.0 }
 0xe30   :  { %v2589_v46 = vpop.xlane.xlu1 %2588  ;;  %2630 = vadd.xlane.f32.xlu1 %v2629_v24 }
 0xe31   :  { %v2599_v30 = vmul.f32 0.03125, %v2589_v46  ;;  %v2614_v58 = vmul.f32 %v7126_v63, %v7126_v63 }
 0xe33   :  { %v7132_v31 = vsub.f32 %v7057_v59, %v2599_v30  ;;  %v2632_v62 = vsel %vm163_vm0, %v2614_v58, 0.0 }
 0xe34   :  { %v2592_v15 = vpop.xlane.xlu1 %2591  ;;  %2633 = vadd.xlane.f32.xlu1 %v2632_v62 }
 0xe35   :  { %v2600_v16 = vmul.f32 0.03125, %v2592_v15  ;;  %v2615_v54 = vmul.f32 %v7132_v31, %v7132_v31 }
 0xe37   :  { %v7138_v19 = vsub.f32 %v7062_v10, %v2600_v16  ;;  %v2635_v33 = vsel %vm163_vm0, %v2615_v54, 0.0 }
 0xe38   :  { %2636 = vadd.xlane.f32.xlu1 %v2635_v33 }
 0xe39   :  { %v2616_v29 = vmul.f32 %v7138_v19, %v7138_v19 }
 0xe3b   :  { %v2638_v59 = vsel %vm163_vm0, %v2616_v29, 0.0 }
 0xe3c   :  { %2639 = vadd.xlane.f32.xlu1 %v2638_v59 }
 0xead   :  { %v2619_v28 = vpop.xlane.xlu1 %2618 }
 0xeae   :  { %v2641_v50 = vmul.f32 0.03125, %v2619_v28 }
 0xeb0   :  { %v2649_v37 = vadd.f32 1e-05, %v2641_v50 }
 0xeb1   :  { %v2622_v17 = vpop.xlane.xlu1 %2621 }
 0xeb2   :  { %5370 = vrsqrt.f32 %v2649_v37  ;;  %v2642_v40 = vmul.f32 0.03125, %v2622_v17 }
 0xeb4   :  { %v2650_v3 = vadd.f32 1e-05, %v2642_v40 }
 0xeb5   :  { %v2625_v2 = vpop.xlane.xlu1 %2624 }
 0xeb6   :  { %5372 = vrsqrt.f32 %v2650_v3  ;;  %v2643_v10 = vmul.f32 0.03125, %v2625_v2 }
 0xeb8   :  { %v2651_v1 = vadd.f32 1e-05, %v2643_v10 }
 0xeb9   :  { %v2628_v41 = vpop.xlane.xlu1 %2627 }
 0xeba   :  { %5374 = vrsqrt.f32 %v2651_v1  ;;  %v2644_v61 = vmul.f32 0.03125, %v2628_v41 }
 0xebc   :  { %v5371_v52 = vpop.eup %5370  ;;  %v2652_v25 = vadd.f32 1e-05, %v2644_v61 }
 0xebd   :  { %v2631_v57 = vpop.xlane.xlu1 %2630  ;;  %v2665_v8 = vmul.f32 %v5371_v52, %v7097_v13  ;;  %v5517_v13 = vld [vmem:[%s8018_s4] ss:$0 sm:$0xff] }
 0xebe   :  { %5376 = vrsqrt.f32 %v2652_v25  ;;  %v2645_v51 = vmul.f32 0.03125, %v2631_v57  ;;  %v5521_v25 = vld [vmem:[%s8113_s22 + $0x20] sm:$0xff]  ;;  %v5522_v57 = vld [vmem:[%s8113_s22 + $0x28] sm:$0xff] }
 0xebf   :  { %v2673_v21 = vmul.f32 %v5516_v32, %v2665_v8  ;;  %v5523_v8 = vld [vmem:[%s8113_s22 + $0x30] sm:$0xff] }
 0xec0   :  { %v5373_v49 = vpop.eup %5372  ;;  %v2653_v36 = vadd.f32 1e-05, %v2645_v51  ;;  %v5524_v51 = vld [vmem:[%s8113_s22 + $0x38] sm:$0xff] }
 0xec1   :  { %v2634_v39 = vpop.xlane.xlu1 %2633  ;;  %v2666_v9 = vmul.f32 %v5373_v49, %v7102_v22  ;;  %v2681_v26 = vadd.f32 %v5517_v13, %v2673_v21  ;;  %v5525_v49 = vld [vmem:[%s8113_s22 + $0x40] sm:$0xff]  ;;  %v5530_v21 = vld [vmem:[%s8113_s22 + $0x68] sm:$0xff] }
 0xec2   :  { %5378 = vrsqrt.f32 %v2653_v36  ;;  %v2646_v20 = vmul.f32 0.03125, %v2634_v39  ;;  %v5526_v36 = vld [vmem:[%s8113_s22 + $0x48] sm:$0xff]  ;;  %v5527_v39 = vld [vmem:[%s8113_s22 + $0x50] sm:$0xff] }
 0xec3   :  { %v2674_v14 = vmul.f32 %v5516_v32, %v2666_v9  ;;  %v5528_v9 = vld [vmem:[%s8113_s22 + $0x58] sm:$0xff] }
 0xec4   :  { %v5375_v18 = vpop.eup %5374  ;;  %v2654_v38 = vadd.f32 1e-05, %v2646_v20  ;;  %v5531_v20 = vld [vmem:[%s8113_s22 + $0x70] sm:$0xff] }
 0xec5   :  { %v2637_v27 = vpop.xlane.xlu1 %2636  ;;  %v2682_v34 = vadd.f32 %v5517_v13, %v2674_v14  ;;  %v2667_v56 = vmul.f32 %v5375_v18, %v7108_v11  ;;  %v5532_v14 = vld [vmem:[%s8113_s22 + $0x78] sm:$0xff]  ;;  %v5533_v18 = vld [vmem:[%s8019_s7] sm:$0xff] }
 0xec6   :  { %5380 = vrsqrt.f32 %v2654_v38  ;;  %v2647_v22 = vmul.f32 0.03125, %v2637_v27  ;;  %v8165_v27 = vld [vmem:[#allocation14_spill] sm:$0xff] }
 0xec7   :  { %v5131_v60 = vpack.c.bf16 %v2682_v34, %v2681_v26  ;;  %v2675_v46 = vmul.f32 %v5516_v32, %v2667_v56  ;;  %v8166_v34 = vld [vmem:[#allocation16_spill] sm:$0xff] }
 0xec8   :  { %v5377_v47 = vpop.eup %5376  ;;  %v2655_v35 = vadd.f32 1e-05, %v2647_v22 }
 0xec9   :  { %5132 = vmatprep.subr.bf16.mxu1 %v5131_v60  ;;  %v2640_v0 = vpop.xlane.xlu1 %2639  ;;  %v2668_v24 = vmul.f32 %v5377_v47, %v7114_v5  ;;  %v2683_v16 = vadd.f32 %v5517_v13, %v2675_v46 }
 0xeca   :  { %5382 = vrsqrt.f32 %v2655_v35  ;;  %v2648_v30 = vmul.f32 0.03125, %v2640_v0  ;;  %5134 = vmatpush3.bf16.msra.mxu1 %v5131_v60  ;;  %v8167_v0 = vld [vmem:[#allocation17_spill] sm:$0xff] }
 0xecb   :  { %v2676_v58 = vmul.f32 %v5516_v32, %v2668_v24 }
 0xecc   :  { %v5379_v62 = vpop.eup %5378  ;;  %v2656_v15 = vadd.f32 1e-05, %v2648_v30 }
 0xecd   :  { %v2684_v54 = vadd.f32 %v5517_v13, %v2676_v58  ;;  %v2669_v11 = vmul.f32 %v5379_v62, %v7120_v48  ;;  %v8168_v58 = vld [vmem:[#allocation15_spill] sm:$0xff] }
 0xece   :  { %5384 = vrsqrt.f32 %v2656_v15 }
 0xecf   :  { %v5135_v33 = vpack.c.bf16 %v2684_v54, %v2683_v16  ;;  %v2677_v28 = vmul.f32 %v5516_v32, %v2669_v11 }
 0xed0   :  { %v5381_v29 = vpop.eup %5380 }
 0xed1   :  { %5136 = vmatprep.subr.bf16.mxu1 %v5135_v33  ;;  %v2670_v59 = vmul.f32 %v5381_v29, %v7126_v63  ;;  %v2685_v37 = vadd.f32 %v5517_v13, %v2677_v28  ;;  %v5518_v63 = vld [vmem:[%s8113_s22 + $0x8] sm:$0xff] }
 0xed2   :  { %5138 = vmatpush3.bf16.msra.mxu1 %v5135_v33 }
 0xed3   :  { %v2678_v5 = vmul.f32 %v5516_v32, %v2670_v59 }
 0xed4   :  { %v5383_v50 = vpop.eup %5382 }
 0xed5   :  { %v2686_v17 = vadd.f32 %v5517_v13, %v2678_v5  ;;  %v2671_v40 = vmul.f32 %v5383_v50, %v7132_v31  ;;  %v5519_v31 = vld [vmem:[%s8113_s22 + $0x10] sm:$0xff] }
 0xed7   :  { %v5139_v3 = vpack.c.bf16 %v2686_v17, %v2685_v37  ;;  %v2679_v48 = vmul.f32 %v5516_v32, %v2671_v40 }
 0xed8   :  { %v5385_v2 = vpop.eup %5384 }
 0xed9   :  { %5140 = vmatprep.subr.bf16.mxu1 %v5139_v3  ;;  %v2672_v10 = vmul.f32 %v5385_v2, %v7138_v19  ;;  %v2687_v41 = vadd.f32 %v5517_v13, %v2679_v48  ;;  %v5520_v19 = vld [vmem:[%s8113_s22 + $0x18] sm:$0xff] }
 0xeda   :  { %5142 = vmatpush3.bf16.msra.mxu1 %v5139_v3  ;;  %v8169_v48 = vld [vmem:[#allocation18_spill] sm:$0xff] }
 0xedb   :  { %v2680_v1 = vmul.f32 %v5516_v32, %v2672_v10  ;;  %v5529_v32 = vld [vmem:[%s8113_s22 + $0x60] sm:$0xff] }
 0xedd   :  { %v2688_v61 = vadd.f32 %v5517_v13, %v2680_v1 }
 0xedf   :  { %v5143_v52 = vpack.c.bf16 %v2688_v61, %v2687_v41 }
 0xee1   :  { %5144 = vmatprep.subr.bf16.mxu1 %v5143_v52 }
 0xee2   :  { %5146 = vmatpush3.bf16.msra.mxu1 %v5143_v52 }
 0xee5   :  { %4871 = vmatmul.mubr.msk.f32.vlgmr.msra.gmra.mrb[32].mxu1 %vm207_vm1, %v5518_v63  ;;  %v8170_v63 = vld [vmem:[#allocation19_spill] sm:$0xff] }
 0xee6   :  { %4873 = vmatprep.mubr.msk.f32.mxu1 %vm207_vm1, %v5519_v31 }
 0xee9   :  { %4874 = vmatmul.mubr.msk.f32.gmra.mrb[34].mxu1 %vm207_vm1, %v5520_v19 }
 0xeea   :  { %4876 = vmatprep.mubr.msk.f32.mxu1 %vm207_vm1, %v5521_v25 }
 0xeed   :  { %4877 = vmatmul.mubr.msk.f32.gmra.mrb[36].mxu1 %vm207_vm1, %v5522_v57 }
 0xeee   :  { %4879 = vmatprep.mubr.msk.f32.mxu1 %vm207_vm1, %v5523_v8 }
 0xef1   :  { %4880 = vmatmul.mubr.msk.f32.gmra.mrb[38].mxu1 %vm207_vm1, %v5524_v51 }
 0xef2   :  { %4882 = vmatprep.mubr.msk.f32.mxu1 %vm207_vm1, %v5525_v49  ;;  %v8171_v49 = vld [vmem:[#allocation20_spill] sm:$0xff] }
 0xef5   :  { %4883 = vmatmul.mubr.msk.f32.gmra.mrb[40].mxu1 %vm207_vm1, %v5526_v36 }
 0xef6   :  { %4885 = vmatprep.mubr.msk.f32.mxu1 %vm207_vm1, %v5527_v39 }
 0xef9   :  { %4886 = vmatmul.mubr.msk.f32.gmra.mrb[42].mxu1 %vm207_vm1, %v5528_v9 }
 0xefa   :  { %4888 = vmatprep.mubr.msk.f32.mxu1 %vm207_vm1, %v5529_v32 }
 0xefd   :  { %4889 = vmatmul.mubr.msk.f32.gmra.mrb[44].mxu1 %vm207_vm1, %v5530_v21  ;;  %v8172_v21 = vld [vmem:[#allocation21_spill] sm:$0xff] }
 0xefe   :  { %4891 = vmatprep.mubr.msk.f32.mxu1 %vm207_vm1, %v5531_v20 }
 0xf01   :  { %4892 = vmatmul.mubr.msk.f32.gmra.mrb[46].mxu1 %vm207_vm1, %v5532_v14 }
 0xf02   :  { %4926 = vmatprep.mubr.f32.mxu1 %v5533_v18 }
 0xfb8   :  { %v4872_v38 = vpop.f32.mrb[32].mxu1 }
 0xfb9   :  { %v2761_v13 = vadd.f32 %v4872_v38, %v8165_v27  ;;  %v2755_v26 = vpop.f32.mrb[33].mxu1 }
 0xfba   :  { %v7223_v56 = vadd.f32 %v2755_v26, %v8166_v34 }
 0xfbb   :  { %v7225_v22 = vmul.f32 0.70710677, %v2761_v13  ;;  %v7270_v14 = vmul.f32 0.5, %v2761_v13 }
 0xfbc   :  { %v7228_v60 = vmul.f32 0.70710677, %v7223_v56  ;;  %v4875_v47 = vpop.f32.mrb[34].mxu1 }
 0xfbd   :  { %v2867_v35 = vand.u32 2147483647, %v7225_v22  ;;  %v7232_v24 = vadd.f32 %v4875_v47, %v8167_v0  ;;  %v2765_v46 = vpop.f32.mrb[35].mxu1  ;;  %vm3187_vm4 = vcmp.ge.f32.partialorder %v7225_v22, 0.0 }
 0xfbe   :  { %v2866_v30 = vand.u32 2147483647, %v7228_v60  ;;  %v7236_v62 = vadd.f32 %v2765_v46, %v8168_v58  ;;  %vm3186_vm5 = vcmp.ge.f32.partialorder %v7228_v60, 0.0 }
 0xfbf   :  { %v2883_v15 = vmul.f32 0.3275911, %v2867_v35  ;;  %v7239_v16 = vmul.f32 0.70710677, %v7232_v24  ;;  %v3091_v28 = vsub.f32 0.0, %v2867_v35 }
 0xfc0   :  { %v2882_v54 = vmul.f32 0.3275911, %v2866_v30  ;;  %v7242_v11 = vmul.f32 0.70710677, %v7236_v62  ;;  %v4878_v59 = vpop.f32.mrb[36].mxu1  ;;  %v3090_v40 = vsub.f32 0.0, %v2866_v30 }
 0xfc1   :  { %v2899_v33 = vadd.f32 1.0, %v2883_v15  ;;  %v2869_v29 = vand.u32 2147483647, %v7239_v16  ;;  %v2775_v37 = vpop.f32.mrb[37].mxu1  ;;  %v7247_v1 = vadd.f32 %v4878_v59, %v8169_v48  ;;  %v3107_v61 = vmul.f32 %v3091_v28, %v2867_v35 }
 0xfc2   :  { %v2898_v5 = vadd.f32 1.0, %v2882_v54  ;;  %v2868_v50 = vand.u32 2147483647, %v7242_v11  ;;  %v7250_v31 = vadd.f32 %v2775_v37, %v8170_v63  ;;  %v3106_v25 = vmul.f32 %v3090_v40, %v2866_v30 }
 0xfc3   :  { %5386 = vrcp.f32 %v2899_v33  ;;  %v2885_v17 = vmul.f32 0.3275911, %v2869_v29  ;;  %v7253_v19 = vmul.f32 0.70710677, %v7247_v1  ;;  %v3124_v9 = vmul.f32 1.442695, %v3107_v61 }
 0xfc4   :  { %5388 = vrcp.f32 %v2898_v5  ;;  %v2884_v3 = vmul.f32 0.3275911, %v2868_v50  ;;  %v4881_v2 = vpop.f32.mrb[38].mxu1  ;;  %v7256_v57 = vmul.f32 0.70710677, %v7250_v31  ;;  %v3093_v18 = vsub.f32 0.0, %v2869_v29 }
 0xfc5   :  { %v2901_v10 = vadd.f32 1.0, %v2885_v17  ;;  %v2785_v41 = vpop.f32.mrb[39].mxu1  ;;  %v2871_v51 = vand.u32 2147483647, %v7253_v19  ;;  %v7262_v36 = vadd.f32 %v4881_v2, %v8171_v49  ;;  %v3122_v26 = vmul.f32 1.442695, %v3106_v25 }
 0xfc6   :  { %v2900_v52 = vadd.f32 1.0, %v2884_v3  ;;  %v2870_v32 = vand.u32 2147483647, %v7256_v57  ;;  %v7268_v20 = vadd.f32 %v2785_v41, %v8172_v21  ;;  %v3092_v0 = vsub.f32 0.0, %v2868_v50 }
 0xfc7   :  { %5390 = vrcp.f32 %v2901_v10  ;;  %v2887_v38 = vmul.f32 0.3275911, %v2871_v51  ;;  %v7273_v27 = vmul.f32 0.70710677, %v7262_v36  ;;  %v3095_v30 = vsub.f32 0.0, %v2871_v51 }
 0xfc8   :  { %5392 = vrcp.f32 %v2900_v52  ;;  %v7258_v8 = vpop.f32.mrb[40].mxu1  ;;  %v2886_v34 = vmul.f32 0.3275911, %v2870_v32  ;;  %v7276_v47 = vmul.f32 0.70710677, %v7268_v20  ;;  %v3109_v37 = vmul.f32 %v3093_v18, %v2869_v29 }
 0xfc9   :  { %v7264_v39 = vpop.f32.mrb[41].mxu1  ;;  %v2903_v46 = vadd.f32 1.0, %v2887_v38  ;;  %v2873_v58 = vand.u32 2147483647, %v7273_v27  ;;  %v3094_v3 = vsub.f32 0.0, %v2870_v32  ;;  %v3108_v21 = vmul.f32 %v3092_v0, %v2868_v50 }
 0xfca   :  { %v2902_v33 = vadd.f32 1.0, %v2886_v34  ;;  %v7287_v59 = vand.u32 2147483647, %v7276_v47  ;;  %v3111_v18 = vmul.f32 %v3095_v30, %v2871_v51  ;;  %v7309_v50 = vmul.f32 0.5, %v7223_v56 }
 0xfcb   :  { %5394 = vrcp.f32 %v2903_v46  ;;  %v2889_v17 = vmul.f32 0.3275911, %v2873_v58  ;;  %v3097_v2 = vsub.f32 0.0, %v2873_v58  ;;  %vm3189_vm9 = vcmp.ge.f32.partialorder %v7239_v16, 0.0 }
 0xfcc   :  { %v7281_v15 = vpop.f32.mrb[42].mxu1  ;;  %5396 = vrcp.f32 %v2902_v33  ;;  %v2888_v52 = vmul.f32 0.3275911, %v7287_v59  ;;  %vm3188_vm10 = vcmp.ge.f32.partialorder %v7242_v11, 0.0  ;;  %vm3191_vm11 = vcmp.ge.f32.partialorder %v7253_v19, 0.0 }
 0xfcd   :  { %v7278_v35 = vpop.eup %5386  ;;  %v7289_v28 = vpop.f32.mrb[43].mxu1  ;;  %v2905_v61 = vadd.f32 1.0, %v2889_v17  ;;  %v3110_v17 = vmul.f32 %v3094_v3, %v2870_v32  ;;  %v3113_v45 = vmul.f32 %v3097_v2, %v2873_v58  ;;  %v3132_v3 = vmul.f32 1.442695, %v3111_v18 }
 0xfce   :  { %v7283_v13 = vpop.eup %5388  ;;  %v2947_v54 = vmul.f32 1.0614054, %v7278_v35  ;;  %v2904_v46 = vadd.f32 1.0, %v2888_v52  ;;  %vm3190_vm12 = vcmp.ge.f32.partialorder %v7256_v57, 0.0  ;;  %vm3193_vm13 = vcmp.ge.f32.partialorder %v7273_v27, 0.0 }
 0xfcf   :  { %v2946_v5 = vmul.f32 1.0614054, %v7283_v13  ;;  %5398 = vrcp.f32 %v2905_v61  ;;  %v3136_v52 = vmul.f32 1.442695, %v3113_v45  ;;  %v3096_v45 = vsub.f32 0.0, %v7287_v59 }
 0xfd0   :  { %v2963_v40 = vadd.f32 -1.4531521, %v2947_v54  ;;  %v7292_v10 = vpop.f32.mrb[44].mxu1  ;;  %5400 = vrcp.f32 %v2904_v46  ;;  %vm3192_vm14 = vcmp.ge.f32.partialorder %v7276_v47, 0.0 }
 0xfd1   :  { %v7294_v48 = vpop.eup %5390  ;;  %v2962_v41 = vadd.f32 -1.4531521, %v2946_v5  ;;  %v7297_v63 = vpop.f32.mrb[45].mxu1  ;;  %v3128_v5 = vmul.f32 1.442695, %v3109_v37  ;;  %5402 = vpow2.f32 %v3124_v9 }
 0xfd2   :  { %v7299_v25 = vpop.eup %5392  ;;  %v2979_v29 = vmul.f32 %v7278_v35, %v2963_v40  ;;  %v2949_v49 = vmul.f32 1.0614054, %v7294_v48  ;;  %v3126_v37 = vmul.f32 1.442695, %v3108_v21  ;;  %5404 = vpow2.f32 %v3122_v26  ;;  %v8173_v21 = vld [vmem:[#allocation22_spill] sm:$0xff] }
 0xfd3   :  { %v2978_v38 = vmul.f32 %v7283_v13, %v2962_v41  ;;  %v2948_v34 = vmul.f32 1.0614054, %v7299_v25  ;;  %v3130_v41 = vmul.f32 1.442695, %v3110_v17  ;;  %5406 = vpow2.f32 %v3128_v5 }
 0xfd4   :  { %v2995_v54 = vadd.f32 1.4214138, %v2979_v29  ;;  %v2965_v33 = vadd.f32 -1.4531521, %v2949_v49  ;;  %v7305_v42 = vpop.f32.mrb[46].mxu1  ;;  %v7325_v18 = vadd.f32 %v7258_v8, %v8173_v21  ;;  %5408 = vpow2.f32 %v3126_v37 }
 0xfd5   :  { %v2994_v55 = vadd.f32 1.4214138, %v2978_v38  ;;  %v2964_v12 = vadd.f32 -1.4531521, %v2948_v34  ;;  %v7312_v0 = vpop.f32.mrb[47].mxu1  ;;  %v7316_v61 = vpop.eup %5394  ;;  %5410 = vpow2.f32 %v3132_v3 }
 0xfd6   :  { %v3011_v40 = vmul.f32 %v7278_v35, %v2995_v54  ;;  %v2981_v51 = vmul.f32 %v7294_v48, %v2965_v33  ;;  %v7318_v29 = vpop.eup %5396  ;;  %5412 = vpow2.f32 %v3130_v41 }
 0xfd7   :  { %v3010_v30 = vmul.f32 %v7283_v13, %v2994_v55  ;;  %v2980_v32 = vmul.f32 %v7299_v25, %v2964_v12  ;;  %v2951_v12 = vmul.f32 1.0614054, %v7316_v61  ;;  %v2950_v34 = vmul.f32 1.0614054, %v7318_v29 }
 0xfd8   :  { %v3027_v58 = vadd.f32 -0.28449672, %v3011_v40  ;;  %v2997_v2 = vadd.f32 1.4214138, %v2981_v51  ;;  %5414 = vpow2.f32 %v3136_v52  ;;  %v7366_v52 = vmul.f32 0.5, %v7236_v62 }
 0xfd9   :  { %v3026_v9 = vadd.f32 -0.28449672, %v3010_v30  ;;  %v2996_v56 = vadd.f32 1.4214138, %v2980_v32  ;;  %v2967_v33 = vadd.f32 -1.4531521, %v2951_v12  ;;  %v7331_v5 = vpop.eup %5398 }
 0xfda   :  { %v3043_v49 = vmul.f32 %v7278_v35, %v3027_v58  ;;  %v3013_v55 = vmul.f32 %v7294_v48, %v2997_v2  ;;  %v2966_v51 = vadd.f32 -1.4531521, %v2950_v34  ;;  %v2953_v32 = vmul.f32 1.0614054, %v7331_v5  ;;  %v7339_v2 = vpop.eup %5400 }
 0xfdb   :  { %v3042_v26 = vmul.f32 %v7283_v13, %v3026_v9  ;;  %v3012_v38 = vmul.f32 %v7299_v25, %v2996_v56  ;;  %v2983_v30 = vmul.f32 %v7316_v61, %v2967_v33  ;;  %v7337_v58 = vmul.f32 0.70710677, %v7325_v18 }
 0xfdc   :  { %v3059_v46 = vadd.f32 0.2548296, %v3043_v49  ;;  %v3029_v54 = vadd.f32 -0.28449672, %v3013_v55  ;;  %v2982_v37 = vmul.f32 %v7318_v29, %v2966_v51  ;;  %v5403_v55 = vpop.eup %5402 }
 0xfdd   :  { %v3058_v17 = vadd.f32 0.2548296, %v3042_v26  ;;  %v3028_v40 = vadd.f32 -0.28449672, %v3012_v38  ;;  %v2999_v21 = vadd.f32 1.4214138, %v2983_v30  ;;  %v5405_v33 = vpop.eup %5404 }
 0xfde   :  { %v3045_v8 = vmul.f32 %v7294_v48, %v3029_v54  ;;  %v3075_v9 = vmul.f32 %v7278_v35, %v3059_v46  ;;  %v2969_v26 = vadd.f32 -1.4531521, %v2953_v32  ;;  %v2998_v34 = vadd.f32 1.4214138, %v2982_v37 }
 0xfdf   :  { %v3074_v56 = vmul.f32 %v7283_v13, %v3058_v17  ;;  %v3044_v49 = vmul.f32 %v7299_v25, %v3028_v40  ;;  %v2952_v54 = vmul.f32 1.0614054, %v7339_v2  ;;  %v3015_v35 = vmul.f32 %v7316_v61, %v2999_v21  ;;  %v5407_v17 = vpop.eup %5406 }
 0xfe0   :  { %v3061_v12 = vadd.f32 0.2548296, %v3045_v8  ;;  %v2985_v13 = vmul.f32 %v7331_v5, %v2969_v26  ;;  %v3112_v46 = vmul.f32 %v3096_v45, %v7287_v59  ;;  %v3155_v40 = vmul.f32 %v5403_v55, %v3075_v9  ;;  %v5409_v9 = vpop.eup %5408 }
 0xfe1   :  { %v3060_v38 = vadd.f32 0.2548296, %v3044_v49  ;;  %v3154_v51 = vmul.f32 %v5405_v33, %v3074_v56  ;;  %v3014_v8 = vmul.f32 %v7318_v29, %v2998_v34  ;;  %v2968_v30 = vadd.f32 -1.4531521, %v2952_v54 }
 0xfe2   :  { %v3077_v4 = vmul.f32 %v7294_v48, %v3061_v12  ;;  %v3031_v32 = vadd.f32 -0.28449672, %v3015_v35  ;;  %v3001_v49 = vadd.f32 1.4214138, %v2985_v13  ;;  %v7353_v37 = vand.u32 2147483647, %v7337_v58 }
 0xfe3   :  { %v3076_v3 = vmul.f32 %v7299_v25, %v3060_v38  ;;  %v3030_v12 = vadd.f32 -0.28449672, %v3014_v8  ;;  %v2984_v21 = vmul.f32 %v7339_v2, %v2968_v30  ;;  %v3171_v56 = vsub.f32 1.0, %v3155_v40 }
 0xfe4   :  { %v3157_v48 = vmul.f32 %v5407_v17, %v3077_v4  ;;  %v3047_v59 = vmul.f32 %v7316_v61, %v3031_v32  ;;  %v3017_v45 = vmul.f32 %v7331_v5, %v3001_v49  ;;  %v3170_v25 = vsub.f32 1.0, %v3154_v51  ;;  %v5411_v51 = vpop.eup %5410 }
 0xfe5   :  { %v3046_v55 = vmul.f32 %v7318_v29, %v3030_v12  ;;  %v3134_v26 = vmul.f32 1.442695, %v3112_v46  ;;  %v3156_v4 = vmul.f32 %v5409_v9, %v3076_v3  ;;  %v2891_v34 = vmul.f32 0.3275911, %v7353_v37 }
 0xfe6   :  { %v3063_v38 = vadd.f32 0.2548296, %v3047_v59  ;;  %v3033_v41 = vadd.f32 -0.28449672, %v3017_v45  ;;  %v7363_v54 = vmul.f32 0.5, %v7232_v24  ;;  %v3173_v33 = vsub.f32 1.0, %v3157_v48 }
 0xfe7   :  { %v3062_v35 = vadd.f32 0.2548296, %v3046_v55  ;;  %v3000_v13 = vadd.f32 1.4214138, %v2984_v21  ;;  %v7372_v46 = vadd.f32 %v7264_v39, %v6196_v43  ;;  %v3203_v8 = vsub.f32 0.0, %v3171_v56  ;;  %v5413_v21 = vpop.eup %5412 }
 0xfe8   :  { %v3079_v17 = vmul.f32 %v7316_v61, %v3063_v38  ;;  %v3049_v40 = vmul.f32 %v7331_v5, %v3033_v41  ;;  %v3202_v30 = vsub.f32 0.0, %v3170_v25  ;;  %5416 = vpow2.f32 %v3134_v26  ;;  %v5415_v55 = vpop.eup %5414 }
 0xfe9   :  { %v3016_v24 = vmul.f32 %v7339_v2, %v3000_v13  ;;  %v3172_v3 = vsub.f32 1.0, %v3156_v4  ;;  %v3078_v32 = vmul.f32 %v7318_v29, %v3062_v35  ;;  %v2907_v62 = vadd.f32 1.0, %v2891_v34 }
 0xfea   :  { %v3065_v49 = vadd.f32 0.2548296, %v3049_v40  ;;  %v3205_v61 = vsub.f32 0.0, %v3173_v33  ;;  %v3159_v48 = vmul.f32 %v5411_v51, %v3079_v17  ;;  %v7379_v43 = vmul.f32 0.5, %v7247_v1 }
 0xfeb   :  { %v3032_v12 = vadd.f32 -0.28449672, %v3016_v24  ;;  %5418 = vrcp.f32 %v2907_v62  ;;  %v3219_v59 = vsel %vm3187_vm4, %v3171_v56, %v3203_v8  ;;  %v7385_v29 = vmul.f32 0.5, %v7250_v31  ;;  %v8174_v24 = vld [vmem:[#allocation23_spill] sm:$0xff] }
 0xfec   :  { %v3081_v39 = vmul.f32 %v7331_v5, %v3065_v49  ;;  %v7390_v9 = vadd.f32 %v7281_v15, %v6213_v53  ;;  %v3218_v1 = vsel %vm3186_vm5, %v3170_v25, %v3202_v30  ;;  %v3204_v26 = vsub.f32 0.0, %v3172_v3 }
 0xfed   :  { %v3048_v45 = vmul.f32 %v7339_v2, %v3032_v12  ;;  %v3158_v5 = vmul.f32 %v5413_v21, %v3078_v32  ;;  %v7396_v22 = vmul.f32 0.70710677, %v7372_v46  ;;  %v3221_v31 = vsel %vm3189_vm9, %v3173_v33, %v3205_v61 }
 0xfee   :  { %v3175_v56 = vsub.f32 1.0, %v3159_v48  ;;  %v3161_v4 = vmul.f32 %v5415_v55, %v3081_v39  ;;  %v7401_v53 = vmul.f32 0.5, %v7262_v36  ;;  %v7404_v15 = vmul.f32 0.5, %v7268_v20 }
 0xfef   :  { %v3064_v38 = vadd.f32 0.2548296, %v3048_v45  ;;  %v3099_v60 = vsub.f32 0.0, %v7353_v37  ;;  %v2874_v25 = vand.u32 2147483647, %v7396_v22  ;;  %v3235_v41 = vadd.f32 1.0, %v3219_v59 }
 0xff0   :  { %v3234_v34 = vadd.f32 1.0, %v3218_v1  ;;  %v7412_v33 = vadd.f32 %v7289_v28, %v6238_v44  ;;  %v3237_v35 = vadd.f32 1.0, %v3221_v31  ;;  %v3220_v36 = vsel %vm3188_vm10, %v3172_v3, %v3204_v26 }
 0xff1   :  { %v3080_v16 = vmul.f32 %v7339_v2, %v3064_v38  ;;  %v3174_v20 = vsub.f32 1.0, %v3158_v5  ;;  %v2890_v13 = vmul.f32 0.3275911, %v2874_v25  ;;  %v3207_v40 = vsub.f32 0.0, %v3175_v56 }
 0xff2   :  { %v5417_v17 = vpop.eup %5416  ;;  %v3177_v51 = vsub.f32 1.0, %v3161_v4  ;;  %v7418_v8 = vmul.f32 0.5, %v7325_v18  ;;  %v7421_v2 = vmul.f32 0.70710677, %v7390_v9  ;;  %v3115_v44 = vmul.f32 %v3099_v60, %v7353_v37 }
 0xff3   :  { %v3160_v30 = vmul.f32 %v5417_v17, %v3080_v16  ;;  %v2906_v28 = vadd.f32 1.0, %v2890_v13  ;;  %v7426_v11 = vadd.f32 %v7292_v10, %v8174_v24  ;;  %v7429_v3 = vmul.f32 %v3235_v41, %v7270_v14  ;;  %v8176_v17 = vld [vmem:[#allocation25_spill] sm:$0xff] }
 0xff4   :  { %v7432_v32 = vmul.f32 %v3234_v34, %v7309_v50  ;;  %v3236_v49 = vadd.f32 1.0, %v3220_v36  ;;  %v2877_v18 = vand.u32 2147483647, %v7421_v2  ;;  %v7438_v61 = vmul.f32 %v3237_v35, %v7363_v54 }
 0xff5   :  { %v7435_v62 = vpop.eup %5418  ;;  %v3206_v37 = vsub.f32 0.0, %v3174_v20  ;;  %5420 = vrcp.f32 %v2906_v28  ;;  %v7441_v48 = vmul.f32 0.70710677, %v7412_v33  ;;  %v3223_v14 = vsel %vm3191_vm11, %v3175_v56, %v3207_v40 }
 0xff6   :  { %v3209_v10 = vsub.f32 0.0, %v3177_v51  ;;  %v2955_v50 = vmul.f32 1.0614054, %v7435_v62  ;;  %v2893_v12 = vmul.f32 0.3275911, %v2877_v18  ;;  %v3176_v39 = vsub.f32 1.0, %v3160_v30 }
 0xff7   :  { %v3140_v21 = vmul.f32 1.442695, %v3115_v44  ;;  %v3098_v59 = vsub.f32 0.0, %v2874_v25  ;;  %v2876_v54 = vand.u32 2147483647, %v7441_v48  ;;  %v7449_v45 = vmul.f32 %v3236_v49, %v7366_v52  ;;  %v8177_v30 = vld [vmem:[#allocation26_spill] sm:$0xff] }
 0xff8   :  { %v2971_v55 = vadd.f32 -1.4531521, %v2955_v50  ;;  %v2909_v1 = vadd.f32 1.0, %v2893_v12  ;;  %v7452_v26 = vmul.f32 0.70710677, %v7426_v11  ;;  %v3239_v19 = vadd.f32 1.0, %v3223_v14 }
 0xff9   :  { %v3222_v5 = vsel %vm3190_vm12, %v3174_v20, %v3206_v37  ;;  %v7457_v31 = vmul.f32 0.5, %v7372_v46  ;;  %v2892_v56 = vmul.f32 0.3275911, %v2876_v54  ;;  %v3225_v4 = vsel %vm3193_vm13, %v3177_v51, %v3209_v10  ;;  %v8175_v46 = vld [vmem:[#allocation24_spill] sm:$0xff] }
 0xffa   :  { %v2987_v38 = vmul.f32 %v7435_v62, %v2971_v55  ;;  %5422 = vrcp.f32 %v2909_v1  ;;  %v7463_v52 = vand.u32 2147483647, %v7452_v26  ;;  %v3208_v60 = vsub.f32 0.0, %v3176_v39 }
 0xffb   :  { %v3114_v41 = vmul.f32 %v3098_v59, %v2874_v25  ;;  %v3101_v34 = vsub.f32 0.0, %v2877_v18  ;;  %v2908_v16 = vadd.f32 1.0, %v2892_v56  ;;  %5424 = vpow2.f32 %v3140_v21 }
 0xffc   :  { %v3003_v35 = vadd.f32 1.4214138, %v2987_v38  ;;  %v2895_v57 = vmul.f32 0.3275911, %v7463_v52  ;;  %v7468_v36 = vadd.f32 %v7297_v63, %v8175_v46  ;;  %v7471_v27 = vmul.f32 %v3239_v19, %v7379_v43 }
 0xffd   :  { %v3238_v20 = vadd.f32 1.0, %v3222_v5  ;;  %v3241_v13 = vadd.f32 1.0, %v3225_v4  ;;  %v7475_v40 = vadd.f32 %v7305_v42, %v8176_v17  ;;  %5426 = vrcp.f32 %v2908_v16 }
 0xffe   :  { %v3019_v25 = vmul.f32 %v7435_v62, %v3003_v35  ;;  %v2911_v51 = vadd.f32 1.0, %v2895_v57  ;;  %v7480_v44 = vadd.f32 %v7312_v0, %v8177_v30  ;;  %v3224_v63 = vsel %vm3192_vm14, %v3176_v39, %v3208_v60 }
 0xfff   :  { %v7482_v28 = vpop.eup %5420  ;;  %v3138_v43 = vmul.f32 1.442695, %v3114_v41  ;;  %v3117_v24 = vmul.f32 %v3101_v34, %v2877_v18  ;;  %v7487_v49 = vmul.f32 0.70710677, %v7468_v36  ;;  %v3100_v14 = vsub.f32 0.0, %v2876_v54 }
0x1000   :  { %v3035_v42 = vadd.f32 -0.28449672, %v3019_v25  ;;  %v2954_v37 = vmul.f32 1.0614054, %v7482_v28  ;;  %5428 = vrcp.f32 %v2911_v51  ;;  %v7491_v10 = vmul.f32 %v3238_v20, %v7385_v29 }
0x1001   :  { %v7494_v0 = vmul.f32 %v3241_v13, %v7401_v53  ;;  %v2878_v50 = vand.u32 2147483647, %v7487_v49  ;;  %v7498_v47 = vmul.f32 0.70710677, %v7475_v40  ;;  %v3240_v18 = vadd.f32 1.0, %v3224_v63 }
0x1002   :  { %v3051_v12 = vmul.f32 %v7435_v62, %v3035_v42  ;;  %v2970_v39 = vadd.f32 -1.4531521, %v2954_v37  ;;  %v7502_v21 = vmul.f32 0.70710677, %v7480_v44  ;;  %5430 = vpow2.f32 %v3138_v43 }
0x1003   :  { %v3144_v59 = vmul.f32 1.442695, %v3117_v24  ;;  %v2894_v55 = vmul.f32 0.3275911, %v2878_v50  ;;  %v2881_v29 = vand.u32 2147483647, %v7498_v47  ;;  %v3116_v5 = vmul.f32 %v3100_v14, %v2876_v54 }
0x1004   :  { %v7505_v1 = vpop.eup %5422  ;;  %v3067_v53 = vadd.f32 0.2548296, %v3051_v12  ;;  %v2986_v19 = vmul.f32 %v7482_v28, %v2970_v39  ;;  %v7509_v56 = vand.u32 2147483647, %v7502_v21  ;;  %v3103_v38 = vsub.f32 0.0, %v7463_v52 }
0x1005   :  { %v2957_v4 = vmul.f32 1.0614054, %v7505_v1  ;;  %v2910_v60 = vadd.f32 1.0, %v2894_v55  ;;  %v2897_v41 = vmul.f32 0.3275911, %v2881_v29  ;;  %v5425_v34 = vpop.eup %5424  ;;  %v3102_v57 = vsub.f32 0.0, %v2878_v50 }
0x1006   :  { %v3083_v16 = vmul.f32 %v7435_v62, %v3067_v53  ;;  %v3002_v35 = vadd.f32 1.4214138, %v2986_v19  ;;  %v2896_v46 = vmul.f32 0.3275911, %v7509_v56  ;;  %v3256_v20 = vmul.f32 %v3240_v18, %v7404_v15 }
0x1007   :  { %v2973_v13 = vadd.f32 -1.4531521, %v2957_v4  ;;  %5432 = vrcp.f32 %v2910_v60  ;;  %v2913_v54 = vadd.f32 1.0, %v2897_v41  ;;  %v7516_v17 = vpop.eup %5426  ;;  %vm3195_vm15 = vcmp.ge.f32.partialorder %v7337_v58, 0.0 }
0x1008   :  { %v3163_v25 = vmul.f32 %v5425_v34, %v3083_v16  ;;  %v3018_v51 = vmul.f32 %v7482_v28, %v3002_v35  ;;  %v3142_v30 = vmul.f32 1.442695, %v3116_v5  ;;  %v2912_v63 = vadd.f32 1.0, %v2896_v46 }
0x1009   :  { %v2989_v62 = vmul.f32 %v7505_v1, %v2973_v13  ;;  %5434 = vpow2.f32 %v3144_v59  ;;  %v2956_v43 = vmul.f32 1.0614054, %v7516_v17  ;;  %v3119_v24 = vmul.f32 %v3103_v38, %v7463_v52 }
0x100a   :  { %v7523_v15 = vpop.eup %5428  ;;  %v3179_v42 = vsub.f32 1.0, %v3163_v25  ;;  %v3034_v37 = vadd.f32 -0.28449672, %v3018_v51  ;;  %v3118_v14 = vmul.f32 %v3102_v57, %v2878_v50  ;;  %5436 = vrcp.f32 %v2913_v54 }
0x100b   :  { %v3005_v18 = vadd.f32 1.4214138, %v2989_v62  ;;  %v2972_v12 = vadd.f32 -1.4531521, %v2956_v43  ;;  %v2959_v39 = vmul.f32 1.0614054, %v7523_v15  ;;  %5438 = vrcp.f32 %v2912_v63 }
0x100c   :  { %v3211_v55 = vsub.f32 0.0, %v3179_v42  ;;  %v3050_v53 = vmul.f32 %v7482_v28, %v3034_v37  ;;  %5440 = vpow2.f32 %v3142_v30  ;;  %v3105_v59 = vsub.f32 0.0, %v2881_v29  ;;  %v5431_v19 = vpop.eup %5430 }
0x100d   :  { %v3021_v5 = vmul.f32 %v7505_v1, %v3005_v18  ;;  %v2988_v52 = vmul.f32 %v7516_v17, %v2972_v12  ;;  %v2975_v4 = vadd.f32 -1.4531521, %v2959_v39  ;;  %v5147_v50 = vpack.c.bf16 %v7429_v3, %v7432_v32 }
0x100e   :  { %v3066_v38 = vadd.f32 0.2548296, %v3050_v53  ;;  %v3148_v60 = vmul.f32 1.442695, %v3119_v24  ;;  %v3104_v41 = vsub.f32 0.0, %v7509_v56  ;;  %v5151_v34 = vpack.c.bf16 %v7438_v61, %v7449_v45 }
0x100f   :  { %vm3194_vm3 = vcmp.ge.f32.partialorder %v7396_v22, 0.0  ;;  %v3037_v16 = vadd.f32 -0.28449672, %v3021_v5  ;;  %v3004_v35 = vadd.f32 1.4214138, %v2988_v52  ;;  %v2991_v57 = vmul.f32 %v7523_v15, %v2975_v4  ;;  %5148 = vmatprep.subr.bf16.mxu1 %v5147_v50 }
0x1010   :  { %v3146_v46 = vmul.f32 1.442695, %v3118_v14  ;;  %v3082_v13 = vmul.f32 %v7482_v28, %v3066_v38  ;;  %v3121_v54 = vmul.f32 %v3105_v59, %v2881_v29  ;;  %5150 = vmatpush3.bf16.msra.mxu1 %v5147_v50  ;;  %v5155_v3 = vpack.c.bf16 %v7471_v27, %v7491_v10 }
0x1011   :  { %v5159_v32 = vpack.c.bf16 %v7494_v0, %v3256_v20  ;;  %v7540_v25 = vpop.eup %5432  ;;  %v3227_v61 = vsel %vm3195_vm15, %v3179_v42, %v3211_v55  ;;  %v3053_v45 = vmul.f32 %v7505_v1, %v3037_v16  ;;  %v3020_v51 = vmul.f32 %v7516_v17, %v3004_v35  ;;  %5152 = vmatprep.subr.bf16.mxu1 %v5151_v34 }
0x1012   :  { %v3007_v30 = vadd.f32 1.4214138, %v2991_v57  ;;  %v3162_v63 = vmul.f32 %v5431_v19, %v3082_v13  ;;  %5442 = vpow2.f32 %v3148_v60  ;;  %v2958_v28 = vmul.f32 1.0614054, %v7540_v25 }
0x1013   :  { %v3120_v29 = vmul.f32 %v3104_v41, %v7509_v56  ;;  %v5435_v27 = vpop.eup %5434  ;;  %v3069_v10 = vadd.f32 0.2548296, %v3053_v45  ;;  %v3036_v0 = vadd.f32 -0.28449672, %v3020_v51  ;;  %5444 = vpow2.f32 %v3146_v46 }
0x1014   :  { %v3023_v20 = vmul.f32 %v7523_v15, %v3007_v30  ;;  %v7549_v58 = vpop.eup %5436  ;;  %v3243_v62 = vadd.f32 1.0, %v3227_v61  ;;  %v3178_v43 = vsub.f32 1.0, %v3162_v63  ;;  %vm3197_vm4 = vcmp.ge.f32.partialorder %v7421_v2, 0.0  ;;  %5154 = vmatpush3.bf16.msra.mxu1 %v5151_v34 }
0x1015   :  { %v2974_v24 = vadd.f32 -1.4531521, %v2958_v28  ;;  %v3152_v42 = vmul.f32 1.442695, %v3121_v54  ;;  %v7552_v37 = vpop.eup %5438  ;;  %v3085_v14 = vmul.f32 %v7505_v1, %v3069_v10  ;;  %v3052_v56 = vmul.f32 %v7516_v17, %v3036_v0  ;;  %5156 = vmatprep.subr.bf16.mxu1 %v5155_v3 }
0x1016   :  { %v3039_v18 = vadd.f32 -0.28449672, %v3023_v20  ;;  %v2961_v12 = vmul.f32 1.0614054, %v7549_v58  ;;  %v5441_v39 = vpop.eup %5440  ;;  %v3210_v55 = vsub.f32 0.0, %v3178_v43  ;;  %v3259_v1 = vmul.f32 %v3243_v62, %v7418_v8 }
0x1017   :  { %v2990_v53 = vmul.f32 %v7540_v25, %v2974_v24  ;;  %v2960_v59 = vmul.f32 1.0614054, %v7552_v37  ;;  %v3150_v19 = vmul.f32 1.442695, %v3120_v29  ;;  %v3165_v5 = vmul.f32 %v5435_v27, %v3085_v14 }
0x1018   :  { %v3068_v52 = vadd.f32 0.2548296, %v3052_v56  ;;  %v3055_v4 = vmul.f32 %v7523_v15, %v3039_v18  ;;  %v2977_v50 = vadd.f32 -1.4531521, %v2961_v12  ;;  %v3226_v38 = vsel %vm3194_vm3, %v3178_v43, %v3210_v55  ;;  %5158 = vmatpush3.bf16.msra.mxu1 %v5155_v3 }
0x1019   :  { %v3006_v60 = vadd.f32 1.4214138, %v2990_v53  ;;  %v2976_v41 = vadd.f32 -1.4531521, %v2960_v59  ;;  %v3242_v34 = vadd.f32 1.0, %v3226_v38  ;;  %v3181_v16 = vsub.f32 1.0, %v3165_v5  ;;  %5160 = vmatprep.subr.bf16.mxu1 %v5159_v32 }
0x101a   :  { %v3084_v35 = vmul.f32 %v7516_v17, %v3068_v52  ;;  %v3071_v57 = vadd.f32 0.2548296, %v3055_v4  ;;  %v2993_v13 = vmul.f32 %v7549_v58, %v2977_v50  ;;  %5446 = vpow2.f32 %v3152_v42 }
0x101b   :  { %v3022_v46 = vmul.f32 %v7540_v25, %v3006_v60  ;;  %v2992_v54 = vmul.f32 %v7552_v37, %v2976_v41  ;;  %v3258_v8 = vmul.f32 %v3242_v34, %v7457_v31  ;;  %v3213_v22 = vsub.f32 0.0, %v3181_v16 }
0x101c   :  { %v3164_v61 = vmul.f32 %v5441_v39, %v3084_v35  ;;  %v3087_v45 = vmul.f32 %v7523_v15, %v3071_v57  ;;  %v5443_v3 = vpop.eup %5442  ;;  %v3009_v30 = vadd.f32 1.4214138, %v2993_v13  ;;  %5448 = vpow2.f32 %v3150_v19  ;;  %5162 = vmatpush3.bf16.msra.mxu1 %v5159_v32 }
0x101d   :  { %v3038_v51 = vadd.f32 -0.28449672, %v3022_v46  ;;  %v3008_v63 = vadd.f32 1.4214138, %v2992_v54  ;;  %v5445_v17 = vpop.eup %5444  ;;  %v3229_v28 = vsel %vm3197_vm4, %v3181_v16, %v3213_v22  ;;  %v5163_v10 = vpack.c.bf16 %v3259_v1, %v3258_v8 }
0x101e   :  { %v3180_v29 = vsub.f32 1.0, %v3164_v61  ;;  %v3167_v27 = vmul.f32 %v5443_v3, %v3087_v45  ;;  %v3245_v0 = vadd.f32 1.0, %v3229_v28  ;;  %v3025_v20 = vmul.f32 %v7549_v58, %v3009_v30  ;;  %v5537_v28 = vld [vmem:[%s8019_s7 + $0x20] sm:$0xff] }
0x101f   :  { %v3054_v31 = vmul.f32 %v7540_v25, %v3038_v51  ;;  %v3024_v15 = vmul.f32 %v7552_v37, %v3008_v63  ;;  %v2845_v62 = vmul.f32 0.5, %v7390_v9  ;;  %vm3196_vm5 = vcmp.ge.f32.partialorder %v7441_v48, 0.0  ;;  %5164 = vmatprep.subr.bf16.mxu1 %v5163_v10 }
0x1020   :  { %v3212_v43 = vsub.f32 0.0, %v3180_v29  ;;  %v3183_v32 = vsub.f32 1.0, %v3167_v27  ;;  %v3041_v2 = vadd.f32 -0.28449672, %v3025_v20  ;;  %5166 = vmatpush3.bf16.msra.mxu1 %v5163_v10  ;;  %v2844_v56 = vmul.f32 0.5, %v7412_v33  ;;  %v5539_v27 = vld [vmem:[%s8019_s7 + $0x30] sm:$0xff] }
0x1021   :  { %v3070_v24 = vadd.f32 0.2548296, %v3054_v31  ;;  %v3040_v42 = vadd.f32 -0.28449672, %v3024_v15  ;;  %v3261_v14 = vmul.f32 %v3245_v0, %v2845_v62  ;;  %vm3199_vm9 = vcmp.ge.f32.partialorder %v7452_v26, 0.0  ;;  %v5540_v10 = vld [vmem:[%s8019_s7 + $0x38] sm:$0xff] }
0x1022   :  { %v3228_v18 = vsel %vm3196_vm5, %v3180_v29, %v3212_v43  ;;  %v3215_v12 = vsub.f32 0.0, %v3183_v32  ;;  %v3057_v53 = vmul.f32 %v7549_v58, %v3041_v2  ;;  %v2847_v16 = vmul.f32 0.5, %v7426_v11  ;;  %v5538_v29 = vld [vmem:[%s8019_s7 + $0x28] sm:$0xff]  ;;  %v8180_v20 = vld [vmem:[#allocation27_spill] sm:$0xff] }
0x1023   :  { %v3244_v39 = vadd.f32 1.0, %v3228_v18  ;;  %v3086_v55 = vmul.f32 %v7540_v25, %v3070_v24  ;;  %v3056_v9 = vmul.f32 %v7552_v37, %v3040_v42  ;;  %vm3198_vm10 = vcmp.ge.f32.partialorder %v7487_v49, 0.0  ;;  %v8181_v43 = vld [vmem:[#allocation28_spill] sm:$0xff] }
0x1024   :  { %v5447_v48 = vpop.eup %5446  ;;  %v3231_v19 = vsel %vm3199_vm9, %v3183_v32, %v3215_v12  ;;  %v3073_v52 = vadd.f32 0.2548296, %v3057_v53  ;;  %v2846_v13 = vmul.f32 0.5, %v7468_v36  ;;  %vm3201_vm11 = vcmp.ge.f32.partialorder %v7498_v47, 0.0  ;;  %v8183_v12 = vld [vmem:[#allocation30_spill] sm:$0xff] }
0x1025   :  { %v3260_v59 = vmul.f32 %v3244_v39, %v2844_v56  ;;  %v3166_v5 = vmul.f32 %v5445_v17, %v3086_v55  ;;  %v3072_v4 = vadd.f32 0.2548296, %v3056_v9  ;;  %v3247_v60 = vadd.f32 1.0, %v3231_v19  ;;  %v8185_v9 = vld [vmem:[#allocation31_spill] sm:$0xff]  ;;  %v8186_v19 = vld [vmem:[#allocation32_spill] sm:$0xff] }
0x1026   :  { %v5449_v50 = vpop.eup %5448  ;;  %v3089_v33 = vmul.f32 %v7549_v58, %v3073_v52  ;;  %vm3200_vm12 = vcmp.ge.f32.partialorder %v7502_v21, 0.0  ;;  %v2849_v11 = vmul.f32 0.5, %v7475_v40  ;;  %v2848_v51 = vmul.f32 0.5, %v7480_v44  ;;  %v5534_v21 = vld [vmem:[%s8019_s7 + $0x8] sm:$0xff]  ;;  %v5535_v40 = vld [vmem:[%s8019_s7 + $0x10] sm:$0xff]  ;;  %v5536_v44 = vld [vmem:[%s8019_s7 + $0x18] sm:$0xff] }
0x1027   :  { %v3182_v1 = vsub.f32 1.0, %v3166_v5  ;;  %v5167_v38 = vpack.c.bf16 %v3261_v14, %v3260_v59  ;;  %v3088_v25 = vmul.f32 %v7552_v37, %v3072_v4  ;;  %v3263_v46 = vmul.f32 %v3247_v60, %v2847_v16  ;;  %v8182_v14 = vld [vmem:[#allocation29_spill] sm:$0xff]  ;;  %v8187_v52 = vld [vmem:[#allocation35_spill] sm:$0xff] }
0x1028   :  { %v3169_v34 = vmul.f32 %v5447_v48, %v3089_v33  ;;  %v8178_v47 = vmov 0.0|0.0   ;;  %v8179_v0 = vmov 0.0   ;;  %v8189_v33 = vld [vmem:[#allocation33_spill] sm:$0xff] }
0x1029   :  { %v3214_v41 = vsub.f32 0.0, %v3182_v1  ;;  %5168 = vmatprep.subr.bf16.mxu1 %v5167_v38  ;;  %v3168_v26 = vmul.f32 %v5449_v50, %v3088_v25  ;;  %v8191_v16 = vld [vmem:[#allocation37_spill] sm:$0xff] }
0x102a   :  { %5170 = vmatpush3.bf16.msra.mxu1 %v5167_v38  ;;  %v3185_v57 = vsub.f32 1.0, %v3169_v34 }
0x102b   :  { %v3230_v35 = vsel %vm3198_vm10, %v3182_v1, %v3214_v41  ;;  %v3184_v58 = vsub.f32 1.0, %v3168_v26  ;;  %v8190_v41 = vld [vmem:[#allocation34_spill] sm:$0xff] }
0x102c   :  { %v3246_v54 = vadd.f32 1.0, %v3230_v35  ;;  %v3217_v8 = vsub.f32 0.0, %v3185_v57  ;;  %v8192_v35 = vld [vmem:[#allocation36_spill] sm:$0xff] }
0x102d   :  { %v3216_v37 = vsub.f32 0.0, %v3184_v58 }
0x102e   :  { %v3262_v22 = vmul.f32 %v3246_v54, %v2846_v13  ;;  %v3233_v61 = vsel %vm3201_vm11, %v3185_v57, %v3217_v8 }
0x102f   :  { %v3249_v49 = vadd.f32 1.0, %v3233_v61  ;;  %v3232_v45 = vsel %vm3200_vm12, %v3184_v58, %v3216_v37 }
0x1030   :  { %v5171_v3 = vpack.c.bf16 %v3263_v46, %v3262_v22  ;;  %v3248_v30 = vadd.f32 1.0, %v3232_v45 }
0x1031   :  { %v3265_v63 = vmul.f32 %v3249_v49, %v2849_v11 }
0x1032   :  { %5172 = vmatprep.subr.bf16.mxu1 %v5171_v3  ;;  %v3264_v36 = vmul.f32 %v3248_v30, %v2848_v51 }
0x1033   :  { %5174 = vmatpush3.bf16.msra.mxu1 %v5171_v3 }
0x1034   :  { %v5175_v17 = vpack.c.bf16 %v3265_v63, %v3264_v36 }
0x1036   :  { %5176 = vmatprep.subr.bf16.mxu1 %v5175_v17 }
0x1037   :  { %5178 = vmatpush3.bf16.msra.mxu1 %v5175_v17 }
0x1038   :  { %5179 = vmatprep.subr.bf16.mxu1 %v8178_v47 }
0x103a   :  { %4927 = vmatmul.mubr.f32.vlgmr.msra.gmra.mrb[48].mxu1 %v5534_v21 }
0x103b   :  { %4929 = vmatprep.mubr.f32.mxu1 %v5535_v40 }
0x103e   :  { %4930 = vmatmul.mubr.f32.gmra.mrb[50].mxu1 %v5536_v44 }
0x103f   :  { %4932 = vmatprep.mubr.f32.mxu1 %v5537_v28 }
0x1042   :  { %4933 = vmatmul.mubr.f32.gmra.mrb[52].mxu1 %v5538_v29 }
0x1043   :  { %4935 = vmatprep.mubr.f32.mxu1 %v5539_v27 }
0x1046   :  { %4936 = vmatmul.mubr.f32.gmra.mrb[54].mxu1 %v5540_v10 }
0x1047   :  { %4946 = vmatprep.mubr.msk.f32.mxu1 %vm5551_vm2, %v8179_v0 }
0x110d   :  { %v4928_v31 = vpop.f32.mrb[48].mxu1 }
0x110e   :  { %v3338_v15 = vadd.f32 %v4928_v31, %v8180_v20  ;;  %v3332_v62 = vpop.f32.mrb[49].mxu1 }
0x110f   :  { %v3333_v32 = vadd.f32 %v3332_v62, %v8181_v43 }
0x1110   :  { %v7617_v24 = vadd.f32 %v6508_v7, %v3338_v15  ;;  %v8184_v7 = vld [vmem:[#allocation4_spill] sm:$0xff] }
0x1111   :  { %v7620_v2 = vadd.f32 %v6503_v6, %v3333_v32  ;;  %v4931_v42 = vpop.f32.mrb[50].mxu1 }
0x1112   :  { %3380 = vst.msk [vmem:[#allocation2 + $0x8] sm:$0xff] %vm163_vm0, %v7617_v24  ;;  %v3348_v56 = vadd.f32 %v4931_v42, %v8182_v14  ;;  %v3342_v18 = vpop.f32.mrb[51].mxu1 }
0x1113   :  { %3379 = vst.msk [vmem:[#allocation2] sm:$0xff] %vm163_vm0, %v7620_v2  ;;  %v3343_v39 = vadd.f32 %v3342_v18, %v8183_v12 }
0x1114   :  { %v7629_v55 = vadd.f32 %v6539_v23, %v3348_v56  ;;  %v8188_v23 = vld [vmem:[#allocation3_spill] sm:$0xff] }
0x1115   :  { %v7632_v53 = vadd.f32 %v8184_v7, %v3343_v39  ;;  %v4934_v6 = vpop.f32.mrb[52].mxu1 }
0x1116   :  { %3382 = vst.msk [vmem:[#allocation2 + $0x18] sm:$0xff] %vm163_vm0, %v7629_v55  ;;  %v3358_v48 = vadd.f32 %v4934_v6, %v8185_v9  ;;  %v3352_v59 = vpop.f32.mrb[53].mxu1 }
0x1117   :  { %3381 = vst.msk [vmem:[#allocation2 + $0x10] sm:$0xff] %vm163_vm0, %v7632_v53  ;;  %v3353_v5 = vadd.f32 %v3352_v59, %v8186_v19  ;;  %v5541_v59 = vld [vmem:[%s8022_s9] sm:$0x3] }
0x1118   :  { %v7641_v4 = vadd.f32 %v8187_v52, %v3358_v48 }
0x1119   :  { %v7644_v50 = vadd.f32 %v8188_v23, %v3353_v5  ;;  %v4937_v1 = vpop.f32.mrb[54].mxu1  ;;  %v8193_v5 = vld [vmem:[#allocation38_spill] sm:$0xff] }
0x111a   :  { %3384 = vst.msk [vmem:[#allocation2 + $0x28] sm:$0xff] %vm163_vm0, %v7641_v4  ;;  %v3368_v38 = vadd.f32 %v4937_v1, %v8189_v33  ;;  %v3362_v60 = vpop.f32.mrb[55].mxu1  ;;  %v3391_v25 = vld [vmem:[#allocation2 + $0x1] ss:$2 sm:$0xff]  ;;  %v3387_v8 = vld [vmem:[#allocation2] ss:$2 sm:$0xff] }
0x111b   :  { %3383 = vst.msk [vmem:[#allocation2 + $0x20] sm:$0xff] %vm163_vm0, %v7644_v50  ;;  %v3363_v34 = vadd.f32 %v3362_v60, %v8190_v41  ;;  %3399 = vrot.lane.b32.xlu1 %v3391_v25, %s5549_s21  ;;  %v5542_v1 = vld [vmem:[%s8023_s11 + $0x8] sm:$0xff]  ;;  %v8194_v33 = vld [vmem:[#allocation43_spill] sm:$0xff]  ;;  %v5544_v25 = vld [vmem:[%s8023_s11 + $0x18] sm:$0xff] }
0x111c   :  { %v7654_v26 = vadd.f32 %v8191_v16, %v3368_v38  ;;  %v5543_v38 = vld [vmem:[%s8023_s11 + $0x10] sm:$0xff]  ;;  %v8195_v60 = vld [vmem:[#allocation44_spill] sm:$0xff] }
0x111d   :  { %v7657_v57 = vadd.f32 %v8192_v35, %v3363_v34  ;;  %v8196_v41 = vld [vmem:[#allocation5_spill] sm:$0xff]  ;;  %v8197_v16 = vld [vmem:[#allocation40_spill] sm:$0xff] }
0x111e   :  { %3386 = vst.msk [vmem:[#allocation2 + $0x38] sm:$0xff] %vm163_vm0, %v7654_v26  ;;  %v3392_v46 = vld [vmem:[#allocation2 + $0x11] ss:$2 sm:$0xff]  ;;  %v3388_v11 = vld [vmem:[#allocation2 + $0x10] ss:$2 sm:$0xff] }
0x111f   :  { %3385 = vst.msk [vmem:[#allocation2 + $0x30] sm:$0xff] %vm163_vm0, %v7657_v57  ;;  %3401 = vrot.lane.b32.xlu0 %v3392_v46, %s5549_s21 }
0x1122   :  { %v3393_v13 = vld [vmem:[#allocation2 + $0x21] ss:$2 sm:$0xff]  ;;  %v3389_v51 = vld [vmem:[#allocation2 + $0x20] ss:$2 sm:$0xff] }
0x1123   :  { %3403 = vrot.lane.b32.xlu1 %v3393_v13, %s5549_s21  ;;  %v8198_v13 = vld [vmem:[#allocation39_spill] sm:$0xff] }
0x1126   :  { %v3394_v54 = vld [vmem:[#allocation2 + $0x31] ss:$2 sm:$0xff]  ;;  %v3390_v21 = vld [vmem:[#allocation2 + $0x30] ss:$2 sm:$0xff] }
0x1127   :  { %3405 = vrot.lane.b32.xlu1 %v3394_v54, %s5549_s21 }
0x118d   :  { %v3400_v58 = vpop.permute.xlu1 %3399 }
0x118e   :  { %v7667_v22 = vsel %vm163_vm0, %v3387_v8, %v3400_v58  ;;  %v8199_v8 = vld [vmem:[#allocation41_spill] sm:$0xff] }
0x118f   :  { %v3415_v37 = vsel %vm207_vm1, %v7667_v22, 0.0  ;;  %v3431_v3 = vsel %vm207_vm1, %v7667_v22, -inf }
0x1190   :  { %3416 = vadd.xlane.f32.xlu1 %v3415_v37 }
0x1191   :  { %v3402_v61 = vpop.permute.xlu0 %3401 }
0x1192   :  { %v7672_v49 = vsel %vm163_vm0, %v3388_v11, %v3402_v61  ;;  %v8200_v11 = vld [vmem:[#allocation42_spill] sm:$0xff] }
0x1193   :  { %v3418_v45 = vsel %vm207_vm1, %v7672_v49, 0.0  ;;  %v3434_v17 = vsel %vm207_vm1, %v7672_v49, -inf }
0x1194   :  { %3419 = vadd.xlane.f32.xlu0 %v3418_v45  ;;  %3432 = vmax.xlane.f32.xlu1 %v3431_v3 }
0x1195   :  { %v3404_v30 = vpop.permute.xlu1 %3403 }
0x1196   :  { %v7679_v63 = vsel %vm163_vm0, %v3389_v51, %v3404_v30 }
0x1197   :  { %v3421_v36 = vsel %vm207_vm1, %v7679_v63, 0.0  ;;  %v3437_v28 = vsel %vm207_vm1, %v7679_v63, -inf }
0x1198   :  { %3422 = vadd.xlane.f32.xlu0 %v3421_v36  ;;  %3435 = vmax.xlane.f32.xlu1 %v3434_v17 }
0x1199   :  { %v3406_v40 = vpop.permute.xlu1 %3405 }
0x119a   :  { %v7686_v44 = vsel %vm163_vm0, %v3390_v21, %v3406_v40 }
0x119b   :  { %v3424_v29 = vsel %vm207_vm1, %v7686_v44, 0.0  ;;  %v3440_v27 = vsel %vm207_vm1, %v7686_v44, -inf }
0x119c   :  { %3438 = vmax.xlane.f32.xlu0 %v3437_v28  ;;  %3425 = vadd.xlane.f32.xlu1 %v3424_v29 }
0x11a0   :  { %3441 = vmax.xlane.f32.xlu1 %v3440_v27 }
0x121d   :  { %v3417_v10 = vpop.xlane.xlu1 %3416 }
0x121e   :  { %v3427_v20 = vmul.f32 0.015625, %v3417_v10 }
0x1221   :  { %v3420_v0 = vpop.xlane.xlu0 %3419  ;;  %v3433_v31 = vpop.xlane.xlu1 %3432 }
0x1222   :  { %v3428_v15 = vmul.f32 0.015625, %v3420_v0  ;;  %v3443_v32 = vsel %vm1420_vm6, %v3427_v20, %v3433_v31 }
0x1225   :  { %v3423_v62 = vpop.xlane.xlu0 %3422  ;;  %v3436_v43 = vpop.xlane.xlu1 %3435 }
0x1226   :  { %v3444_v42 = vsel %vm1420_vm6, %v3428_v15, %v3436_v43  ;;  %v3429_v12 = vmul.f32 0.015625, %v3423_v62 }
0x1227   :  { %v5180_v14 = vpack.c.bf16 %v3444_v42, %v3443_v32 }
0x1229   :  { %5181 = vmatpush3.bf16.msra.mxu1 %v5180_v14  ;;  %v3426_v56 = vpop.xlane.xlu1 %3425  ;;  %v3439_v18 = vpop.xlane.xlu0 %3438 }
0x122a   :  { %5182 = vmatprep.subr.bf16.mxu1 %v8178_v47  ;;  %v3430_v39 = vmul.f32 0.015625, %v3426_v56  ;;  %v3445_v6 = vsel %vm1420_vm6, %v3429_v12, %v3439_v18 }
0x122d   :  { %v3442_v7 = vpop.xlane.xlu1 %3441 }
0x122e   :  { %v3446_v9 = vsel %vm1420_vm6, %v3430_v39, %v3442_v7 }
0x122f   :  { %v5183_v48 = vpack.c.bf16 %v3446_v9, %v3445_v6 }
0x1231   :  { %5184 = vmatpush3.bf16.msra.mxu1 %v5183_v48 }
0x1234   :  { %4947 = vmatmul.mubr.msk.f32.vlgmr.msra.gmra.mrb[56].mxu1 %vm163_vm0, %v5541_v59 }
0x1307   :  { %v3513_v19 = vpop.f32.mrb[56].mxu1 }
0x1308   :  { %v3514_v52 = vadd.f32 %v3513_v19, %v8193_v5  ;;  %v4948_v47 = vpop.f32.mrb[57].mxu1 }
0x130a   :  { %v3517_v23 = vmax.f32 %v3514_v52, 0.0 }
0x130c   :  { %4949 = vmatprep.subr.msk.mxu0 %vm1537_vm8, %v3517_v23 }
0x130d   :  { %4950 = vmatpush3.msk.msra.mxu0 %vm1537_vm8, %v3517_v23 }
0x130e   :  { %4952 = vmatmul.mubr.msk.f32.vlgmr.msra.gmra.mrb[18].mxu0 %vm1524_vm7, %v5542_v1  ;;  %5186 = vmatprep.subr.bf16.mxu0 %v8194_v33 }
0x130f   :  { %4954 = vmatprep.mubr.msk.f32.mxu0 %vm1524_vm7, %v5543_v38  ;;  %5188 = vmatpush3.bf16.msra.mxu0 %v8194_v33 }
0x1310   :  { %5190 = vmatprep.subr.bf16.mxu0 %v8195_v60 }
0x1312   :  { %4955 = vmatmul.mubr.msk.f32.gmra.mrb[20].mxu0 %vm1524_vm7, %v5544_v25 }
0x1313   :  { %5192 = vmatpush3.bf16.msra.mxu0 %v8195_v60 }
0x1314   :  { %5194 = vmatprep.subr.bf16.mxu0 %v8196_v41 }
0x13e1   :  { %v4953_v34 = vpop.f32.mrb[18].mxu0 }
0x13e2   :  { %v3593_v35 = vadd.f32 %v4953_v34, %v8197_v16  ;;  %v3587_v46 = vpop.f32.mrb[19].mxu0 }
0x13e3   :  { %v3588_v54 = vadd.f32 %v3587_v46, %v8198_v13 }
0x13e4   :  { %3612 = vrot.lane.b32.xlu1 %v3593_v35, %s5555_s27 }
0x13e5   :  { %v4956_v58 = vpop.f32.mrb[20].mxu0  ;;  %3610 = vrot.lane.b32.xlu0 %v3588_v54, %s5555_s27 }
0x13e6   :  { %v3603_v37 = vadd.f32 %v4956_v58, %v8199_v8  ;;  %v3597_v61 = vpop.f32.mrb[21].mxu0 }
0x13e7   :  { %v3598_v45 = vadd.f32 %v3597_v61, %v8200_v11 }
0x13e9   :  { %3614 = vrot.lane.b32.xlu1 %v3598_v45, %s5555_s27  ;;  %3616 = vrot.lane.b32.xlu0 %v3603_v37, %s5555_s27 }
0x1456   :  { %v3613_v3 = vpop.permute.xlu1 %3612 }
0x1457   :  { %v3623_v51 = vadd.f32 %v3613_v3, %v3593_v35  ;;  %v3611_v30 = vpop.permute.xlu0 %3610 }
0x1458   :  { %v3622_v36 = vadd.f32 %v3611_v30, %v3588_v54 }
0x1459   :  { %v3627_v17 = vsub.f32 0.0, %v3623_v51 }
0x145a   :  { %v3626_v21 = vsub.f32 0.0, %v3622_v36 }
0x145b   :  { %v3632_v40 = vmul.f32 1.442695, %v3627_v17  ;;  %v3615_v28 = vpop.permute.xlu1 %3614  ;;  %v3617_v29 = vpop.permute.xlu0 %3616 }
0x145c   :  { %v3630_v27 = vmul.f32 1.442695, %v3626_v21  ;;  %v3624_v10 = vadd.f32 %v3615_v28, %v3598_v45  ;;  %v3625_v0 = vadd.f32 %v3617_v29, %v3603_v37 }
0x145d   :  { %5450 = vpow2.f32 %v3632_v40 }
0x145e   :  { %5452 = vpow2.f32 %v3630_v27  ;;  %v3628_v31 = vsub.f32 0.0, %v3624_v10  ;;  %v3629_v20 = vsub.f32 0.0, %v3625_v0 }
0x1460   :  { %v3634_v15 = vmul.f32 1.442695, %v3628_v31  ;;  %v3636_v62 = vmul.f32 1.442695, %v3629_v20 }
0x1462   :  { %5454 = vpow2.f32 %v3634_v15 }
0x1463   :  { %5456 = vpow2.f32 %v3636_v62 }
0x1467   :  { %v5451_v43 = vpop.eup %5450 }
0x1468   :  { %v5453_v32 = vpop.eup %5452  ;;  %v3639_v42 = vadd.f32 1.0, %v5451_v43 }
0x1469   :  { %v3638_v14 = vadd.f32 1.0, %v5453_v32 }
0x146a   :  { %5458 = vrcp.f32 %v3639_v42 }
0x146b   :  { %5460 = vrcp.f32 %v3638_v14 }
0x146c   :  { %v5455_v56 = vpop.eup %5454 }
0x146d   :  { %v5457_v18 = vpop.eup %5456  ;;  %v3640_v12 = vadd.f32 1.0, %v5455_v56 }
0x146e   :  { %v3641_v39 = vadd.f32 1.0, %v5457_v18 }
0x146f   :  { %5462 = vrcp.f32 %v3640_v12 }
0x1470   :  { %5464 = vrcp.f32 %v3641_v39 }
0x1474   :  { %v5459_v7 = vpop.eup %5458 }
0x1475   :  { %v5461_v6 = vpop.eup %5460  ;;  %3657 = vperm.xlu0 %5216, %v5459_v7  }
0x1476   :  { %3652 = vperm.xlu1 %5217, %v5461_v6  }
0x1479   :  { %v5463_v9 = vpop.eup %5462 }
0x147a   :  { %v5465_v48 = vpop.eup %5464  ;;  %3662 = vperm.xlu1 %5217, %v5463_v9  }
0x147b   :  { %3667 = vperm.xlu0 %5216, %v5465_v48  }
0x14f4   :  { %v3658_v5 = vpop.permute.xlu0 %3657 }
0x14f5   :  { %v3653_v59 = vpop.permute.xlu1 %3652  ;;  %v3671_v52 = vmul.f32 %v3658_v5, %v7672_v49 }
0x14f6   :  { %v3670_v19 = vmul.f32 %v3653_v59, %v7667_v22 }
0x14f8   :  { %3674 = vxpose.xlu1.b32.start [1/4] (short) (narrow) %v3670_v19, 64 }
0x14f9   :  { %v3663_v47 = vpop.permute.xlu1 %3662 }
0x14fa   :  { %v3672_v23 = vmul.f32 %v3663_v47, %v7679_v63  ;;  %v3668_v1 = vpop.permute.xlu0 %3667 }
0x14fb   :  { %v3673_v33 = vmul.f32 %v3668_v1, %v7686_v44 }
0x14fc   :  { %3675 = vxpose.xlu1.b32.cont [2/4] (short) (narrow) %v3671_v52, 64 }
0x1500   :  { %3676 = vxpose.xlu1.b32.cont [3/4] (short) (narrow) %v3672_v23, 64 }
0x1504   :  { %3677 = vxpose.xlu1.b32.end [4/4] (short) (narrow) %v3673_v33, 64 }
0x1578   :  { %v3690_v38 = vpop.trf.xlu1 }
0x1579   :  { %v3706_v60 = vadd.f32 %v3690_v38, %v7620_v2 }
0x157b   :  { %v3714_v25 = vsel %vm163_vm0, %v3706_v60, 0.0 }
0x157c   :  { %3715 = vadd.xlane.f32.xlu0 %v3714_v25  ;;  %v3691_v22 = vpop.trf.xlu1 }
0x157d   :  { %v3707_v34 = vadd.f32 %v3691_v22, %v7617_v24 }
0x157f   :  { %v3717_v49 = vsel %vm163_vm0, %v3707_v34, 0.0 }
0x1580   :  { %3718 = vadd.xlane.f32.xlu0 %v3717_v49  ;;  %v3692_v16 = vpop.trf.xlu1 }
0x1581   :  { %v3708_v63 = vadd.f32 %v3692_v16, %v7632_v53 }
0x1583   :  { %v3720_v35 = vsel %vm163_vm0, %v3708_v63, 0.0 }
0x1584   :  { %3721 = vadd.xlane.f32.xlu0 %v3720_v35  ;;  %v3693_v44 = vpop.trf.xlu1 }
0x1585   :  { %v3709_v46 = vadd.f32 %v3693_v44, %v7629_v55 }
0x1587   :  { %v3723_v13 = vsel %vm163_vm0, %v3709_v46, 0.0 }
0x1588   :  { %3724 = vadd.xlane.f32.xlu0 %v3723_v13  ;;  %v3694_v54 = vpop.trf.xlu1 }
0x1589   :  { %v3710_v58 = vadd.f32 %v3694_v54, %v7644_v50 }
0x158b   :  { %v3726_v8 = vsel %vm163_vm0, %v3710_v58, 0.0 }
0x158c   :  { %3727 = vadd.xlane.f32.xlu0 %v3726_v8  ;;  %v3695_v37 = vpop.trf.xlu1 }
0x158d   :  { %v3711_v61 = vadd.f32 %v3695_v37, %v7641_v4 }
0x158f   :  { %v3729_v11 = vsel %vm163_vm0, %v3711_v61, 0.0 }
0x1590   :  { %3730 = vadd.xlane.f32.xlu0 %v3729_v11  ;;  %v3696_v45 = vpop.trf.xlu1 }
0x1591   :  { %v3712_v3 = vadd.f32 %v3696_v45, %v7657_v57 }
0x1593   :  { %v3732_v51 = vsel %vm163_vm0, %v3712_v3, 0.0 }
0x1594   :  { %3733 = vadd.xlane.f32.xlu0 %v3732_v51  ;;  %v3697_v30 = vpop.trf.xlu1 }
0x1595   :  { %v3713_v36 = vadd.f32 %v3697_v30, %v7654_v26 }
0x1597   :  { %v3735_v17 = vsel %vm163_vm0, %v3713_v36, 0.0 }
0x1598   :  { %3736 = vadd.xlane.f32.xlu1 %v3735_v17 }
0x1609   :  { %v3716_v21 = vpop.xlane.xlu0 %3715 }
0x160a   :  { %v3738_v40 = vmul.f32 0.03125, %v3716_v21 }
0x160c   :  { %v7751_v28 = vsub.f32 %v3706_v60, %v3738_v40  ;;  %v5545_v40 = vld [vmem:[%s8025_s13] ss:$0 sm:$0xff] }
0x160d   :  { %v3719_v29 = vpop.xlane.xlu0 %3718 }
0x160e   :  { %v3739_v27 = vmul.f32 0.03125, %v3719_v29  ;;  %v3754_v10 = vmul.f32 %v7751_v28, %v7751_v28 }
0x1610   :  { %v7755_v0 = vsub.f32 %v3707_v34, %v3739_v27  ;;  %v3762_v31 = vsel %vm163_vm0, %v3754_v10, 0.0 }
0x1611   :  { %v3722_v20 = vpop.xlane.xlu0 %3721  ;;  %3763 = vadd.xlane.f32.xlu0 %v3762_v31 }
0x1612   :  { %v3740_v15 = vmul.f32 0.03125, %v3722_v20  ;;  %v3755_v62 = vmul.f32 %v7755_v0, %v7755_v0 }
0x1614   :  { %v7760_v43 = vsub.f32 %v3708_v63, %v3740_v15  ;;  %v3765_v32 = vsel %vm163_vm0, %v3755_v62, 0.0  ;;  %v5546_v15 = vld [vmem:[%s8026_s14] ss:$0 sm:$0xff] }
0x1615   :  { %v3725_v42 = vpop.xlane.xlu0 %3724  ;;  %3766 = vadd.xlane.f32.xlu0 %v3765_v32 }
0x1616   :  { %v3741_v14 = vmul.f32 0.03125, %v3725_v42  ;;  %v3756_v56 = vmul.f32 %v7760_v43, %v7760_v43 }
0x1618   :  { %v7765_v18 = vsub.f32 %v3709_v46, %v3741_v14  ;;  %v3768_v12 = vsel %vm163_vm0, %v3756_v56, 0.0 }
0x1619   :  { %v3728_v39 = vpop.xlane.xlu0 %3727  ;;  %3769 = vadd.xlane.f32.xlu0 %v3768_v12 }
0x161a   :  { %v3742_v7 = vmul.f32 0.03125, %v3728_v39  ;;  %v3757_v6 = vmul.f32 %v7765_v18, %v7765_v18 }
0x161c   :  { %v7770_v9 = vsub.f32 %v3710_v58, %v3742_v7  ;;  %v3771_v48 = vsel %vm163_vm0, %v3757_v6, 0.0 }
0x161d   :  { %v3731_v59 = vpop.xlane.xlu0 %3730  ;;  %3772 = vadd.xlane.f32.xlu0 %v3771_v48 }
0x161e   :  { %v3743_v19 = vmul.f32 0.03125, %v3731_v59  ;;  %v3758_v5 = vmul.f32 %v7770_v9, %v7770_v9 }
0x1620   :  { %v7775_v52 = vsub.f32 %v3711_v61, %v3743_v19  ;;  %v3774_v47 = vsel %vm163_vm0, %v3758_v5, 0.0 }
0x1621   :  { %3775 = vadd.xlane.f32.xlu0 %v3774_v47  ;;  %v3734_v23 = vpop.xlane.xlu0 %3733  ;;  %v8201_v47 = vld [vmem:[#allocation6_spill] sm:$0xff] }
0x1622   :  { %v3744_v1 = vmul.f32 0.03125, %v3734_v23  ;;  %v3759_v33 = vmul.f32 %v7775_v52, %v7775_v52 }
0x1624   :  { %v7780_v38 = vsub.f32 %v3712_v3, %v3744_v1  ;;  %v3777_v60 = vsel %vm163_vm0, %v3759_v33, 0.0 }
0x1625   :  { %3778 = vadd.xlane.f32.xlu0 %v3777_v60  ;;  %v3737_v25 = vpop.xlane.xlu1 %3736 }
0x1626   :  { %v3745_v22 = vmul.f32 0.03125, %v3737_v25  ;;  %v3760_v34 = vmul.f32 %v7780_v38, %v7780_v38 }
0x1628   :  { %v7785_v49 = vsub.f32 %v3713_v36, %v3745_v22  ;;  %v3780_v16 = vsel %vm163_vm0, %v3760_v34, 0.0  ;;  %v8202_v22 = vld [vmem:[#allocation7_spill] sm:$0xff] }
0x1629   :  { %3781 = vadd.xlane.f32.xlu0 %v3780_v16 }
0x162a   :  { %v3761_v63 = vmul.f32 %v7785_v49, %v7785_v49 }
0x162c   :  { %v3783_v35 = vsel %vm163_vm0, %v3761_v63, 0.0  ;;  %v8203_v63 = vld [vmem:[#allocation8_spill] sm:$0xff] }
0x162d   :  { %3784 = vadd.xlane.f32.xlu0 %v3783_v35 }
0x169e   :  { %v3764_v44 = vpop.xlane.xlu0 %3763 }
0x169f   :  { %v3786_v46 = vmul.f32 0.03125, %v3764_v44 }
0x16a1   :  { %v3794_v13 = vadd.f32 1e-05, %v3786_v46 }
0x16a2   :  { %v3767_v54 = vpop.xlane.xlu0 %3766 }
0x16a3   :  { %5466 = vrsqrt.f32 %v3794_v13  ;;  %v3787_v58 = vmul.f32 0.03125, %v3767_v54 }
0x16a5   :  { %v3795_v8 = vadd.f32 1e-05, %v3787_v58 }
0x16a6   :  { %v3770_v37 = vpop.xlane.xlu0 %3769 }
0x16a7   :  { %5468 = vrsqrt.f32 %v3795_v8  ;;  %v3788_v61 = vmul.f32 0.03125, %v3770_v37 }
0x16a9   :  { %v3796_v11 = vadd.f32 1e-05, %v3788_v61 }
0x16aa   :  { %v3773_v45 = vpop.xlane.xlu0 %3772 }
0x16ab   :  { %5470 = vrsqrt.f32 %v3796_v11  ;;  %v3789_v3 = vmul.f32 0.03125, %v3773_v45  ;;  %v5547_v11 = vld [vmem:[%s8028_s16] ss:$0 sm:$0xff] }
0x16ad   :  { %v5467_v51 = vpop.eup %5466  ;;  %v3797_v30 = vadd.f32 1e-05, %v3789_v3 }
0x16ae   :  { %v3776_v36 = vpop.xlane.xlu0 %3775  ;;  %v3810_v17 = vmul.f32 %v5467_v51, %v7751_v28 }
0x16af   :  { %5472 = vrsqrt.f32 %v3797_v30  ;;  %v3790_v21 = vmul.f32 0.03125, %v3776_v36 }
0x16b0   :  { %v3818_v29 = vmul.f32 %v5545_v40, %v3810_v17 }
0x16b1   :  { %v5469_v27 = vpop.eup %5468  ;;  %v3798_v10 = vadd.f32 1e-05, %v3790_v21 }
0x16b2   :  { %v3811_v31 = vmul.f32 %v5469_v27, %v7755_v0  ;;  %v3779_v20 = vpop.xlane.xlu0 %3778  ;;  %v3826_v62 = vadd.f32 %v5546_v15, %v3818_v29 }
0x16b3   :  { %5474 = vrsqrt.f32 %v3798_v10  ;;  %v3791_v32 = vmul.f32 0.03125, %v3779_v20 }
0x16b4   :  { %v3819_v28 = vmul.f32 %v5545_v40, %v3811_v31  ;;  %4965 = vmatprep.mubr.msk.f32.mxu0 %vm163_vm0, %v3826_v62 }
0x16b5   :  { %v5471_v42 = vpop.eup %5470  ;;  %v3799_v14 = vadd.f32 1e-05, %v3791_v32 }
0x16b6   :  { %v3827_v56 = vadd.f32 %v5546_v15, %v3819_v28  ;;  %v3782_v12 = vpop.xlane.xlu0 %3781  ;;  %v3812_v39 = vmul.f32 %v5471_v42, %v7760_v43 }
0x16b7   :  { %5476 = vrsqrt.f32 %v3799_v14  ;;  %v3792_v7 = vmul.f32 0.03125, %v3782_v12 }
0x16b8   :  { %4966 = vmatmul.mubr.msk.f32.vlgmr.msra.gmra.mrb[22].mxu0 %vm163_vm0, %v3827_v56  ;;  %v3820_v0 = vmul.f32 %v5545_v40, %v3812_v39 }
0x16b9   :  { %v5473_v6 = vpop.eup %5472  ;;  %v3800_v48 = vadd.f32 1e-05, %v3792_v7  ;;  %5196 = vmatpush3.bf16.msra.mxu0 %v8196_v41 }
0x16ba   :  { %v3785_v59 = vpop.xlane.xlu0 %3784  ;;  %v3828_v19 = vadd.f32 %v5546_v15, %v3820_v0  ;;  %v3813_v5 = vmul.f32 %v5473_v6, %v7765_v18  ;;  %5198 = vmatprep.subr.bf16.mxu0 %v8201_v47 }
0x16bb   :  { %5478 = vrsqrt.f32 %v3800_v48  ;;  %v3793_v23 = vmul.f32 0.03125, %v3785_v59 }
0x16bc   :  { %4968 = vmatprep.mubr.msk.f32.mxu0 %vm163_vm0, %v3828_v19  ;;  %v3821_v43 = vmul.f32 %v5545_v40, %v3813_v5 }
0x16bd   :  { %v5475_v1 = vpop.eup %5474  ;;  %v3801_v33 = vadd.f32 1e-05, %v3793_v23  ;;  %5200 = vmatpush3.bf16.msra.mxu0 %v8201_v47 }
0x16be   :  { %v3829_v60 = vadd.f32 %v5546_v15, %v3821_v43  ;;  %v3814_v25 = vmul.f32 %v5475_v1, %v7770_v9  ;;  %5202 = vmatprep.subr.bf16.mxu0 %v8202_v22 }
0x16bf   :  { %5480 = vrsqrt.f32 %v3801_v33 }
0x16c0   :  { %4969 = vmatmul.mubr.msk.f32.gmra.mrb[24].mxu0 %vm163_vm0, %v3829_v60  ;;  %v3822_v41 = vmul.f32 %v5545_v40, %v3814_v25 }
0x16c1   :  { %v5477_v18 = vpop.eup %5476  ;;  %5204 = vmatpush3.bf16.msra.mxu0 %v8202_v22 }
0x16c2   :  { %v3830_v34 = vadd.f32 %v5546_v15, %v3822_v41  ;;  %v3815_v16 = vmul.f32 %v5477_v18, %v7775_v52  ;;  %5206 = vmatprep.subr.bf16.mxu0 %v8203_v63 }
0x16c4   :  { %4971 = vmatprep.mubr.msk.f32.mxu0 %vm163_vm0, %v3830_v34  ;;  %v3823_v35 = vmul.f32 %v5545_v40, %v3815_v16 }
0x16c5   :  { %v5479_v44 = vpop.eup %5478  ;;  %5208 = vmatpush3.bf16.msra.mxu0 %v8203_v63 }
0x16c6   :  { %v3831_v9 = vadd.f32 %v5546_v15, %v3823_v35  ;;  %v3816_v46 = vmul.f32 %v5479_v44, %v7780_v38 }
0x16c8   :  { %4972 = vmatmul.mubr.msk.f32.gmra.mrb[26].mxu0 %vm163_vm0, %v3831_v9  ;;  %v3824_v13 = vmul.f32 %v5545_v40, %v3816_v46 }
0x16c9   :  { %v5481_v54 = vpop.eup %5480 }
0x16ca   :  { %v3832_v58 = vadd.f32 %v5546_v15, %v3824_v13  ;;  %v3817_v8 = vmul.f32 %v5481_v54, %v7785_v49 }
0x16cc   :  { %4974 = vmatprep.mubr.msk.f32.mxu0 %vm163_vm0, %v3832_v58  ;;  %v3825_v52 = vmul.f32 %v5545_v40, %v3817_v8 }
0x16ce   :  { %v3833_v37 = vadd.f32 %v5546_v15, %v3825_v52 }
0x16d0   :  { %4975 = vmatmul.mubr.msk.f32.gmra.mrb[28].mxu0 %vm163_vm0, %v3833_v37 }
0x178b   :  { %v4967_v61 = vpop.f32.mrb[22].mxu0 }
0x178c   :  { %v3930_v45 = vadd.f32 %v5547_v11, %v4967_v61  ;;  %v3924_v38 = vpop.f32.mrb[23].mxu0 }
0x178d   :  { %v3925_v3 = vadd.f32 %v5547_v11, %v3924_v38 }
0x178e   :  { %v7823_v51 = vmul.f32 0.70710677, %v3930_v45  ;;  %v7864_v38 = vmul.f32 0.5, %v3930_v45 }
0x178f   :  { %v7825_v30 = vmul.f32 0.70710677, %v3925_v3 }
0x1790   :  { %v3980_v49 = vand.u32 2147483647, %v7823_v51  ;;  %vm4140_vm2 = vcmp.ge.f32.partialorder %v7823_v51, 0.0 }
0x1791   :  { %v3979_v36 = vand.u32 2147483647, %v7825_v30  ;;  %vm4139_vm6 = vcmp.ge.f32.partialorder %v7825_v30, 0.0 }
0x1792   :  { %v3988_v17 = vmul.f32 0.3275911, %v3980_v49  ;;  %v4092_v62 = vsub.f32 0.0, %v3980_v49 }
0x1793   :  { %v3987_v21 = vmul.f32 0.3275911, %v3979_v36  ;;  %v4970_v40 = vpop.f32.mrb[24].mxu0  ;;  %v4091_v42 = vsub.f32 0.0, %v3979_v36 }
0x1794   :  { %v3996_v29 = vadd.f32 1.0, %v3988_v17  ;;  %v7829_v27 = vadd.f32 %v5547_v11, %v4970_v40  ;;  %v3934_v10 = vpop.f32.mrb[25].mxu0  ;;  %v4100_v12 = vmul.f32 %v4092_v62, %v3980_v49  ;;  %v7867_v17 = vmul.f32 0.5, %v3925_v3 }
0x1795   :  { %v3995_v31 = vadd.f32 1.0, %v3987_v21  ;;  %v7831_v20 = vadd.f32 %v5547_v11, %v3934_v10  ;;  %v4099_v59 = vmul.f32 %v4091_v42, %v3979_v36 }
0x1796   :  { %5482 = vrcp.f32 %v3996_v29  ;;  %v7834_v15 = vmul.f32 0.70710677, %v7829_v27  ;;  %v4109_v23 = vmul.f32 1.442695, %v4100_v12 }
0x1797   :  { %5484 = vrcp.f32 %v3995_v31  ;;  %v7837_v32 = vmul.f32 0.70710677, %v7831_v20  ;;  %v4107_v41 = vmul.f32 1.442695, %v4099_v59 }
0x1798   :  { %v3982_v28 = vand.u32 2147483647, %v7834_v15  ;;  %vm4142_vm7 = vcmp.ge.f32.partialorder %v7834_v15, 0.0 }
0x1799   :  { %v3981_v14 = vand.u32 2147483647, %v7837_v32  ;;  %vm4141_vm8 = vcmp.ge.f32.partialorder %v7837_v32, 0.0 }
0x179a   :  { %v3990_v56 = vmul.f32 0.3275911, %v3982_v28  ;;  %v4094_v33 = vsub.f32 0.0, %v3982_v28 }
0x179b   :  { %v3989_v39 = vmul.f32 0.3275911, %v3981_v14  ;;  %v4973_v7 = vpop.f32.mrb[26].mxu0  ;;  %v4093_v35 = vsub.f32 0.0, %v3981_v14 }
0x179c   :  { %v3998_v0 = vadd.f32 1.0, %v3990_v56  ;;  %v7841_v6 = vadd.f32 %v5547_v11, %v4973_v7  ;;  %v3944_v48 = vpop.f32.mrb[27].mxu0  ;;  %v4102_v13 = vmul.f32 %v4094_v33, %v3982_v28 }
0x179d   :  { %v3997_v19 = vadd.f32 1.0, %v3989_v39  ;;  %v7843_v5 = vadd.f32 %v5547_v11, %v3944_v48  ;;  %v4101_v31 = vmul.f32 %v4093_v35, %v3981_v14 }
0x179e   :  { %5486 = vrcp.f32 %v3998_v0  ;;  %v7846_v47 = vmul.f32 0.70710677, %v7841_v6  ;;  %v4113_v10 = vmul.f32 1.442695, %v4102_v13 }
0x179f   :  { %5488 = vrcp.f32 %v3997_v19  ;;  %v7849_v43 = vmul.f32 0.70710677, %v7843_v5 }
0x17a0   :  { %v7851_v1 = vpop.eup %5482  ;;  %v3984_v60 = vand.u32 2147483647, %v7846_v47  ;;  %5490 = vpow2.f32 %v4109_v23  ;;  %v4111_v23 = vmul.f32 1.442695, %v4101_v31  ;;  %vm4144_vm13 = vcmp.ge.f32.partialorder %v7846_v47, 0.0 }
0x17a1   :  { %v7854_v25 = vpop.eup %5484  ;;  %v4020_v22 = vmul.f32 1.0614054, %v7851_v1  ;;  %v3983_v18 = vand.u32 2147483647, %v7849_v43  ;;  %5492 = vpow2.f32 %v4107_v41  ;;  %vm4143_vm14 = vcmp.ge.f32.partialorder %v7849_v43, 0.0 }
0x17a2   :  { %v4019_v34 = vmul.f32 1.0614054, %v7854_v25  ;;  %v3992_v16 = vmul.f32 0.3275911, %v3984_v60  ;;  %v4096_v3 = vsub.f32 0.0, %v3984_v60  ;;  %v3968_v47 = vmul.f32 0.5, %v7841_v6 }
0x17a3   :  { %v4028_v63 = vadd.f32 -1.4531521, %v4020_v22  ;;  %v3991_v44 = vmul.f32 0.3275911, %v3983_v18  ;;  %v4976_v9 = vpop.f32.mrb[28].mxu0  ;;  %v4095_v39 = vsub.f32 0.0, %v3983_v18 }
0x17a4   :  { %v4027_v46 = vadd.f32 -1.4531521, %v4019_v34  ;;  %v4000_v54 = vadd.f32 1.0, %v3992_v16  ;;  %v7859_v58 = vadd.f32 %v5547_v11, %v4976_v9  ;;  %v3954_v8 = vpop.f32.mrb[29].mxu0 }
0x17a5   :  { %v4036_v52 = vmul.f32 %v7851_v1, %v4028_v63  ;;  %v3999_v37 = vadd.f32 1.0, %v3991_v44  ;;  %v7862_v61 = vadd.f32 %v5547_v11, %v3954_v8  ;;  %v4104_v44 = vmul.f32 %v4096_v3, %v3984_v60 }
0x17a6   :  { %v4035_v49 = vmul.f32 %v7854_v25, %v4027_v46  ;;  %5494 = vrcp.f32 %v4000_v54  ;;  %v7870_v21 = vmul.f32 0.70710677, %v7859_v58  ;;  %v4103_v9 = vmul.f32 %v4095_v39, %v3983_v18 }
0x17a7   :  { %v4044_v36 = vadd.f32 1.4214138, %v4036_v52  ;;  %5496 = vrcp.f32 %v3999_v37  ;;  %v7875_v11 = vmul.f32 0.70710677, %v7862_v61 }
0x17a8   :  { %v7872_v40 = vpop.eup %5486  ;;  %v4043_v29 = vadd.f32 1.4214138, %v4035_v49  ;;  %v7882_v42 = vand.u32 2147483647, %v7870_v21  ;;  %5498 = vpow2.f32 %v4113_v10  ;;  %v7899_v49 = vmul.f32 0.5, %v7831_v20 }
0x17a9   :  { %v7877_v45 = vpop.eup %5488  ;;  %v4052_v62 = vmul.f32 %v7851_v1, %v4044_v36  ;;  %v4022_v28 = vmul.f32 1.0614054, %v7872_v40  ;;  %v7887_v14 = vand.u32 2147483647, %v7875_v11  ;;  %v4115_v39 = vmul.f32 1.442695, %v4103_v9 }
0x17aa   :  { %v4051_v56 = vmul.f32 %v7854_v25, %v4043_v29  ;;  %v4021_v12 = vmul.f32 1.0614054, %v7877_v45  ;;  %v3994_v48 = vmul.f32 0.3275911, %v7882_v42  ;;  %v5491_v33 = vpop.eup %5490  ;;  %vm4146_vm15 = vcmp.ge.f32.partialorder %v7870_v21, 0.0 }
0x17ab   :  { %v4060_v7 = vadd.f32 -0.28449672, %v4052_v62  ;;  %v4030_v0 = vadd.f32 -1.4531521, %v4022_v28  ;;  %v3993_v16 = vmul.f32 0.3275911, %v7887_v14  ;;  %v5493_v46 = vpop.eup %5492 }
0x17ac   :  { %v4059_v59 = vadd.f32 -0.28449672, %v4051_v56  ;;  %v4029_v19 = vadd.f32 -1.4531521, %v4021_v12  ;;  %v4002_v34 = vadd.f32 1.0, %v3994_v48  ;;  %v4098_v48 = vsub.f32 0.0, %v7882_v42 }
0x17ad   :  { %v4068_v22 = vmul.f32 %v7851_v1, %v4060_v7  ;;  %v4038_v41 = vmul.f32 %v7872_v40, %v4030_v0  ;;  %v4001_v8 = vadd.f32 1.0, %v3993_v16  ;;  %v4117_v28 = vmul.f32 1.442695, %v4104_v44  ;;  %v5548_v21 = vld [vmem:[%s8029_s18] ss:$0 sm:$0xff] }
0x17ae   :  { %v4067_v63 = vmul.f32 %v7854_v25, %v4059_v59  ;;  %v4037_v35 = vmul.f32 %v7877_v45, %v4029_v19  ;;  %5500 = vrcp.f32 %v4002_v34  ;;  %vm4145_vm3 = vcmp.ge.f32.partialorder %v7875_v11, 0.0 }
0x17af   :  { %v4076_v13 = vadd.f32 0.2548296, %v4068_v22  ;;  %v4046_v54 = vadd.f32 1.4214138, %v4038_v41  ;;  %5502 = vpow2.f32 %v4111_v23 }
0x17b0   :  { %v7895_v52 = vpop.eup %5494  ;;  %v4075_v37 = vadd.f32 0.2548296, %v4067_v63  ;;  %v4045_v36 = vadd.f32 1.4214138, %v4037_v35  ;;  %5504 = vrcp.f32 %v4001_v8 }
0x17b1   :  { %v7901_v29 = vpop.eup %5496  ;;  %v4084_v60 = vmul.f32 %v7851_v1, %v4076_v13  ;;  %v4054_v18 = vmul.f32 %v7872_v40, %v4046_v54  ;;  %v4024_v10 = vmul.f32 1.0614054, %v7895_v52  ;;  %5506 = vpow2.f32 %v4117_v28 }
0x17b2   :  { %v4083_v31 = vmul.f32 %v7854_v25, %v4075_v37  ;;  %v4053_v62 = vmul.f32 %v7877_v45, %v4045_v36  ;;  %v4023_v20 = vmul.f32 1.0614054, %v7901_v29  ;;  %v4097_v25 = vsub.f32 0.0, %v7887_v14  ;;  %v5499_v22 = vpop.eup %5498 }
0x17b3   :  { %v4124_v3 = vmul.f32 %v5491_v33, %v4084_v60  ;;  %v4062_v56 = vadd.f32 -0.28449672, %v4054_v18  ;;  %v4032_v12 = vadd.f32 -1.4531521, %v4024_v10  ;;  %5508 = vpow2.f32 %v4115_v39 }
0x17b4   :  { %v4123_v7 = vmul.f32 %v5493_v46, %v4083_v31  ;;  %v4061_v1 = vadd.f32 -0.28449672, %v4053_v62  ;;  %v4031_v0 = vadd.f32 -1.4531521, %v4023_v20  ;;  %v4106_v13 = vmul.f32 %v4098_v48, %v7882_v42 }
0x17b5   :  { %v4132_v59 = vsub.f32 1.0, %v4124_v3  ;;  %v4070_v19 = vmul.f32 %v7872_v40, %v4062_v56  ;;  %v4040_v23 = vmul.f32 %v7895_v52, %v4032_v12  ;;  %v4105_v60 = vmul.f32 %v4097_v25, %v7887_v14 }
0x17b6   :  { %v4131_v41 = vsub.f32 1.0, %v4123_v7  ;;  %v4069_v34 = vmul.f32 %v7877_v45, %v4061_v1  ;;  %v4039_v33 = vmul.f32 %v7901_v29, %v4031_v0  ;;  %v4121_v39 = vmul.f32 1.442695, %v4106_v13 }
0x17b7   :  { %v4148_v16 = vsub.f32 0.0, %v4132_v59  ;;  %v4078_v63 = vadd.f32 0.2548296, %v4070_v19  ;;  %v4048_v35 = vadd.f32 1.4214138, %v4040_v23 }
0x17b8   :  { %v4147_v44 = vsub.f32 0.0, %v4131_v41  ;;  %v4077_v9 = vadd.f32 0.2548296, %v4069_v34  ;;  %v4047_v46 = vadd.f32 1.4214138, %v4039_v33  ;;  %v7918_v54 = vpop.eup %5500  ;;  %5510 = vpow2.f32 %v4121_v39 }
0x17b9   :  { %v4156_v8 = vsel %vm4140_vm2, %v4132_v59, %v4148_v16  ;;  %v4086_v37 = vmul.f32 %v7872_v40, %v4078_v63  ;;  %v4056_v36 = vmul.f32 %v7895_v52, %v4048_v35  ;;  %v5503_v18 = vpop.eup %5502  ;;  %v4026_v40 = vmul.f32 1.0614054, %v7918_v54 }
0x17ba   :  { %v4164_v10 = vadd.f32 1.0, %v4156_v8  ;;  %v4155_v31 = vsel %vm4139_vm6, %v4131_v41, %v4147_v44  ;;  %v4085_v62 = vmul.f32 %v7877_v45, %v4077_v9  ;;  %v4055_v42 = vmul.f32 %v7901_v29, %v4047_v46  ;;  %v7929_v28 = vpop.eup %5504 }
0x17bb   :  { %v4163_v20 = vadd.f32 1.0, %v4155_v31  ;;  %v4126_v51 = vmul.f32 %v5499_v22, %v4086_v37  ;;  %v4064_v3 = vadd.f32 -0.28449672, %v4056_v36  ;;  %v4025_v14 = vmul.f32 1.0614054, %v7929_v28  ;;  %v5507_v34 = vpop.eup %5506 }
0x17bc   :  { %v4125_v56 = vmul.f32 %v5503_v18, %v4085_v62  ;;  %v4063_v12 = vadd.f32 -0.28449672, %v4055_v42  ;;  %v4034_v45 = vadd.f32 -1.4531521, %v4026_v40  ;;  %v4172_v0 = vmul.f32 %v4164_v10, %v7864_v38 }
0x17bd   :  { %v4171_v7 = vmul.f32 %v4163_v20, %v7867_v17  ;;  %v4134_v30 = vsub.f32 1.0, %v4126_v51  ;;  %v4072_v1 = vmul.f32 %v7895_v52, %v4064_v3  ;;  %v4033_v19 = vadd.f32 -1.4531521, %v4025_v14  ;;  %v5509_v38 = vpop.eup %5508 }
0x17be   :  { %v4133_v48 = vsub.f32 1.0, %v4125_v56  ;;  %v4071_v59 = vmul.f32 %v7901_v29, %v4063_v12  ;;  %v4042_v22 = vmul.f32 %v7918_v54, %v4034_v45  ;;  %v4119_v41 = vmul.f32 1.442695, %v4105_v60 }
0x17bf   :  { %v4150_v23 = vsub.f32 0.0, %v4134_v30  ;;  %v4080_v25 = vadd.f32 0.2548296, %v4072_v1  ;;  %4993 = vmatprep.mubr.msk.f32.mxu0 %vm207_vm1, %v4171_v7  ;;  %v4041_v16 = vmul.f32 %v7929_v28, %v4033_v19  ;;  %v3966_v60 = vmul.f32 0.5, %v7829_v27 }
0x17c0   :  { %v4149_v17 = vsub.f32 0.0, %v4133_v48  ;;  %v4079_v33 = vadd.f32 0.2548296, %v4071_v59  ;;  %4994 = vmatmul.mubr.msk.f32.vlgmr.msra.gmra.mrb[30].mxu0 %vm207_vm1, %v4172_v0  ;;  %v4050_v44 = vadd.f32 1.4214138, %v4042_v22  ;;  %5512 = vpow2.f32 %v4119_v41 }
0x17c1   :  { %v4158_v63 = vsel %vm4142_vm7, %v4134_v30, %v4150_v23  ;;  %v4088_v35 = vmul.f32 %v7895_v52, %v4080_v25  ;;  %v4049_v8 = vadd.f32 1.4214138, %v4041_v16  ;;  %v3967_v7 = vmul.f32 0.5, %v7843_v5 }
0x17c2   :  { %v4166_v9 = vadd.f32 1.0, %v4158_v63  ;;  %v4157_v46 = vsel %vm4141_vm8, %v4133_v48, %v4149_v17  ;;  %v4087_v13 = vmul.f32 %v7901_v29, %v4079_v33  ;;  %v4058_v36 = vmul.f32 %v7918_v54, %v4050_v44  ;;  %v5511_v14 = vpop.eup %5510 }
0x17c3   :  { %v4165_v32 = vadd.f32 1.0, %v4157_v46  ;;  %v4128_v37 = vmul.f32 %v5507_v34, %v4088_v35  ;;  %v4057_v15 = vmul.f32 %v7929_v28, %v4049_v8  ;;  %v3969_v41 = vmul.f32 0.5, %v7862_v61 }
0x17c4   :  { %v4127_v18 = vmul.f32 %v5509_v38, %v4087_v13  ;;  %v4066_v31 = vadd.f32 -0.28449672, %v4058_v36  ;;  %v4174_v62 = vmul.f32 %v4166_v9, %v3966_v60  ;;  %v3970_v17 = vmul.f32 0.5, %v7859_v58 }
0x17c5   :  { %v4173_v10 = vmul.f32 %v4165_v32, %v7899_v49  ;;  %v4136_v52 = vsub.f32 1.0, %v4128_v37  ;;  %v4065_v20 = vadd.f32 -0.28449672, %v4057_v15 }
0x17c6   :  { %v4135_v42 = vsub.f32 1.0, %v4127_v18  ;;  %v4074_v29 = vmul.f32 %v7918_v54, %v4066_v31 }
0x17c7   :  { %v4152_v51 = vsub.f32 0.0, %v4136_v52  ;;  %4996 = vmatprep.mubr.msk.f32.mxu0 %vm207_vm1, %v4173_v10  ;;  %v4073_v27 = vmul.f32 %v7929_v28, %v4065_v20 }
0x17c8   :  { %v4151_v3 = vsub.f32 0.0, %v4135_v42  ;;  %4997 = vmatmul.mubr.msk.f32.gmra.mrb[32].mxu0 %vm207_vm1, %v4174_v62  ;;  %v4082_v49 = vadd.f32 0.2548296, %v4074_v29 }
0x17c9   :  { %v4160_v40 = vsel %vm4144_vm13, %v4136_v52, %v4152_v51  ;;  %v4081_v39 = vadd.f32 0.2548296, %v4073_v27 }
0x17ca   :  { %v4168_v56 = vadd.f32 1.0, %v4160_v40  ;;  %v4159_v12 = vsel %vm4143_vm14, %v4135_v42, %v4151_v3  ;;  %v4090_v1 = vmul.f32 %v7918_v54, %v4082_v49  ;;  %v5513_v0 = vpop.eup %5512 }
0x17cb   :  { %v4167_v30 = vadd.f32 1.0, %v4159_v12  ;;  %v4089_v45 = vmul.f32 %v7929_v28, %v4081_v39 }
0x17cc   :  { %v4130_v59 = vmul.f32 %v5511_v14, %v4090_v1  ;;  %v4176_v19 = vmul.f32 %v4168_v56, %v3968_v47 }
0x17cd   :  { %v4175_v48 = vmul.f32 %v4167_v30, %v3967_v7  ;;  %v4129_v23 = vmul.f32 %v5513_v0, %v4089_v45 }
0x17ce   :  { %v4138_v43 = vsub.f32 1.0, %v4130_v59 }
0x17cf   :  { %4999 = vmatprep.mubr.msk.f32.mxu0 %vm207_vm1, %v4175_v48  ;;  %v4137_v25 = vsub.f32 1.0, %v4129_v23 }
0x17d0   :  { %5000 = vmatmul.mubr.msk.f32.gmra.mrb[34].mxu0 %vm207_vm1, %v4176_v19  ;;  %v4154_v22 = vsub.f32 0.0, %v4138_v43 }
0x17d1   :  { %v4153_v5 = vsub.f32 0.0, %v4137_v25 }
0x17d2   :  { %v4162_v54 = vsel %vm4146_vm15, %v4138_v43, %v4154_v22 }
0x17d3   :  { %v4170_v6 = vadd.f32 1.0, %v4162_v54  ;;  %v4161_v28 = vsel %vm4145_vm3, %v4137_v25, %v4153_v5 }
0x17d4   :  { %v4169_v34 = vadd.f32 1.0, %v4161_v28 }
0x17d5   :  { %v4178_v16 = vmul.f32 %v4170_v6, %v3970_v17 }
0x17d6   :  { %v4177_v33 = vmul.f32 %v4169_v34, %v3969_v41 }
0x17d8   :  { %5002 = vmatprep.mubr.msk.f32.mxu0 %vm207_vm1, %v4177_v33 }
0x17d9   :  { %5003 = vmatmul.mubr.msk.f32.gmra.mrb[36].mxu0 %vm207_vm1, %v4178_v16 }
0x1893   :  { %v4995_v38 = vpop.f32.mrb[30].mxu0 }
0x1894   :  { %v4275_v63 = vadd.f32 %v5548_v21, %v4995_v38  ;;  %v4269_v11 = vpop.f32.mrb[31].mxu0 }
0x1895   :  { %v4270_v35 = vadd.f32 %v5548_v21, %v4269_v11 }
0x1896   :  { %v4309_v44 = vadd.f32 %v4275_v63, %v7617_v24 }
0x1897   :  { %v4308_v61 = vadd.f32 %v4270_v35, %v7620_v2 }
0x1898   :  { %4420 = vst.msk [vmem:[%s8030_s19 + $0x48] sm:$0xff] %vm163_vm0, %v4309_v44 }
0x1899   :  { %4419 = vst.msk [vmem:[%s8030_s19 + $0x40] sm:$0xff] %vm163_vm0, %v4308_v61 }
0x189b   :  { %v4998_v58 = vpop.f32.mrb[32].mxu0 }
0x189c   :  { %v4285_v9 = vadd.f32 %v5548_v21, %v4998_v58  ;;  %v4279_v46 = vpop.f32.mrb[33].mxu0 }
0x189d   :  { %v4280_v13 = vadd.f32 %v5548_v21, %v4279_v46 }
0x189e   :  { %v4311_v8 = vadd.f32 %v4285_v9, %v7629_v55 }
0x189f   :  { %v4310_v24 = vadd.f32 %v4280_v13, %v7632_v53 }
0x18a0   :  { %4422 = vst.msk [vmem:[%s8030_s19 + $0x58] sm:$0xff] %vm163_vm0, %v4311_v8 }
0x18a1   :  { %4421 = vst.msk [vmem:[%s8030_s19 + $0x50] sm:$0xff] %vm163_vm0, %v4310_v24 }
0x18a3   :  { %v5001_v2 = vpop.f32.mrb[34].mxu0 }
0x18a4   :  { %v4295_v32 = vadd.f32 %v5548_v21, %v5001_v2  ;;  %v4289_v37 = vpop.f32.mrb[35].mxu0 }
0x18a5   :  { %v4290_v36 = vadd.f32 %v5548_v21, %v4289_v37 }
0x18a6   :  { %v4313_v60 = vadd.f32 %v4295_v32, %v7641_v4 }
0x18a7   :  { %v4312_v55 = vadd.f32 %v4290_v36, %v7644_v50 }
0x18a8   :  { %4424 = vst.msk [vmem:[%s8030_s19 + $0x68] sm:$0xff] %vm163_vm0, %v4313_v60 }
0x18a9   :  { %4423 = vst.msk [vmem:[%s8030_s19 + $0x60] sm:$0xff] %vm163_vm0, %v4312_v55 }
0x18ac   :  { %v5004_v53 = vpop.f32.mrb[36].mxu0 }
0x18ad   :  { %v4305_v18 = vadd.f32 %v5548_v21, %v5004_v53  ;;  %v4299_v15 = vpop.f32.mrb[37].mxu0 }
0x18ae   :  { %v4300_v10 = vadd.f32 %v5548_v21, %v4299_v15 }
0x18af   :  { %v4315_v52 = vadd.f32 %v4305_v18, %v7654_v26 }
0x18b0   :  { %v4314_v4 = vadd.f32 %v4300_v10, %v7657_v57 }
0x18b1   :  { %4426 = vst.msk [vmem:[%s8030_s19 + $0x78] sm:$0xff] %vm163_vm0, %v4315_v52 }
0x18b2   :  { %4425 = vst.msk [vmem:[%s8030_s19 + $0x70] sm:$0xff] %vm163_vm0, %v4314_v4 }

</bundles_post_ra>
